<compile_context>
chip_gen: v7x
topology: tpu7x:2x2x1
jax: 0.10.0
libtpu: 0.0.40
codegen_flags: <defaults>
</compile_context>

<pallas_src>
import functools

import jax
import jax.numpy as jnp
from jax.experimental import pallas as pl
from jax.experimental.pallas import tpu as pltpu


def _round_up(x, m):
    return ((x + m - 1) // m) * m


def _vmem_capacity_bytes():
    """Per-TensorCore VMEM capacity; conservative fallback if unavailable."""
    try:
        info = pltpu.get_tpu_info()
        cap = getattr(info, "vmem_capacity_bytes", None)
        if cap:
            return int(cap)
    except Exception:
        pass
    return 64 * 1024 * 1024  # v7x per-TC figure: safe lower bound everywhere


def _pick_tiling(batch, d_in, x_itemsize, block_b):
    """Pick (batch tile, vmem_limit_bytes) from the per-generation VMEM size."""
    vmem_cap = _vmem_capacity_bytes()
    # Per-generation scoped-VMEM budget: ~56 MiB on v7x (64 MiB physical),
    # ~100 MiB on v5e/v6e (128 MiB physical).
    vmem_limit = max(32 << 20, min(vmem_cap - (8 << 20), 100 << 20))

    # Resident, double-buffered W1: the 25-wide lane dim pads to 128.
    w1_resident = 2 * d_in * 128 * x_itemsize
    # Headroom for bias/W2/W3 blocks, output blocks, epilogue temporaries.
    misc = 6 << 20
    x_budget = vmem_limit - w1_resident - misc

    bb = x_budget // (2 * d_in * x_itemsize)       # X slab is double-buffered
    bb = max(8, (bb // 8) * 8)
    bb = min(bb, 1024)                             # per-step DMA already >> 8 MiB
    if block_b is not None:
        bb = min(bb, max(8, _round_up(block_b, 8)))

    if batch <= bb:
        if batch >= 16:
            # Guarantee >= 2 batch tiles so the "parallel" axis can shard
            # across both v7x TensorCores.
            bb = _round_up(-(-batch // 2), 8)
        else:
            bb = batch   # single tile == full array dim (no (8,128) constraint)
    return bb, vmem_limit


def _mlp_kernel(x_ref, w1_ref, b1_ref, w2_ref, b2_ref, w3_ref, b3_ref, o_ref):
    # Layer 1: the dominant MXU / DMA work.  bf16 or f32 inputs, f32
    # accumulation via preferred_element_type.  DEFAULT MXU precision is used
    # (acceptable here; bf16 inputs are the recommended path).
    # TODO(synk): expose precision=lax.Precision.HIGHEST for the f32 path if
    # an exact-f32 layer-1 matmul is ever required (multi-pass MXU on v5e).
    h1 = jnp.dot(x_ref[...], w1_ref[...], preferred_element_type=jnp.float32)
    h1 = jnp.maximum(h1 + b1_ref[...], 0.0)

    # Tiny fused layers (~0.03% of FLOPs) hidden under the X DMA.  All f32
    # (v5e VPU has no bf16).  Output last dim is 6 (<128 lanes) -> masked
    # stores, but the write volume is negligible.
    h2 = jnp.dot(h1, w2_ref[...], preferred_element_type=jnp.float32)
    h2 = jnp.maximum(h2 + b2_ref[...], 0.0)
    o = jnp.dot(h2, w3_ref[...], preferred_element_type=jnp.float32) + b3_ref[...]
    o_ref[...] = o.astype(o_ref.dtype)


@functools.partial(jax.jit, static_argnames=("block_b", "use_bf16_inputs"))
def binary_cross_model_forward(x, w1, b1, w2, b2, w3, b3, *,
                               block_b=None, use_bf16_inputs=True):
    B, D_in = x.shape
    H1 = w1.shape[1]
    H2 = w2.shape[1]
    D_out = w3.shape[1]

    if use_bf16_inputs:
        # Halves the dominant HBM X read.  Cheapest when the caller already
        # holds X in bf16 (the cast is skipped); otherwise the one-off convert
        # is amortized across reuse of the bf16 copy.
        if x.dtype != jnp.bfloat16:
            x = x.astype(jnp.bfloat16)
        if w1.dtype != jnp.bfloat16:
            w1 = w1.astype(jnp.bfloat16)
    else:
        x = x.astype(jnp.float32)
        w1 = w1.astype(jnp.float32)
    # Keep the tiny layers and the epilogue strictly f32.
    b1 = b1.astype(jnp.float32)
    w2 = w2.astype(jnp.float32)
    b2 = b2.astype(jnp.float32)
    w3 = w3.astype(jnp.float32)
    b3 = b3.astype(jnp.float32)

    bb, vmem_limit = _pick_tiling(B, D_in, x.dtype.itemsize, block_b)
    grid = (pl.cdiv(B, bb),)

    # Constant-index blocks are DMA'd once and stay resident across the grid.
    # TODO(synk): pipeline_mode=pl.Buffered(1) on these specs would reclaim
    # their second pipeline buffer (~3-6 MiB for W1); left at the default
    # until that path is verified on all target jax versions (the VMEM budget
    # above already accounts for the double buffer).
    const = lambda shape: pl.BlockSpec(shape, lambda i: (0, 0))

    flops = 2 * B * (D_in * H1 + H1 * H2 + H2 * D_out)
    bytes_accessed = (
        x.size * x.dtype.itemsize
        + w1.size * w1.dtype.itemsize + b1.size * b1.dtype.itemsize
        + w2.size * w2.dtype.itemsize + b2.size * b2.dtype.itemsize
        + w3.size * w3.dtype.itemsize + b3.size * b3.dtype.itemsize
        + B * D_out * 4)

    return pl.pallas_call(
        _mlp_kernel,
        out_shape=jax.ShapeDtypeStruct((B, D_out), jnp.float32),
        grid_spec=pltpu.PrefetchScalarGridSpec(
            num_scalar_prefetch=0,
            grid=grid,
            in_specs=[
                pl.BlockSpec((bb, D_in), lambda i: (i, 0)),   # X slab
                const((D_in, H1)),                            # W1 (resident)
                const(b1.shape),
                const(w2.shape), const(b2.shape),
                const(w3.shape), const(b3.shape),
            ],
            out_specs=pl.BlockSpec((bb, D_out), lambda i: (i, 0)),
        ),
        compiler_params=pltpu.CompilerParams(
            dimension_semantics=("parallel",),
            vmem_limit_bytes=vmem_limit,
        ),
        cost_estimate=pl.CostEstimate(
            flops=flops, transcendentals=0, bytes_accessed=bytes_accessed),
    )(x, w1, b1, w2, b2, w3, b3)


def _init_linear(key, fan_in, fan_out):
    # Deterministic init mimicking torch.nn.Linear's U(-1/sqrt(fan_in), ...).
    kw, kb = jax.random.split(key)
    bound = 1.0 / jnp.sqrt(fan_in)
    # Stored as (in, out) so the kernel computes x @ W + b.
    w = jax.random.uniform(kw, (fan_in, fan_out), jnp.float32, -bound, bound)
    b = jax.random.uniform(kb, (1, fan_out), jnp.float32, -bound, bound)
    return w, b


def _reference_forward(x, w1, b1, w2, b2, w3, b3):
    h1 = jnp.maximum(x @ w1 + b1, 0.0)
    h2 = jnp.maximum(h1 @ w2 + b2, 0.0)
    return h2 @ w3 + b3


if __name__ == "__main__":
    key = jax.random.PRNGKey(0)
    k_x, k1, k2, k3 = jax.random.split(key, 4)

    batch = 8  # small demo batch; feature dim 12288 is fixed by the module
    x = jax.random.normal(k_x, (batch, 12288), jnp.float32)

    w1, b1 = _init_linear(k1, 12288, 25)
    w2, b2 = _init_linear(k2, 25, 12)
    w3, b3 = _init_linear(k3, 12, 6)

    # Default (recommended) path: bf16 X/W1 stream, f32 accumulation/epilogue.
    out = jax.block_until_ready(
        binary_cross_model_forward(x, w1, b1, w2, b2, w3, b3))
    ref_bf16 = _reference_forward(
        x.astype(jnp.bfloat16).astype(jnp.float32),
        w1.astype(jnp.bfloat16).astype(jnp.float32), b1, w2, b2, w3, b3)
    assert out.shape == (batch, 6)
    assert jnp.allclose(out, ref_bf16, atol=2e-3, rtol=2e-3), \
        "bf16-path mismatch vs reference"

    # Guarded strict-f32 input path (default MXU precision; looser tolerance).
    out_f32 = jax.block_until_ready(
        binary_cross_model_forward(x, w1, b1, w2, b2, w3, b3,
                                   use_bf16_inputs=False))
    ref_f32 = _reference_forward(x, w1, b1, w2, b2, w3, b3)
    assert jnp.allclose(out_f32, ref_f32, atol=2e-2, rtol=2e-2), \
        "f32-path mismatch vs reference"

    print("KERNEL_OK")
</pallas_src>

<mosaic_0001>
module attributes {stable_mosaic.version = 11 : i64} {
  func.func @_mlp_kernel(%arg0: i32, %arg1: memref<8x12288xbf16, #tpu.memory_space<vmem>>, %arg2: memref<12288x25xbf16, #tpu.memory_space<vmem>>, %arg3: memref<1x25xf32, #tpu.memory_space<vmem>>, %arg4: memref<25x12xf32, #tpu.memory_space<vmem>>, %arg5: memref<1x12xf32, #tpu.memory_space<vmem>>, %arg6: memref<12x6xf32, #tpu.memory_space<vmem>>, %arg7: memref<1x6xf32, #tpu.memory_space<vmem>>, %arg8: memref<8x6xf32, #tpu.memory_space<vmem>>) attributes {dimension_semantics = [#tpu.dimension_semantics<parallel>], iteration_bounds = array<i64: 1>, scalar_prefetch = 0 : i64, scratch_operands = 0 : i64, tpu.core_type = #tpu.core_type<tc>, window_params = [{transform_indices = @transform_0, window_bounds = array<i64: 8, 12288>}, {pipeline_mode = #tpu.pipeline_mode<synchronous>, transform_indices = @transform_1, window_bounds = array<i64: 12288, 25>}, {pipeline_mode = #tpu.pipeline_mode<synchronous>, transform_indices = @transform_2, window_bounds = array<i64: 1, 25>}, {pipeline_mode = #tpu.pipeline_mode<synchronous>, transform_indices = @transform_3, window_bounds = array<i64: 25, 12>}, {pipeline_mode = #tpu.pipeline_mode<synchronous>, transform_indices = @transform_4, window_bounds = array<i64: 1, 12>}, {pipeline_mode = #tpu.pipeline_mode<synchronous>, transform_indices = @transform_5, window_bounds = array<i64: 12, 6>}, {pipeline_mode = #tpu.pipeline_mode<synchronous>, transform_indices = @transform_6, window_bounds = array<i64: 1, 6>}, {transform_indices = @transform_7, window_bounds = array<i64: 8, 6>}]} {
    %c0 = arith.constant 0 : index
    %c0_0 = arith.constant 0 : index
    %0 = vector.load %arg1[%c0, %c0_0] : memref<8x12288xbf16, #tpu.memory_space<vmem>>, vector<8x12288xbf16>
    %c0_1 = arith.constant 0 : index
    %c0_2 = arith.constant 0 : index
    %1 = vector.load %arg2[%c0_1, %c0_2] : memref<12288x25xbf16, #tpu.memory_space<vmem>>, vector<12288x25xbf16>
    %cst = arith.constant dense<0.000000e+00> : vector<8x25xf32>
    %2 = tpu.matmul %0, %1, %cst {dimension_numbers = #tpu.dot_dimension_numbers<[1], [0], [0], [1], [0, 0, 1, 1], [], []>} : vector<8x12288xbf16>, vector<12288x25xbf16>, vector<8x25xf32> -> vector<8x25xf32>
    %c0_3 = arith.constant 0 : index
    %c0_4 = arith.constant 0 : index
    %3 = vector.load %arg3[%c0_3, %c0_4] : memref<1x25xf32, #tpu.memory_space<vmem>>, vector<1x25xf32>
    %4 = vector.broadcast %3 : vector<1x25xf32> to vector<8x25xf32>
    %5 = arith.addf %2, %4 : vector<8x25xf32>
    %cst_5 = arith.constant 0.000000e+00 : f32
    %6 = vector.broadcast %cst_5 : f32 to vector<8x25xf32>
    %7 = arith.maximumf %5, %6 : vector<8x25xf32>
    %c0_6 = arith.constant 0 : index
    %c0_7 = arith.constant 0 : index
    %8 = vector.load %arg4[%c0_6, %c0_7] : memref<25x12xf32, #tpu.memory_space<vmem>>, vector<25x12xf32>
    %cst_8 = arith.constant dense<0.000000e+00> : vector<8x12xf32>
    %9 = tpu.matmul %7, %8, %cst_8 {dimension_numbers = #tpu.dot_dimension_numbers<[1], [0], [0], [1], [0, 0, 1, 1], [], []>} : vector<8x25xf32>, vector<25x12xf32>, vector<8x12xf32> -> vector<8x12xf32>
    %c0_9 = arith.constant 0 : index
    %c0_10 = arith.constant 0 : index
    %10 = vector.load %arg5[%c0_9, %c0_10] : memref<1x12xf32, #tpu.memory_space<vmem>>, vector<1x12xf32>
    %11 = vector.broadcast %10 : vector<1x12xf32> to vector<8x12xf32>
    %12 = arith.addf %9, %11 : vector<8x12xf32>
    %cst_11 = arith.constant 0.000000e+00 : f32
    %13 = vector.broadcast %cst_11 : f32 to vector<8x12xf32>
    %14 = arith.maximumf %12, %13 : vector<8x12xf32>
    %c0_12 = arith.constant 0 : index
    %c0_13 = arith.constant 0 : index
    %15 = vector.load %arg6[%c0_12, %c0_13] : memref<12x6xf32, #tpu.memory_space<vmem>>, vector<12x6xf32>
    %cst_14 = arith.constant dense<0.000000e+00> : vector<8x6xf32>
    %16 = tpu.matmul %14, %15, %cst_14 {dimension_numbers = #tpu.dot_dimension_numbers<[1], [0], [0], [1], [0, 0, 1, 1], [], []>} : vector<8x12xf32>, vector<12x6xf32>, vector<8x6xf32> -> vector<8x6xf32>
    %c0_15 = arith.constant 0 : index
    %c0_16 = arith.constant 0 : index
    %17 = vector.load %arg7[%c0_15, %c0_16] : memref<1x6xf32, #tpu.memory_space<vmem>>, vector<1x6xf32>
    %18 = vector.broadcast %17 : vector<1x6xf32> to vector<8x6xf32>
    %19 = arith.addf %16, %18 : vector<8x6xf32>
    %c0_17 = arith.constant 0 : index
    %c0_18 = arith.constant 0 : index
    %20 = vector.load %arg8[%c0_17, %c0_18] : memref<8x6xf32, #tpu.memory_space<vmem>>, vector<8x6xf32>
    tpu.vector_store %arg8[%c0_17, %c0_18], %19 {strides = array<i32>} : memref<8x6xf32, #tpu.memory_space<vmem>>, vector<8x6xf32>,
    return
  }
  func.func @transform_0(%arg0: i32) -> (i32, i32) {
    %c0_i32 = arith.constant 0 : i32
    %c0_i32_0 = arith.constant 0 : i32
    return %arg0, %c0_i32 : i32, i32
  }
  func.func @transform_1(%arg0: i32) -> (i32, i32) {
    %c0_i32 = arith.constant 0 : i32
    %c0_i32_0 = arith.constant 0 : i32
    %c0_i32_1 = arith.constant 0 : i32
    return %c0_i32, %c0_i32_0 : i32, i32
  }
  func.func @transform_2(%arg0: i32) -> (i32, i32) {
    %c0_i32 = arith.constant 0 : i32
    %c0_i32_0 = arith.constant 0 : i32
    %c0_i32_1 = arith.constant 0 : i32
    return %c0_i32, %c0_i32_0 : i32, i32
  }
  func.func @transform_3(%arg0: i32) -> (i32, i32) {
    %c0_i32 = arith.constant 0 : i32
    %c0_i32_0 = arith.constant 0 : i32
    %c0_i32_1 = arith.constant 0 : i32
    return %c0_i32, %c0_i32_0 : i32, i32
  }
  func.func @transform_4(%arg0: i32) -> (i32, i32) {
    %c0_i32 = arith.constant 0 : i32
    %c0_i32_0 = arith.constant 0 : i32
    %c0_i32_1 = arith.constant 0 : i32
    return %c0_i32, %c0_i32_0 : i32, i32
  }
  func.func @transform_5(%arg0: i32) -> (i32, i32) {
    %c0_i32 = arith.constant 0 : i32
    %c0_i32_0 = arith.constant 0 : i32
    %c0_i32_1 = arith.constant 0 : i32
    return %c0_i32, %c0_i32_0 : i32, i32
  }
  func.func @transform_6(%arg0: i32) -> (i32, i32) {
    %c0_i32 = arith.constant 0 : i32
    %c0_i32_0 = arith.constant 0 : i32
    %c0_i32_1 = arith.constant 0 : i32
    return %c0_i32, %c0_i32_0 : i32, i32
  }
  func.func @transform_7(%arg0: i32) -> (i32, i32) {
    %c0_i32 = arith.constant 0 : i32
    %c0_i32_0 = arith.constant 0 : i32
    return %arg0, %c0_i32 : i32, i32
  }
}

</mosaic_0001>

<bundles_post_ra>
// kernel: binary_cross_model_forward.1
= control target key start
LH: loop header
LB: loop body
LE: loop exit
PB: predicated region body
PF: predicated region fallthrough
CT: control target
= control target key end

     0   :  { %s14114_s0 = inlined_call_operand.vmem [shape: bf16[8,12288], index: 0, kind: input, shape index: {}]   ;;  %s14115_s1 = inlined_call_operand.vmem [shape: bf16[12288,25], index: 1, kind: input, shape index: {}]   ;;  %s14116_s2 = inlined_call_operand.vmem [shape: f32[1,25], index: 2, kind: input, shape index: {}]   ;;  %s14117_s3 = inlined_call_operand.vmem [shape: f32[25,12], index: 3, kind: input, shape index: {}]   ;;  %s14118_s4 = inlined_call_operand.vmem [shape: f32[1,12], index: 4, kind: input, shape index: {}]   ;;  %s14119_s5 = inlined_call_operand.vmem [shape: f32[12,6], index: 5, kind: input, shape index: {}]   ;;  %s14120_s6 = inlined_call_operand.vmem [shape: f32[1,6], index: 6, kind: input, shape index: {}]   ;;  %s14121_s7 = inlined_call_operand.hbm [shape: f32[8,6], index: 7, kind: output, shape index: {}]  }
   0x1   :  { %v10646_v0 = vld [vmem:[%s14115_s1 + $0x40] sm:$0xff]   ;;  %v10650_v4 = vld [vmem:[%s14115_s1 + $0x48] sm:$0xff]   ;;  %v10654_v8 = vld [vmem:[%s14115_s1 + $0x50] sm:$0xff]  }
   0x2   :  { %v10647_v1 = vld [vmem:[%s14115_s1 + $0xc0] sm:$0xff]   ;;  %9548 = vmatprep.subr.bf16.mxu0 %v10646_v0  ;;  %v10651_v5 = vld [vmem:[%s14115_s1 + $0xc8] sm:$0xff]   ;;  %v10655_v9 = vld [vmem:[%s14115_s1 + $0xd0] sm:$0xff]  }
   0x3   :  { %v10648_v2 = vld [vmem:[%s14115_s1] sm:$0xff]   ;;  %9570 = vmatprep.subr.bf16.mxu1 %v10647_v1  ;;  %v10652_v6 = vld [vmem:[%s14115_s1 + $0x8] sm:$0xff]   ;;  %v10656_v10 = vld [vmem:[%s14115_s1 + $0x10] sm:$0xff]  }
   0x4   :  { %v10649_v3 = vld [vmem:[%s14115_s1 + $0x80] sm:$0xff]   ;;  %9549 = vmatpush3.bf16.msra.mxu0 %v10648_v2  ;;  %v10653_v7 = vld [vmem:[%s14115_s1 + $0x88] sm:$0xff]   ;;  %v10657_v11 = vld [vmem:[%s14115_s1 + $0x90] sm:$0xff]  }
   0x5   :  { %9571 = vmatpush3.bf16.msra.mxu1 %v10649_v3  ;;  %9550 = vmatprep.subr.bf16.mxu0 %v10650_v4  ;;  %v10658_v12 = vld [vmem:[%s14115_s1 + $0x58] sm:$0xff]   ;;  %v10662_v16 = vld [vmem:[%s14115_s1 + $0x60] sm:$0xff]   ;;  %v10666_v20 = vld [vmem:[%s14115_s1 + $0x68] sm:$0xff]  }
   0x6   :  { %9572 = vmatprep.subr.bf16.mxu1 %v10651_v5  ;;  %v10659_v13 = vld [vmem:[%s14115_s1 + $0xd8] sm:$0xff]   ;;  %v10663_v17 = vld [vmem:[%s14115_s1 + $0xe0] sm:$0xff]   ;;  %v10667_v21 = vld [vmem:[%s14115_s1 + $0xe8] sm:$0xff]  }
   0x7   :  { %v10660_v14 = vld [vmem:[%s14115_s1 + $0x18] sm:$0xff]   ;;  %v10664_v18 = vld [vmem:[%s14115_s1 + $0x20] sm:$0xff]   ;;  %v10668_v22 = vld [vmem:[%s14115_s1 + $0x28] sm:$0xff]  }
   0x8   :  { %9551 = vmatpush3.bf16.msra.mxu0 %v10652_v6  ;;  %v10661_v15 = vld [vmem:[%s14115_s1 + $0x98] sm:$0xff]   ;;  %v10665_v19 = vld [vmem:[%s14115_s1 + $0xa0] sm:$0xff]   ;;  %v10669_v23 = vld [vmem:[%s14115_s1 + $0xa8] sm:$0xff]  }
   0x9   :  { %9573 = vmatpush3.bf16.msra.mxu1 %v10653_v7  ;;  %9552 = vmatprep.subr.bf16.mxu0 %v10654_v8  ;;  %v10670_v24 = vld [vmem:[%s14115_s1 + $0x70] sm:$0xff]   ;;  %v10674_v28 = vld [vmem:[%s14115_s1 + $0x78] sm:$0xff]   ;;  %v28_v32 = vld [vmem:[%s14114_s0] sm:$0xff] }
   0xa   :  { %9574 = vmatprep.subr.bf16.mxu1 %v10655_v9  ;;  %v10671_v25 = vld [vmem:[%s14115_s1 + $0xf0] sm:$0xff]   ;;  %v10675_v29 = vld [vmem:[%s14115_s1 + $0xf8] sm:$0xff]   ;;  %v29_v33 = vld [vmem:[%s14114_s0 + $0x8] sm:$0xff]  ;;  %v8678_v34 = vcombine.low %v28_v32, %v28_v32  ;;  %v8679_v35 = vcombine.high %v28_v32, %v28_v32 }
   0xb   :  { %v10672_v26 = vld [vmem:[%s14115_s1 + $0x30] sm:$0xff]   ;;  %v10676_v30 = vld [vmem:[%s14115_s1 + $0x38] sm:$0xff]   ;;  %v8680_v36 = vcombine.low %v29_v33, %v29_v33  ;;  %v8681_v37 = vcombine.high %v29_v33, %v29_v33  ;;  %v10682_v38 = vld [vmem:[%s14115_s1 + $0x140] sm:$0xff]  }
   0xc   :  { %9553 = vmatpush3.bf16.msra.mxu0 %v10656_v10  ;;  %v10673_v27 = vld [vmem:[%s14115_s1 + $0xb0] sm:$0xff]   ;;  %v10677_v31 = vld [vmem:[%s14115_s1 + $0xb8] sm:$0xff]   ;;  %v10683_v39 = vld [vmem:[%s14115_s1 + $0x1c0] sm:$0xff]   ;;  %6595 = vmatprep.mubr.bf16.mxu0 %v8679_v35 }
   0xd   :  { %9575 = vmatpush3.bf16.msra.mxu1 %v10657_v11  ;;  %9554 = vmatprep.subr.bf16.mxu0 %v10658_v12  ;;  %v10684_v40 = vld [vmem:[%s14115_s1 + $0x100] sm:$0xff]   ;;  %v10686_v42 = vld [vmem:[%s14115_s1 + $0x148] sm:$0xff]   ;;  %v10690_v46 = vld [vmem:[%s14115_s1 + $0x150] sm:$0xff]  }
   0xe   :  { %9576 = vmatprep.subr.bf16.mxu1 %v10659_v13  ;;  %6635 = vmatprep.mubr.bf16.mxu1 %v8681_v37  ;;  %v10685_v41 = vld [vmem:[%s14115_s1 + $0x180] sm:$0xff]   ;;  %v10687_v43 = vld [vmem:[%s14115_s1 + $0x1c8] sm:$0xff]   ;;  %v10691_v47 = vld [vmem:[%s14115_s1 + $0x1d0] sm:$0xff]  }
   0xf   :  { %v10688_v44 = vld [vmem:[%s14115_s1 + $0x108] sm:$0xff]   ;;  %v10692_v48 = vld [vmem:[%s14115_s1 + $0x110] sm:$0xff]   ;;  %v10694_v50 = vld [vmem:[%s14115_s1 + $0x158] sm:$0xff]  }
  0x10   :  { %9555 = vmatpush3.bf16.msra.mxu0 %v10660_v14  ;;  %v10689_v45 = vld [vmem:[%s14115_s1 + $0x188] sm:$0xff]   ;;  %v10693_v49 = vld [vmem:[%s14115_s1 + $0x190] sm:$0xff]   ;;  %v10695_v51 = vld [vmem:[%s14115_s1 + $0x1d8] sm:$0xff]  }
  0x11   :  { %9577 = vmatpush3.bf16.msra.mxu1 %v10661_v15  ;;  %9556 = vmatprep.subr.bf16.mxu0 %v10662_v16  ;;  %v10696_v52 = vld [vmem:[%s14115_s1 + $0x118] sm:$0xff]   ;;  %v10698_v54 = vld [vmem:[%s14115_s1 + $0x160] sm:$0xff]   ;;  %v10702_v58 = vld [vmem:[%s14115_s1 + $0x168] sm:$0xff]  }
  0x12   :  { %9578 = vmatprep.subr.bf16.mxu1 %v10663_v17  ;;  %v10697_v53 = vld [vmem:[%s14115_s1 + $0x198] sm:$0xff]   ;;  %v10699_v55 = vld [vmem:[%s14115_s1 + $0x1e0] sm:$0xff]   ;;  %v10703_v59 = vld [vmem:[%s14115_s1 + $0x1e8] sm:$0xff]  }
  0x13   :  { %v10700_v56 = vld [vmem:[%s14115_s1 + $0x120] sm:$0xff]   ;;  %v10704_v60 = vld [vmem:[%s14115_s1 + $0x128] sm:$0xff]   ;;  %v10706_v62 = vld [vmem:[%s14115_s1 + $0x170] sm:$0xff]  }
  0x14   :  { %9557 = vmatpush3.bf16.msra.mxu0 %v10664_v18  ;;  %v10701_v57 = vld [vmem:[%s14115_s1 + $0x1a0] sm:$0xff]   ;;  %v10705_v61 = vld [vmem:[%s14115_s1 + $0x1a8] sm:$0xff]   ;;  %v10707_v63 = vld [vmem:[%s14115_s1 + $0x1f0] sm:$0xff]  }
  0x15   :  { %9579 = vmatpush3.bf16.msra.mxu1 %v10665_v19  ;;  %9558 = vmatprep.subr.bf16.mxu0 %v10666_v20  ;;  %v10708_v0 = vld [vmem:[%s14115_s1 + $0x130] sm:$0xff]   ;;  %v10710_v2 = vld [vmem:[%s14115_s1 + $0x178] sm:$0xff]   ;;  %v10718_v12 = vld [vmem:[%s14115_s1 + $0x240] sm:$0xff]  }
  0x16   :  { %9580 = vmatprep.subr.bf16.mxu1 %v10667_v21  ;;  %v10709_v1 = vld [vmem:[%s14115_s1 + $0x1b0] sm:$0xff]   ;;  %v10711_v3 = vld [vmem:[%s14115_s1 + $0x1f8] sm:$0xff]   ;;  %v10719_v13 = vld [vmem:[%s14115_s1 + $0x2c0] sm:$0xff]  }
  0x17   :  { %v10712_v4 = vld [vmem:[%s14115_s1 + $0x138] sm:$0xff]   ;;  %v30_v6 = vld [vmem:[%s14114_s0 + $0x10] sm:$0xff]  ;;  %v10720_v14 = vld [vmem:[%s14115_s1 + $0x200] sm:$0xff]  }
  0x18   :  { %9559 = vmatpush3.bf16.msra.mxu0 %v10668_v22  ;;  %v10713_v5 = vld [vmem:[%s14115_s1 + $0x1b8] sm:$0xff]   ;;  %v8682_v7 = vcombine.low %v30_v6, %v30_v6  ;;  %v8683_v8 = vcombine.high %v30_v6, %v30_v6  ;;  %v10721_v15 = vld [vmem:[%s14115_s1 + $0x280] sm:$0xff]   ;;  %v10722_v16 = vld [vmem:[%s14115_s1 + $0x248] sm:$0xff]  }
  0x19   :  { %9581 = vmatpush3.bf16.msra.mxu1 %v10669_v23  ;;  %9560 = vmatprep.subr.bf16.mxu0 %v10670_v24  ;;  %v31_v9 = vld [vmem:[%s14114_s0 + $0x18] sm:$0xff]  ;;  %v10723_v17 = vld [vmem:[%s14115_s1 + $0x2c8] sm:$0xff]   ;;  %v10726_v20 = vld [vmem:[%s14115_s1 + $0x250] sm:$0xff]  }
  0x1a   :  { %9582 = vmatprep.subr.bf16.mxu1 %v10671_v25  ;;  %v8684_v10 = vcombine.low %v31_v9, %v31_v9  ;;  %v8685_v11 = vcombine.high %v31_v9, %v31_v9  ;;  %v10724_v18 = vld [vmem:[%s14115_s1 + $0x208] sm:$0xff]   ;;  %v10727_v21 = vld [vmem:[%s14115_s1 + $0x2d0] sm:$0xff]   ;;  %v10730_v24 = vld [vmem:[%s14115_s1 + $0x258] sm:$0xff]  }
  0x1b   :  { %v10725_v19 = vld [vmem:[%s14115_s1 + $0x288] sm:$0xff]   ;;  %v10728_v22 = vld [vmem:[%s14115_s1 + $0x210] sm:$0xff]   ;;  %v10731_v25 = vld [vmem:[%s14115_s1 + $0x2d8] sm:$0xff]  }
  0x1c   :  { %9561 = vmatpush3.bf16.msra.mxu0 %v10672_v26  ;;  %v10729_v23 = vld [vmem:[%s14115_s1 + $0x290] sm:$0xff]   ;;  %v10732_v26 = vld [vmem:[%s14115_s1 + $0x218] sm:$0xff]   ;;  %v10738_v32 = vld [vmem:[%s14115_s1 + $0x268] sm:$0xff]  }
  0x1d   :  { %9583 = vmatpush3.bf16.msra.mxu1 %v10673_v27  ;;  %9562 = vmatprep.subr.bf16.mxu0 %v10674_v28  ;;  %v10733_v27 = vld [vmem:[%s14115_s1 + $0x298] sm:$0xff]   ;;  %v10734_v28 = vld [vmem:[%s14115_s1 + $0x260] sm:$0xff]   ;;  %v10739_v33 = vld [vmem:[%s14115_s1 + $0x2e8] sm:$0xff]  }
  0x1e   :  { %9584 = vmatprep.subr.bf16.mxu1 %v10675_v29  ;;  %v10735_v29 = vld [vmem:[%s14115_s1 + $0x2e0] sm:$0xff]   ;;  %v10741_v35 = vld [vmem:[%s14115_s1 + $0x2a8] sm:$0xff]   ;;  %v10743_v37 = vld [vmem:[%s14115_s1 + $0x2f0] sm:$0xff]  }
  0x1f   :  { %v10774_v6 = vld [vmem:[%s14115_s1 + $0x368] sm:$0xff]  }
  0x20   :  { %9563 = vmatpush3.bf16.msra.mxu0 %v10676_v30  ;;  %v10736_v30 = vld [vmem:[%s14115_s1 + $0x220] sm:$0xff]   ;;  %v10777_v9 = vld [vmem:[%s14115_s1 + $0x3a8] sm:$0xff]  }
  0x21   :  { %9585 = vmatpush3.bf16.msra.mxu1 %v10677_v31  ;;  %9592 = vmatprep.subr.bf16.mxu0 %v10682_v38  ;;  %v10737_v31 = vld [vmem:[%s14115_s1 + $0x2a0] sm:$0xff]   ;;  %v10744_v38 = vld [vmem:[%s14115_s1 + $0x230] sm:$0xff]  }
  0x22   :  { %9614 = vmatprep.subr.bf16.mxu1 %v10683_v39  ;;  %v10745_v39 = vld [vmem:[%s14115_s1 + $0x2b0] sm:$0xff]  }
  0x23   :  { %6596 = vmatmul.mubr.bf16.vlgmr.msra.gmra.mrb[0].mxu0 %v8678_v34  ;;  %v10740_v34 = vld [vmem:[%s14115_s1 + $0x228] sm:$0xff]  }
  0x24   :  { %6636 = vmatmul.mubr.bf16.vlgmr.msra.gmra.mrb[0].mxu1 %v8680_v36  ;;  %9593 = vmatpush3.bf16.msra.mxu0 %v10684_v40  ;;  %v10742_v36 = vld [vmem:[%s14115_s1 + $0x270] sm:$0xff]   ;;  %v10746_v40 = vld [vmem:[%s14115_s1 + $0x278] sm:$0xff]  }
  0x25   :  { %9615 = vmatpush3.bf16.msra.mxu1 %v10685_v41  ;;  %9594 = vmatprep.subr.bf16.mxu0 %v10686_v42  ;;  %v10747_v41 = vld [vmem:[%s14115_s1 + $0x2f8] sm:$0xff]  }
  0x26   :  { %9616 = vmatprep.subr.bf16.mxu1 %v10687_v43  ;;  %6675 = vmatprep.mubr.bf16.mxu0 %v8683_v8  ;;  %v10748_v42 = vld [vmem:[%s14115_s1 + $0x238] sm:$0xff]   ;;  %v10776_v8 = vld [vmem:[%s14115_s1 + $0x328] sm:$0xff]  }
  0x27   :  { %6715 = vmatprep.mubr.bf16.mxu1 %v8685_v11  ;;  %v10749_v43 = vld [vmem:[%s14115_s1 + $0x2b8] sm:$0xff]   ;;  %v10779_v11 = vld [vmem:[%s14115_s1 + $0x3f0] sm:$0xff]  }
  0x28   :  { %9595 = vmatpush3.bf16.msra.mxu0 %v10688_v44  ;;  %v32_v44 = vld [vmem:[%s14114_s0 + $0x20] sm:$0xff] }
  0x29   :  { %9617 = vmatpush3.bf16.msra.mxu1 %v10689_v45  ;;  %9596 = vmatprep.subr.bf16.mxu0 %v10690_v46  ;;  %v33_v45 = vld [vmem:[%s14114_s0 + $0x28] sm:$0xff]  ;;  %v8686_v46 = vcombine.low %v32_v44, %v32_v44 }
  0x2a   :  { %9618 = vmatprep.subr.bf16.mxu1 %v10691_v47  ;;  %v8687_v47 = vcombine.high %v32_v44, %v32_v44  ;;  %v10810_v44 = vld [vmem:[%s14115_s1 + $0x468] sm:$0xff]  }
  0x2c   :  { %9597 = vmatpush3.bf16.msra.mxu0 %v10692_v48  ;;  %v8688_v48 = vcombine.low %v33_v45, %v33_v45 }
  0x2d   :  { %9619 = vmatpush3.bf16.msra.mxu1 %v10693_v49  ;;  %9598 = vmatprep.subr.bf16.mxu0 %v10694_v50  ;;  %v8689_v49 = vcombine.high %v33_v45, %v33_v45  ;;  %v10754_v50 = vld [vmem:[%s14115_s1 + $0x340] sm:$0xff]   ;;  %v10811_v45 = vld [vmem:[%s14115_s1 + $0x4e8] sm:$0xff]  }
  0x2e   :  { %9620 = vmatprep.subr.bf16.mxu1 %v10695_v51  ;;  %v10755_v51 = vld [vmem:[%s14115_s1 + $0x3c0] sm:$0xff]  }
  0x30   :  { %9599 = vmatpush3.bf16.msra.mxu0 %v10696_v52  ;;  %v10756_v52 = vld [vmem:[%s14115_s1 + $0x300] sm:$0xff]  }
  0x31   :  { %9621 = vmatpush3.bf16.msra.mxu1 %v10697_v53  ;;  %9600 = vmatprep.subr.bf16.mxu0 %v10698_v54  ;;  %v10757_v53 = vld [vmem:[%s14115_s1 + $0x380] sm:$0xff]   ;;  %v10758_v54 = vld [vmem:[%s14115_s1 + $0x348] sm:$0xff]  }
  0x32   :  { %9622 = vmatprep.subr.bf16.mxu1 %v10699_v55  ;;  %v10759_v55 = vld [vmem:[%s14115_s1 + $0x3c8] sm:$0xff]  }
  0x34   :  { %9601 = vmatpush3.bf16.msra.mxu0 %v10700_v56  ;;  %v10760_v56 = vld [vmem:[%s14115_s1 + $0x308] sm:$0xff]  }
  0x35   :  { %9623 = vmatpush3.bf16.msra.mxu1 %v10701_v57  ;;  %9602 = vmatprep.subr.bf16.mxu0 %v10702_v58  ;;  %v10761_v57 = vld [vmem:[%s14115_s1 + $0x388] sm:$0xff]   ;;  %v10762_v58 = vld [vmem:[%s14115_s1 + $0x350] sm:$0xff]  }
  0x36   :  { %9624 = vmatprep.subr.bf16.mxu1 %v10703_v59  ;;  %v10763_v59 = vld [vmem:[%s14115_s1 + $0x3d0] sm:$0xff]  }
  0x38   :  { %9603 = vmatpush3.bf16.msra.mxu0 %v10704_v60  ;;  %v10764_v60 = vld [vmem:[%s14115_s1 + $0x310] sm:$0xff]  }
  0x39   :  { %9625 = vmatpush3.bf16.msra.mxu1 %v10705_v61  ;;  %9604 = vmatprep.subr.bf16.mxu0 %v10706_v62  ;;  %v10765_v61 = vld [vmem:[%s14115_s1 + $0x390] sm:$0xff]   ;;  %v10766_v62 = vld [vmem:[%s14115_s1 + $0x358] sm:$0xff]  }
  0x3a   :  { %9626 = vmatprep.subr.bf16.mxu1 %v10707_v63  ;;  %v10767_v63 = vld [vmem:[%s14115_s1 + $0x3d8] sm:$0xff]  }
  0x3c   :  { %9605 = vmatpush3.bf16.msra.mxu0 %v10708_v0  ;;  %v10768_v0 = vld [vmem:[%s14115_s1 + $0x318] sm:$0xff]  }
  0x3d   :  { %9627 = vmatpush3.bf16.msra.mxu1 %v10709_v1  ;;  %9606 = vmatprep.subr.bf16.mxu0 %v10710_v2  ;;  %v10769_v1 = vld [vmem:[%s14115_s1 + $0x398] sm:$0xff]   ;;  %v10770_v2 = vld [vmem:[%s14115_s1 + $0x360] sm:$0xff]  }
  0x3e   :  { %9628 = vmatprep.subr.bf16.mxu1 %v10711_v3  ;;  %v10771_v3 = vld [vmem:[%s14115_s1 + $0x3e0] sm:$0xff]  }
  0x40   :  { %9607 = vmatpush3.bf16.msra.mxu0 %v10712_v4  ;;  %v10772_v4 = vld [vmem:[%s14115_s1 + $0x320] sm:$0xff]  }
  0x41   :  { %9629 = vmatpush3.bf16.msra.mxu1 %v10713_v5  ;;  %9636 = vmatprep.subr.bf16.mxu0 %v10718_v12  ;;  %v10773_v5 = vld [vmem:[%s14115_s1 + $0x3a0] sm:$0xff]   ;;  %v10780_v12 = vld [vmem:[%s14115_s1 + $0x330] sm:$0xff]  }
  0x42   :  { %9658 = vmatprep.subr.bf16.mxu1 %v10719_v13  ;;  %v10781_v13 = vld [vmem:[%s14115_s1 + $0x3b0] sm:$0xff]  }
  0x43   :  { %6676 = vmatmul.mubr.bf16.vlgmr.msra.gmra.mrb[4].mxu0 %v8682_v7  ;;  %v10775_v7 = vld [vmem:[%s14115_s1 + $0x3e8] sm:$0xff]  }
  0x44   :  { %6716 = vmatmul.mubr.bf16.vlgmr.msra.gmra.mrb[4].mxu1 %v8684_v10  ;;  %9637 = vmatpush3.bf16.msra.mxu0 %v10720_v14  ;;  %v10778_v10 = vld [vmem:[%s14115_s1 + $0x370] sm:$0xff]   ;;  %v10782_v14 = vld [vmem:[%s14115_s1 + $0x378] sm:$0xff]  }
  0x45   :  { %9659 = vmatpush3.bf16.msra.mxu1 %v10721_v15  ;;  %9638 = vmatprep.subr.bf16.mxu0 %v10722_v16  ;;  %v10783_v15 = vld [vmem:[%s14115_s1 + $0x3f8] sm:$0xff]  }
  0x46   :  { %9660 = vmatprep.subr.bf16.mxu1 %v10723_v17  ;;  %6755 = vmatprep.mubr.bf16.mxu0 %v8687_v47  ;;  %v10784_v16 = vld [vmem:[%s14115_s1 + $0x338] sm:$0xff]   ;;  %v10813_v47 = vld [vmem:[%s14115_s1 + $0x4a8] sm:$0xff]  }
  0x47   :  { %6795 = vmatprep.mubr.bf16.mxu1 %v8689_v49  ;;  %v10785_v17 = vld [vmem:[%s14115_s1 + $0x3b8] sm:$0xff]   ;;  %v10815_v49 = vld [vmem:[%s14115_s1 + $0x4f0] sm:$0xff]  }
  0x48   :  { %9639 = vmatpush3.bf16.msra.mxu0 %v10724_v18  ;;  %v34_v18 = vld [vmem:[%s14114_s0 + $0x30] sm:$0xff] }
  0x49   :  { %9661 = vmatpush3.bf16.msra.mxu1 %v10725_v19  ;;  %9640 = vmatprep.subr.bf16.mxu0 %v10726_v20  ;;  %v35_v19 = vld [vmem:[%s14114_s0 + $0x38] sm:$0xff]  ;;  %v8690_v20 = vcombine.low %v34_v18, %v34_v18 }
  0x4a   :  { %9662 = vmatprep.subr.bf16.mxu1 %v10727_v21  ;;  %v8691_v21 = vcombine.high %v34_v18, %v34_v18  ;;  %v10846_v18 = vld [vmem:[%s14115_s1 + $0x568] sm:$0xff]  }
  0x4c   :  { %9641 = vmatpush3.bf16.msra.mxu0 %v10728_v22  ;;  %v8692_v22 = vcombine.low %v35_v19, %v35_v19 }
  0x4d   :  { %9663 = vmatpush3.bf16.msra.mxu1 %v10729_v23  ;;  %9642 = vmatprep.subr.bf16.mxu0 %v10730_v24  ;;  %v10790_v23 = vld [vmem:[%s14115_s1 + $0x440] sm:$0xff]   ;;  %v8693_v24 = vcombine.high %v35_v19, %v35_v19  ;;  %v10847_v19 = vld [vmem:[%s14115_s1 + $0x5e8] sm:$0xff]  }
  0x4e   :  { %9664 = vmatprep.subr.bf16.mxu1 %v10731_v25  ;;  %v10791_v25 = vld [vmem:[%s14115_s1 + $0x4c0] sm:$0xff]  }
  0x50   :  { %9643 = vmatpush3.bf16.msra.mxu0 %v10732_v26  ;;  %v10792_v26 = vld [vmem:[%s14115_s1 + $0x400] sm:$0xff]  }
  0x51   :  { %9665 = vmatpush3.bf16.msra.mxu1 %v10733_v27  ;;  %9644 = vmatprep.subr.bf16.mxu0 %v10734_v28  ;;  %v10793_v27 = vld [vmem:[%s14115_s1 + $0x480] sm:$0xff]   ;;  %v10794_v28 = vld [vmem:[%s14115_s1 + $0x448] sm:$0xff]  }
  0x52   :  { %9666 = vmatprep.subr.bf16.mxu1 %v10735_v29  ;;  %v10795_v29 = vld [vmem:[%s14115_s1 + $0x4c8] sm:$0xff]  }
  0x54   :  { %9645 = vmatpush3.bf16.msra.mxu0 %v10736_v30  ;;  %v10796_v30 = vld [vmem:[%s14115_s1 + $0x408] sm:$0xff]  }
  0x55   :  { %9667 = vmatpush3.bf16.msra.mxu1 %v10737_v31  ;;  %9646 = vmatprep.subr.bf16.mxu0 %v10738_v32  ;;  %v10797_v31 = vld [vmem:[%s14115_s1 + $0x488] sm:$0xff]   ;;  %v10798_v32 = vld [vmem:[%s14115_s1 + $0x450] sm:$0xff]  }
  0x56   :  { %9668 = vmatprep.subr.bf16.mxu1 %v10739_v33  ;;  %v10799_v33 = vld [vmem:[%s14115_s1 + $0x4d0] sm:$0xff]  }
  0x58   :  { %9647 = vmatpush3.bf16.msra.mxu0 %v10740_v34  ;;  %v10800_v34 = vld [vmem:[%s14115_s1 + $0x410] sm:$0xff]  }
  0x59   :  { %9669 = vmatpush3.bf16.msra.mxu1 %v10741_v35  ;;  %9648 = vmatprep.subr.bf16.mxu0 %v10742_v36  ;;  %v10801_v35 = vld [vmem:[%s14115_s1 + $0x490] sm:$0xff]   ;;  %v10802_v36 = vld [vmem:[%s14115_s1 + $0x458] sm:$0xff]  }
  0x5a   :  { %9670 = vmatprep.subr.bf16.mxu1 %v10743_v37  ;;  %v10803_v37 = vld [vmem:[%s14115_s1 + $0x4d8] sm:$0xff]  }
  0x5c   :  { %9649 = vmatpush3.bf16.msra.mxu0 %v10744_v38  ;;  %v10804_v38 = vld [vmem:[%s14115_s1 + $0x418] sm:$0xff]  }
  0x5d   :  { %9671 = vmatpush3.bf16.msra.mxu1 %v10745_v39  ;;  %9650 = vmatprep.subr.bf16.mxu0 %v10746_v40  ;;  %v10805_v39 = vld [vmem:[%s14115_s1 + $0x498] sm:$0xff]   ;;  %v10806_v40 = vld [vmem:[%s14115_s1 + $0x460] sm:$0xff]  }
  0x5e   :  { %9672 = vmatprep.subr.bf16.mxu1 %v10747_v41  ;;  %v10807_v41 = vld [vmem:[%s14115_s1 + $0x4e0] sm:$0xff]  }
  0x60   :  { %9651 = vmatpush3.bf16.msra.mxu0 %v10748_v42  ;;  %v10808_v42 = vld [vmem:[%s14115_s1 + $0x420] sm:$0xff]  }
  0x61   :  { %9673 = vmatpush3.bf16.msra.mxu1 %v10749_v43  ;;  %9680 = vmatprep.subr.bf16.mxu0 %v10754_v50  ;;  %v10809_v43 = vld [vmem:[%s14115_s1 + $0x4a0] sm:$0xff]   ;;  %v10816_v50 = vld [vmem:[%s14115_s1 + $0x430] sm:$0xff]  }
  0x62   :  { %9702 = vmatprep.subr.bf16.mxu1 %v10755_v51  ;;  %v10817_v51 = vld [vmem:[%s14115_s1 + $0x4b0] sm:$0xff]  }
  0x63   :  { %6756 = vmatmul.mubr.bf16.vlgmr.msra.gmra.mrb[8].mxu0 %v8686_v46  ;;  %v10812_v46 = vld [vmem:[%s14115_s1 + $0x428] sm:$0xff]  }
  0x64   :  { %6796 = vmatmul.mubr.bf16.vlgmr.msra.gmra.mrb[8].mxu1 %v8688_v48  ;;  %9681 = vmatpush3.bf16.msra.mxu0 %v10756_v52  ;;  %v10814_v48 = vld [vmem:[%s14115_s1 + $0x470] sm:$0xff]   ;;  %v10818_v52 = vld [vmem:[%s14115_s1 + $0x478] sm:$0xff]  }
  0x65   :  { %9703 = vmatpush3.bf16.msra.mxu1 %v10757_v53  ;;  %9682 = vmatprep.subr.bf16.mxu0 %v10758_v54  ;;  %v10819_v53 = vld [vmem:[%s14115_s1 + $0x4f8] sm:$0xff]  }
  0x66   :  { %9704 = vmatprep.subr.bf16.mxu1 %v10759_v55  ;;  %6835 = vmatprep.mubr.bf16.mxu0 %v8691_v21  ;;  %v10820_v54 = vld [vmem:[%s14115_s1 + $0x438] sm:$0xff]   ;;  %v10849_v21 = vld [vmem:[%s14115_s1 + $0x5a8] sm:$0xff]  }
  0x67   :  { %6875 = vmatprep.mubr.bf16.mxu1 %v8693_v24  ;;  %v10821_v55 = vld [vmem:[%s14115_s1 + $0x4b8] sm:$0xff]   ;;  %v10852_v24 = vld [vmem:[%s14115_s1 + $0x530] sm:$0xff]  }
  0x68   :  { %9683 = vmatpush3.bf16.msra.mxu0 %v10760_v56  ;;  %v36_v56 = vld [vmem:[%s14114_s0 + $0x40] sm:$0xff] }
  0x69   :  { %9705 = vmatpush3.bf16.msra.mxu1 %v10761_v57  ;;  %9684 = vmatprep.subr.bf16.mxu0 %v10762_v58  ;;  %v8694_v57 = vcombine.low %v36_v56, %v36_v56  ;;  %v8695_v58 = vcombine.high %v36_v56, %v36_v56  ;;  %v10882_v56 = vld [vmem:[%s14115_s1 + $0x668] sm:$0xff]  }
  0x6a   :  { %9706 = vmatprep.subr.bf16.mxu1 %v10763_v59  ;;  %v37_v59 = vld [vmem:[%s14114_s0 + $0x48] sm:$0xff] }
  0x6c   :  { %9685 = vmatpush3.bf16.msra.mxu0 %v10764_v60  ;;  %v8696_v60 = vcombine.low %v37_v59, %v37_v59 }
  0x6d   :  { %9707 = vmatpush3.bf16.msra.mxu1 %v10765_v61  ;;  %9686 = vmatprep.subr.bf16.mxu0 %v10766_v62  ;;  %v8697_v61 = vcombine.high %v37_v59, %v37_v59  ;;  %v10826_v62 = vld [vmem:[%s14115_s1 + $0x540] sm:$0xff]   ;;  %v10885_v59 = vld [vmem:[%s14115_s1 + $0x6a8] sm:$0xff]  }
  0x6e   :  { %9708 = vmatprep.subr.bf16.mxu1 %v10767_v63  ;;  %v10827_v63 = vld [vmem:[%s14115_s1 + $0x5c0] sm:$0xff]  }
  0x70   :  { %9687 = vmatpush3.bf16.msra.mxu0 %v10768_v0  ;;  %v10828_v0 = vld [vmem:[%s14115_s1 + $0x500] sm:$0xff]  }
  0x71   :  { %9709 = vmatpush3.bf16.msra.mxu1 %v10769_v1  ;;  %9688 = vmatprep.subr.bf16.mxu0 %v10770_v2  ;;  %v10829_v1 = vld [vmem:[%s14115_s1 + $0x580] sm:$0xff]   ;;  %v10830_v2 = vld [vmem:[%s14115_s1 + $0x548] sm:$0xff]  }
  0x72   :  { %9710 = vmatprep.subr.bf16.mxu1 %v10771_v3  ;;  %v10831_v3 = vld [vmem:[%s14115_s1 + $0x5c8] sm:$0xff]  }
  0x74   :  { %9689 = vmatpush3.bf16.msra.mxu0 %v10772_v4  ;;  %v10832_v4 = vld [vmem:[%s14115_s1 + $0x508] sm:$0xff]  }
  0x75   :  { %9711 = vmatpush3.bf16.msra.mxu1 %v10773_v5  ;;  %9690 = vmatprep.subr.bf16.mxu0 %v10774_v6  ;;  %v10833_v5 = vld [vmem:[%s14115_s1 + $0x588] sm:$0xff]   ;;  %v10834_v6 = vld [vmem:[%s14115_s1 + $0x550] sm:$0xff]  }
  0x76   :  { %9712 = vmatprep.subr.bf16.mxu1 %v10775_v7  ;;  %v10835_v7 = vld [vmem:[%s14115_s1 + $0x5d0] sm:$0xff]  }
  0x78   :  { %9691 = vmatpush3.bf16.msra.mxu0 %v10776_v8  ;;  %v10836_v8 = vld [vmem:[%s14115_s1 + $0x510] sm:$0xff]  }
  0x79   :  { %9713 = vmatpush3.bf16.msra.mxu1 %v10777_v9  ;;  %9692 = vmatprep.subr.bf16.mxu0 %v10778_v10  ;;  %v10837_v9 = vld [vmem:[%s14115_s1 + $0x590] sm:$0xff]   ;;  %v10838_v10 = vld [vmem:[%s14115_s1 + $0x558] sm:$0xff]  }
  0x7a   :  { %9714 = vmatprep.subr.bf16.mxu1 %v10779_v11  ;;  %v10839_v11 = vld [vmem:[%s14115_s1 + $0x5d8] sm:$0xff]  }
  0x7c   :  { %9693 = vmatpush3.bf16.msra.mxu0 %v10780_v12  ;;  %v10840_v12 = vld [vmem:[%s14115_s1 + $0x518] sm:$0xff]  }
  0x7d   :  { %9715 = vmatpush3.bf16.msra.mxu1 %v10781_v13  ;;  %9694 = vmatprep.subr.bf16.mxu0 %v10782_v14  ;;  %v10841_v13 = vld [vmem:[%s14115_s1 + $0x598] sm:$0xff]   ;;  %v10842_v14 = vld [vmem:[%s14115_s1 + $0x560] sm:$0xff]  }
  0x7e   :  { %9716 = vmatprep.subr.bf16.mxu1 %v10783_v15  ;;  %v10843_v15 = vld [vmem:[%s14115_s1 + $0x5e0] sm:$0xff]  }
  0x80   :  { %9695 = vmatpush3.bf16.msra.mxu0 %v10784_v16  ;;  %v10844_v16 = vld [vmem:[%s14115_s1 + $0x520] sm:$0xff]  }
  0x81   :  { %9717 = vmatpush3.bf16.msra.mxu1 %v10785_v17  ;;  %9724 = vmatprep.subr.bf16.mxu0 %v10790_v23  ;;  %v10845_v17 = vld [vmem:[%s14115_s1 + $0x5a0] sm:$0xff]   ;;  %v10851_v23 = vld [vmem:[%s14115_s1 + $0x5f0] sm:$0xff]  }
  0x82   :  { %9746 = vmatprep.subr.bf16.mxu1 %v10791_v25  ;;  %v10853_v25 = vld [vmem:[%s14115_s1 + $0x5b0] sm:$0xff]  }
  0x83   :  { %6836 = vmatmul.mubr.bf16.vlgmr.msra.gmra.mrb[12].mxu0 %v8690_v20  ;;  %v10848_v20 = vld [vmem:[%s14115_s1 + $0x528] sm:$0xff]  }
  0x84   :  { %6876 = vmatmul.mubr.bf16.vlgmr.msra.gmra.mrb[12].mxu1 %v8692_v22  ;;  %9725 = vmatpush3.bf16.msra.mxu0 %v10792_v26  ;;  %v10850_v22 = vld [vmem:[%s14115_s1 + $0x570] sm:$0xff]   ;;  %v10854_v26 = vld [vmem:[%s14115_s1 + $0x578] sm:$0xff]  }
  0x85   :  { %9747 = vmatpush3.bf16.msra.mxu1 %v10793_v27  ;;  %9726 = vmatprep.subr.bf16.mxu0 %v10794_v28  ;;  %v10855_v27 = vld [vmem:[%s14115_s1 + $0x5f8] sm:$0xff]  }
  0x86   :  { %9748 = vmatprep.subr.bf16.mxu1 %v10795_v29  ;;  %6915 = vmatprep.mubr.bf16.mxu0 %v8695_v58  ;;  %v10856_v28 = vld [vmem:[%s14115_s1 + $0x538] sm:$0xff]   ;;  %v10884_v58 = vld [vmem:[%s14115_s1 + $0x628] sm:$0xff]  }
  0x87   :  { %6955 = vmatprep.mubr.bf16.mxu1 %v8697_v61  ;;  %v10857_v29 = vld [vmem:[%s14115_s1 + $0x5b8] sm:$0xff]   ;;  %v10887_v61 = vld [vmem:[%s14115_s1 + $0x6f0] sm:$0xff]  }
  0x88   :  { %9727 = vmatpush3.bf16.msra.mxu0 %v10796_v30  ;;  %v38_v30 = vld [vmem:[%s14114_s0 + $0x50] sm:$0xff] }
  0x89   :  { %9749 = vmatpush3.bf16.msra.mxu1 %v10797_v31  ;;  %9728 = vmatprep.subr.bf16.mxu0 %v10798_v32  ;;  %v39_v31 = vld [vmem:[%s14114_s0 + $0x58] sm:$0xff]  ;;  %v8698_v32 = vcombine.low %v38_v30, %v38_v30 }
  0x8a   :  { %9750 = vmatprep.subr.bf16.mxu1 %v10799_v33  ;;  %v8699_v33 = vcombine.high %v38_v30, %v38_v30  ;;  %v10917_v30 = vld [vmem:[%s14115_s1 + $0x7a0] sm:$0xff]  }
  0x8c   :  { %9729 = vmatpush3.bf16.msra.mxu0 %v10800_v34  ;;  %v8700_v34 = vcombine.low %v39_v31, %v39_v31 }
  0x8d   :  { %9751 = vmatpush3.bf16.msra.mxu1 %v10801_v35  ;;  %9730 = vmatprep.subr.bf16.mxu0 %v10802_v36  ;;  %v8701_v35 = vcombine.high %v39_v31, %v39_v31  ;;  %v10862_v36 = vld [vmem:[%s14115_s1 + $0x640] sm:$0xff]  }
  0x8e   :  { %9752 = vmatprep.subr.bf16.mxu1 %v10803_v37  ;;  %v10863_v37 = vld [vmem:[%s14115_s1 + $0x6c0] sm:$0xff]  }
  0x90   :  { %9731 = vmatpush3.bf16.msra.mxu0 %v10804_v38  ;;  %v10864_v38 = vld [vmem:[%s14115_s1 + $0x600] sm:$0xff]  }
  0x91   :  { %9753 = vmatpush3.bf16.msra.mxu1 %v10805_v39  ;;  %9732 = vmatprep.subr.bf16.mxu0 %v10806_v40  ;;  %v10865_v39 = vld [vmem:[%s14115_s1 + $0x680] sm:$0xff]   ;;  %v10866_v40 = vld [vmem:[%s14115_s1 + $0x648] sm:$0xff]  }
  0x92   :  { %9754 = vmatprep.subr.bf16.mxu1 %v10807_v41  ;;  %v10867_v41 = vld [vmem:[%s14115_s1 + $0x6c8] sm:$0xff]  }
  0x94   :  { %9733 = vmatpush3.bf16.msra.mxu0 %v10808_v42  ;;  %v10868_v42 = vld [vmem:[%s14115_s1 + $0x608] sm:$0xff]  }
  0x95   :  { %9755 = vmatpush3.bf16.msra.mxu1 %v10809_v43  ;;  %9734 = vmatprep.subr.bf16.mxu0 %v10810_v44  ;;  %v10869_v43 = vld [vmem:[%s14115_s1 + $0x688] sm:$0xff]   ;;  %v10870_v44 = vld [vmem:[%s14115_s1 + $0x650] sm:$0xff]  }
  0x96   :  { %9756 = vmatprep.subr.bf16.mxu1 %v10811_v45  ;;  %v10871_v45 = vld [vmem:[%s14115_s1 + $0x6d0] sm:$0xff]  }
  0x98   :  { %9735 = vmatpush3.bf16.msra.mxu0 %v10812_v46  ;;  %v10872_v46 = vld [vmem:[%s14115_s1 + $0x610] sm:$0xff]  }
  0x99   :  { %9757 = vmatpush3.bf16.msra.mxu1 %v10813_v47  ;;  %9736 = vmatprep.subr.bf16.mxu0 %v10814_v48  ;;  %v10873_v47 = vld [vmem:[%s14115_s1 + $0x690] sm:$0xff]   ;;  %v10874_v48 = vld [vmem:[%s14115_s1 + $0x658] sm:$0xff]  }
  0x9a   :  { %9758 = vmatprep.subr.bf16.mxu1 %v10815_v49  ;;  %v10875_v49 = vld [vmem:[%s14115_s1 + $0x6d8] sm:$0xff]  }
  0x9c   :  { %9737 = vmatpush3.bf16.msra.mxu0 %v10816_v50  ;;  %v10876_v50 = vld [vmem:[%s14115_s1 + $0x618] sm:$0xff]  }
  0x9d   :  { %9759 = vmatpush3.bf16.msra.mxu1 %v10817_v51  ;;  %9738 = vmatprep.subr.bf16.mxu0 %v10818_v52  ;;  %v10877_v51 = vld [vmem:[%s14115_s1 + $0x698] sm:$0xff]   ;;  %v10878_v52 = vld [vmem:[%s14115_s1 + $0x660] sm:$0xff]  }
  0x9e   :  { %9760 = vmatprep.subr.bf16.mxu1 %v10819_v53  ;;  %v10879_v53 = vld [vmem:[%s14115_s1 + $0x6e0] sm:$0xff]  }
  0xa0   :  { %9739 = vmatpush3.bf16.msra.mxu0 %v10820_v54  ;;  %v10880_v54 = vld [vmem:[%s14115_s1 + $0x620] sm:$0xff]  }
  0xa1   :  { %9761 = vmatpush3.bf16.msra.mxu1 %v10821_v55  ;;  %9768 = vmatprep.subr.bf16.mxu0 %v10826_v62  ;;  %v10881_v55 = vld [vmem:[%s14115_s1 + $0x6a0] sm:$0xff]   ;;  %v10888_v62 = vld [vmem:[%s14115_s1 + $0x630] sm:$0xff]  }
  0xa2   :  { %9790 = vmatprep.subr.bf16.mxu1 %v10827_v63  ;;  %v10889_v63 = vld [vmem:[%s14115_s1 + $0x6b0] sm:$0xff]  }
  0xa3   :  { %6916 = vmatmul.mubr.bf16.vlgmr.msra.gmra.mrb[16].mxu0 %v8694_v57  ;;  %v10883_v57 = vld [vmem:[%s14115_s1 + $0x6e8] sm:$0xff]  }
  0xa4   :  { %6956 = vmatmul.mubr.bf16.vlgmr.msra.gmra.mrb[16].mxu1 %v8696_v60  ;;  %9769 = vmatpush3.bf16.msra.mxu0 %v10828_v0  ;;  %v10886_v60 = vld [vmem:[%s14115_s1 + $0x670] sm:$0xff]   ;;  %v10890_v0 = vld [vmem:[%s14115_s1 + $0x678] sm:$0xff]  }
  0xa5   :  { %9791 = vmatpush3.bf16.msra.mxu1 %v10829_v1  ;;  %9770 = vmatprep.subr.bf16.mxu0 %v10830_v2  ;;  %v10891_v1 = vld [vmem:[%s14115_s1 + $0x6f8] sm:$0xff]  }
  0xa6   :  { %9792 = vmatprep.subr.bf16.mxu1 %v10831_v3  ;;  %6995 = vmatprep.mubr.bf16.mxu0 %v8699_v33  ;;  %v10892_v2 = vld [vmem:[%s14115_s1 + $0x638] sm:$0xff]  }
  0xa7   :  { %7035 = vmatprep.mubr.bf16.mxu1 %v8701_v35  ;;  %v10893_v3 = vld [vmem:[%s14115_s1 + $0x6b8] sm:$0xff]  }
  0xa8   :  { %9771 = vmatpush3.bf16.msra.mxu0 %v10832_v4  ;;  %v40_v4 = vld [vmem:[%s14114_s0 + $0x60] sm:$0xff] }
  0xa9   :  { %9793 = vmatpush3.bf16.msra.mxu1 %v10833_v5  ;;  %9772 = vmatprep.subr.bf16.mxu0 %v10834_v6  ;;  %v41_v5 = vld [vmem:[%s14114_s0 + $0x68] sm:$0xff]  ;;  %v8702_v6 = vcombine.low %v40_v4, %v40_v4 }
  0xaa   :  { %9794 = vmatprep.subr.bf16.mxu1 %v10835_v7  ;;  %v8703_v7 = vcombine.high %v40_v4, %v40_v4  ;;  %v10941_v4 = vld [vmem:[%s14115_s1 + $0x888] sm:$0xff]  }
  0xac   :  { %9773 = vmatpush3.bf16.msra.mxu0 %v10836_v8  ;;  %v8704_v8 = vcombine.low %v41_v5, %v41_v5 }
  0xad   :  { %9795 = vmatpush3.bf16.msra.mxu1 %v10837_v9  ;;  %9774 = vmatprep.subr.bf16.mxu0 %v10838_v10  ;;  %v10898_v9 = vld [vmem:[%s14115_s1 + $0x740] sm:$0xff]   ;;  %v8705_v10 = vcombine.high %v41_v5, %v41_v5  ;;  %v10942_v5 = vld [vmem:[%s14115_s1 + $0x850] sm:$0xff]  }
  0xae   :  { %9796 = vmatprep.subr.bf16.mxu1 %v10839_v11  ;;  %v10899_v11 = vld [vmem:[%s14115_s1 + $0x7c0] sm:$0xff]  }
  0xb0   :  { %9775 = vmatpush3.bf16.msra.mxu0 %v10840_v12  ;;  %v10900_v12 = vld [vmem:[%s14115_s1 + $0x700] sm:$0xff]  }
  0xb1   :  { %9797 = vmatpush3.bf16.msra.mxu1 %v10841_v13  ;;  %9776 = vmatprep.subr.bf16.mxu0 %v10842_v14  ;;  %v10901_v13 = vld [vmem:[%s14115_s1 + $0x780] sm:$0xff]   ;;  %v10902_v14 = vld [vmem:[%s14115_s1 + $0x748] sm:$0xff]  }
  0xb2   :  { %9798 = vmatprep.subr.bf16.mxu1 %v10843_v15  ;;  %v10903_v15 = vld [vmem:[%s14115_s1 + $0x7c8] sm:$0xff]  }
  0xb4   :  { %9777 = vmatpush3.bf16.msra.mxu0 %v10844_v16  ;;  %v10904_v16 = vld [vmem:[%s14115_s1 + $0x708] sm:$0xff]  }
  0xb5   :  { %9799 = vmatpush3.bf16.msra.mxu1 %v10845_v17  ;;  %9778 = vmatprep.subr.bf16.mxu0 %v10846_v18  ;;  %v10905_v17 = vld [vmem:[%s14115_s1 + $0x788] sm:$0xff]   ;;  %v10906_v18 = vld [vmem:[%s14115_s1 + $0x750] sm:$0xff]  }
  0xb6   :  { %9800 = vmatprep.subr.bf16.mxu1 %v10847_v19  ;;  %v10907_v19 = vld [vmem:[%s14115_s1 + $0x7d0] sm:$0xff]  }
  0xb8   :  { %9779 = vmatpush3.bf16.msra.mxu0 %v10848_v20  ;;  %v10908_v20 = vld [vmem:[%s14115_s1 + $0x710] sm:$0xff]  }
  0xb9   :  { %9801 = vmatpush3.bf16.msra.mxu1 %v10849_v21  ;;  %9780 = vmatprep.subr.bf16.mxu0 %v10850_v22  ;;  %v10909_v21 = vld [vmem:[%s14115_s1 + $0x790] sm:$0xff]   ;;  %v10910_v22 = vld [vmem:[%s14115_s1 + $0x758] sm:$0xff]  }
  0xba   :  { %9802 = vmatprep.subr.bf16.mxu1 %v10851_v23  ;;  %v10911_v23 = vld [vmem:[%s14115_s1 + $0x7d8] sm:$0xff]  }
  0xbc   :  { %9781 = vmatpush3.bf16.msra.mxu0 %v10852_v24  ;;  %v10912_v24 = vld [vmem:[%s14115_s1 + $0x718] sm:$0xff]  }
  0xbd   :  { %9803 = vmatpush3.bf16.msra.mxu1 %v10853_v25  ;;  %9782 = vmatprep.subr.bf16.mxu0 %v10854_v26  ;;  %v10913_v25 = vld [vmem:[%s14115_s1 + $0x798] sm:$0xff]   ;;  %v10914_v26 = vld [vmem:[%s14115_s1 + $0x760] sm:$0xff]  }
  0xbe   :  { %9804 = vmatprep.subr.bf16.mxu1 %v10855_v27  ;;  %v10915_v27 = vld [vmem:[%s14115_s1 + $0x7e0] sm:$0xff]  }
  0xc0   :  { %9783 = vmatpush3.bf16.msra.mxu0 %v10856_v28  ;;  %v10916_v28 = vld [vmem:[%s14115_s1 + $0x720] sm:$0xff]  }
  0xc1   :  { %9805 = vmatpush3.bf16.msra.mxu1 %v10857_v29  ;;  %9812 = vmatprep.subr.bf16.mxu0 %v10862_v36 }
  0xc2   :  { %9834 = vmatprep.subr.bf16.mxu1 %v10863_v37  ;;  %v10918_v37 = vld [vmem:[%s14115_s1 + $0x768] sm:$0xff]  }
  0xc3   :  { %6996 = vmatmul.mubr.bf16.vlgmr.msra.gmra.mrb[20].mxu0 %v8698_v32  ;;  %v8677_v32 = vld [vmem:[%s14116_s2] ss:$0 sm:$0xff] }
  0xc4   :  { %7036 = vmatmul.mubr.bf16.vlgmr.msra.gmra.mrb[20].mxu1 %v8700_v34  ;;  %9813 = vmatpush3.bf16.msra.mxu0 %v10864_v38 }
  0xc5   :  { %9835 = vmatpush3.bf16.msra.mxu1 %v10865_v39  ;;  %9814 = vmatprep.subr.bf16.mxu0 %v10866_v40  ;;  %v10919_v39 = vld [vmem:[%s14115_s1 + $0x7e8] sm:$0xff]  }
  0xc6   :  { %9836 = vmatprep.subr.bf16.mxu1 %v10867_v41  ;;  %7075 = vmatprep.mubr.bf16.mxu0 %v8703_v7  ;;  %v10944_v7 = vld [vmem:[%s14115_s1 + $0x810] sm:$0xff]  }
  0xc7   :  { %7115 = vmatprep.mubr.bf16.mxu1 %v8705_v10  ;;  %v10947_v10 = vld [vmem:[%s14115_s1 + $0x8d8] sm:$0xff]  }
  0xc8   :  { %9815 = vmatpush3.bf16.msra.mxu0 %v10868_v42  ;;  %v10920_v42 = vld [vmem:[%s14115_s1 + $0x728] sm:$0xff]  }
  0xc9   :  { %9837 = vmatpush3.bf16.msra.mxu1 %v10869_v43  ;;  %9816 = vmatprep.subr.bf16.mxu0 %v10870_v44  ;;  %v10921_v44 = vld [vmem:[%s14115_s1 + $0x7a8] sm:$0xff]  }
  0xca   :  { %9838 = vmatprep.subr.bf16.mxu1 %v10871_v45 }
  0xcc   :  { %9817 = vmatpush3.bf16.msra.mxu0 %v10872_v46 }
  0xcd   :  { %9839 = vmatpush3.bf16.msra.mxu1 %v10873_v47  ;;  %9818 = vmatprep.subr.bf16.mxu0 %v10874_v48  ;;  %v10922_v47 = vld [vmem:[%s14115_s1 + $0x770] sm:$0xff]  }
  0xce   :  { %9840 = vmatprep.subr.bf16.mxu1 %v10875_v49  ;;  %v10923_v48 = vld [vmem:[%s14115_s1 + $0x7f0] sm:$0xff]  }
  0xcf   :  { %v10924_v49 = vld [vmem:[%s14115_s1 + $0x730] sm:$0xff]  }
  0xd0   :  { %9819 = vmatpush3.bf16.msra.mxu0 %v10876_v50  ;;  %v10925_v50 = vld [vmem:[%s14115_s1 + $0x7b0] sm:$0xff]  }
  0xd1   :  { %9841 = vmatpush3.bf16.msra.mxu1 %v10877_v51  ;;  %9820 = vmatprep.subr.bf16.mxu0 %v10878_v52  ;;  %v10926_v51 = vld [vmem:[%s14115_s1 + $0x778] sm:$0xff]  }
  0xd2   :  { %9842 = vmatprep.subr.bf16.mxu1 %v10879_v53  ;;  %v10927_v52 = vld [vmem:[%s14115_s1 + $0x7f8] sm:$0xff]  }
  0xd3   :  { %v10928_v53 = vld [vmem:[%s14115_s1 + $0x738] sm:$0xff]  }
  0xd4   :  { %9821 = vmatpush3.bf16.msra.mxu0 %v10880_v54  ;;  %v10929_v54 = vld [vmem:[%s14115_s1 + $0x7b8] sm:$0xff]  }
  0xd5   :  { %9843 = vmatpush3.bf16.msra.mxu1 %v10881_v55  ;;  %9822 = vmatprep.subr.bf16.mxu0 %v10882_v56  ;;  %v42_v55 = vld [vmem:[%s14114_s0 + $0x70] sm:$0xff]  ;;  %v43_v56 = vld [vmem:[%s14114_s0 + $0x78] sm:$0xff] }
  0xd6   :  { %9844 = vmatprep.subr.bf16.mxu1 %v10883_v57  ;;  %v8706_v57 = vcombine.low %v42_v55, %v42_v55 }
  0xd8   :  { %9823 = vmatpush3.bf16.msra.mxu0 %v10884_v58  ;;  %v8707_v58 = vcombine.high %v42_v55, %v42_v55  ;;  %v10978_v55 = vld [vmem:[%s14115_s1 + $0x950] sm:$0xff]  }
  0xd9   :  { %9845 = vmatpush3.bf16.msra.mxu1 %v10885_v59  ;;  %9824 = vmatprep.subr.bf16.mxu0 %v10886_v60  ;;  %v8708_v59 = vcombine.low %v43_v56, %v43_v56  ;;  %v8709_v60 = vcombine.high %v43_v56, %v43_v56  ;;  %v10979_v56 = vld [vmem:[%s14115_s1 + $0x9d0] sm:$0xff]  }
  0xda   :  { %9846 = vmatprep.subr.bf16.mxu1 %v10887_v61  ;;  %v10934_v61 = vld [vmem:[%s14115_s1 + $0x840] sm:$0xff]  }
  0xdc   :  { %9825 = vmatpush3.bf16.msra.mxu0 %v10888_v62  ;;  %v10935_v62 = vld [vmem:[%s14115_s1 + $0x8c0] sm:$0xff]  }
  0xdd   :  { %9847 = vmatpush3.bf16.msra.mxu1 %v10889_v63  ;;  %9826 = vmatprep.subr.bf16.mxu0 %v10890_v0  ;;  %v10936_v63 = vld [vmem:[%s14115_s1 + $0x800] sm:$0xff]  }
  0xde   :  { %9848 = vmatprep.subr.bf16.mxu1 %v10891_v1  ;;  %v10937_v0 = vld [vmem:[%s14115_s1 + $0x880] sm:$0xff]   ;;  %v10938_v1 = vld [vmem:[%s14115_s1 + $0x848] sm:$0xff]  }
  0xe0   :  { %9827 = vmatpush3.bf16.msra.mxu0 %v10892_v2  ;;  %v10939_v2 = vld [vmem:[%s14115_s1 + $0x8c8] sm:$0xff]  }
  0xe1   :  { %9849 = vmatpush3.bf16.msra.mxu1 %v10893_v3  ;;  %9856 = vmatprep.subr.bf16.mxu0 %v10898_v9  ;;  %v10940_v3 = vld [vmem:[%s14115_s1 + $0x808] sm:$0xff]   ;;  %v10946_v9 = vld [vmem:[%s14115_s1 + $0x858] sm:$0xff]  }
  0xe2   :  { %9878 = vmatprep.subr.bf16.mxu1 %v10899_v11  ;;  %v10948_v11 = vld [vmem:[%s14115_s1 + $0x818] sm:$0xff]  }
  0xe3   :  { %7076 = vmatmul.mubr.bf16.vlgmr.msra.gmra.mrb[24].mxu0 %v8702_v6  ;;  %v10943_v6 = vld [vmem:[%s14115_s1 + $0x8d0] sm:$0xff]  }
  0xe4   :  { %7116 = vmatmul.mubr.bf16.vlgmr.msra.gmra.mrb[24].mxu1 %v8704_v8  ;;  %9857 = vmatpush3.bf16.msra.mxu0 %v10900_v12  ;;  %v10945_v8 = vld [vmem:[%s14115_s1 + $0x890] sm:$0xff]   ;;  %v10949_v12 = vld [vmem:[%s14115_s1 + $0x898] sm:$0xff]  }
  0xe5   :  { %9879 = vmatpush3.bf16.msra.mxu1 %v10901_v13  ;;  %9858 = vmatprep.subr.bf16.mxu0 %v10902_v14  ;;  %v10950_v13 = vld [vmem:[%s14115_s1 + $0x860] sm:$0xff]  }
  0xe6   :  { %9880 = vmatprep.subr.bf16.mxu1 %v10903_v15  ;;  %7155 = vmatprep.mubr.bf16.mxu0 %v8707_v58  ;;  %v10951_v14 = vld [vmem:[%s14115_s1 + $0x8e0] sm:$0xff]   ;;  %v10981_v58 = vld [vmem:[%s14115_s1 + $0x990] sm:$0xff]  }
  0xe7   :  { %7195 = vmatprep.mubr.bf16.mxu1 %v8709_v60  ;;  %v10952_v15 = vld [vmem:[%s14115_s1 + $0x820] sm:$0xff]   ;;  %v10983_v60 = vld [vmem:[%s14115_s1 + $0x9d8] sm:$0xff]  }
  0xe8   :  { %9859 = vmatpush3.bf16.msra.mxu0 %v10904_v16 }
  0xe9   :  { %9881 = vmatpush3.bf16.msra.mxu1 %v10905_v17  ;;  %9860 = vmatprep.subr.bf16.mxu0 %v10906_v18  ;;  %v10953_v17 = vld [vmem:[%s14115_s1 + $0x8a0] sm:$0xff]  }
  0xea   :  { %9882 = vmatprep.subr.bf16.mxu1 %v10907_v19 }
  0xec   :  { %9861 = vmatpush3.bf16.msra.mxu0 %v10908_v20 }
  0xed   :  { %9883 = vmatpush3.bf16.msra.mxu1 %v10909_v21  ;;  %9862 = vmatprep.subr.bf16.mxu0 %v10910_v22 }
  0xee   :  { %9884 = vmatprep.subr.bf16.mxu1 %v10911_v23  ;;  %v10954_v23 = vld [vmem:[%s14115_s1 + $0x868] sm:$0xff]  }
  0xf0   :  { %9863 = vmatpush3.bf16.msra.mxu0 %v10912_v24 }
  0xf1   :  { %9885 = vmatpush3.bf16.msra.mxu1 %v10913_v25  ;;  %9864 = vmatprep.subr.bf16.mxu0 %v10914_v26  ;;  %v10955_v25 = vld [vmem:[%s14115_s1 + $0x8e8] sm:$0xff]  }
  0xf2   :  { %9886 = vmatprep.subr.bf16.mxu1 %v10915_v27 }
  0xf4   :  { %9865 = vmatpush3.bf16.msra.mxu0 %v10916_v28  ;;  %v10956_v28 = vld [vmem:[%s14115_s1 + $0x828] sm:$0xff]  }
  0xf5   :  { %9887 = vmatpush3.bf16.msra.mxu1 %v10917_v30  ;;  %9866 = vmatprep.subr.bf16.mxu0 %v10918_v37  ;;  %v10957_v30 = vld [vmem:[%s14115_s1 + $0x8a8] sm:$0xff]   ;;  %v10962_v37 = vld [vmem:[%s14115_s1 + $0x878] sm:$0xff]  }
  0xf6   :  { %v9564_v29 = vpop.f32.mrb[0].mxu0  ;;  %9888 = vmatprep.subr.bf16.mxu1 %v10919_v39  ;;  %v10964_v39 = vld [vmem:[%s14115_s1 + $0x838] sm:$0xff]  }
  0xf7   :  { %v9586_v31 = vpop.f32.mrb[0].mxu1  ;;  %v9565_v33 = vpop.f32.mrb[1].mxu0 }
  0xf8   :  { %v9587_v34 = vpop.f32.mrb[1].mxu1  ;;  %v9566_v35 = vadd.f32 %v9565_v33, %v9564_v29  ;;  %v9567_v38 = vpop.f32.mrb[2].mxu0  ;;  %9867 = vmatpush3.bf16.msra.mxu0 %v10920_v42  ;;  %v10958_v33 = vld [vmem:[%s14115_s1 + $0x870] sm:$0xff]   ;;  %v45_v42 = vld [vmem:[%s14114_s0 + $0x88] sm:$0xff] }
  0xf9   :  { %v9588_v36 = vadd.f32 %v9587_v34, %v9586_v31  ;;  %v9589_v40 = vpop.f32.mrb[2].mxu1  ;;  %v9568_v43 = vpop.f32.mrb[3].mxu0  ;;  %9889 = vmatpush3.bf16.msra.mxu1 %v10921_v44  ;;  %9868 = vmatprep.subr.bf16.mxu0 %v10922_v47  ;;  %v10959_v34 = vld [vmem:[%s14115_s1 + $0x8f0] sm:$0xff]   ;;  %v10963_v38 = vld [vmem:[%s14115_s1 + $0x8f8] sm:$0xff]   ;;  %v10970_v47 = vld [vmem:[%s14115_s1 + $0x940] sm:$0xff]  }
  0xfa   :  { %v6598_v41 = vadd.f32 %v9566_v35, %v8677_v32  ;;  %v9590_v45 = vpop.f32.mrb[3].mxu1  ;;  %9890 = vmatprep.subr.bf16.mxu1 %v10923_v48  ;;  %v10960_v35 = vld [vmem:[%s14115_s1 + $0x830] sm:$0xff]   ;;  %v10965_v40 = vld [vmem:[%s14115_s1 + $0x8b8] sm:$0xff]   ;;  %v10971_v48 = vld [vmem:[%s14115_s1 + $0x9c0] sm:$0xff]  }
  0xfb   :  { %v8712_v45 = vcombine.low %v45_v42, %v45_v42 }
  0xfc   :  { %v12368_v46 = vadd.f32 %v9588_v36, %v6598_v41  ;;  %9869 = vmatpush3.bf16.msra.mxu0 %v10924_v49  ;;  %v10961_v36 = vld [vmem:[%s14115_s1 + $0x8b0] sm:$0xff]   ;;  %v44_v41 = vld [vmem:[%s14114_s0 + $0x80] sm:$0xff] }
  0xfd   :  { %9891 = vmatpush3.bf16.msra.mxu1 %v10925_v50  ;;  %9870 = vmatprep.subr.bf16.mxu0 %v10926_v51  ;;  %v8710_v43 = vcombine.low %v44_v41, %v44_v41  ;;  %v8711_v44 = vcombine.high %v44_v41, %v44_v41  ;;  %v10972_v49 = vld [vmem:[%s14115_s1 + $0x900] sm:$0xff]   ;;  %v10974_v51 = vld [vmem:[%s14115_s1 + $0x948] sm:$0xff]   ;;  %v11014_v41 = vld [vmem:[%s14115_s1 + $0xa50] sm:$0xff]  }
  0xfe   :  { %9892 = vmatprep.subr.bf16.mxu1 %v10927_v52  ;;  %v10973_v50 = vld [vmem:[%s14115_s1 + $0x980] sm:$0xff]   ;;  %v10975_v52 = vld [vmem:[%s14115_s1 + $0x9c8] sm:$0xff]  }
 0x100   :  { %9871 = vmatpush3.bf16.msra.mxu0 %v10928_v53  ;;  %v10976_v53 = vld [vmem:[%s14115_s1 + $0x908] sm:$0xff]  }
 0x101   :  { %9893 = vmatpush3.bf16.msra.mxu1 %v10929_v54  ;;  %9900 = vmatprep.subr.bf16.mxu0 %v10934_v61  ;;  %v10977_v54 = vld [vmem:[%s14115_s1 + $0x988] sm:$0xff]   ;;  %v10984_v61 = vld [vmem:[%s14115_s1 + $0x918] sm:$0xff]  }
 0x102   :  { %9922 = vmatprep.subr.bf16.mxu1 %v10935_v62  ;;  %v10985_v62 = vld [vmem:[%s14115_s1 + $0x998] sm:$0xff]  }
 0x103   :  { %7156 = vmatmul.mubr.bf16.vlgmr.msra.gmra.mrb[28].mxu0 %v8706_v57  ;;  %v10980_v57 = vld [vmem:[%s14115_s1 + $0x910] sm:$0xff]  }
 0x104   :  { %7196 = vmatmul.mubr.bf16.vlgmr.msra.gmra.mrb[28].mxu1 %v8708_v59  ;;  %9901 = vmatpush3.bf16.msra.mxu0 %v10936_v63  ;;  %v10982_v59 = vld [vmem:[%s14115_s1 + $0x958] sm:$0xff]   ;;  %v10986_v63 = vld [vmem:[%s14115_s1 + $0x960] sm:$0xff]  }
 0x105   :  { %9923 = vmatpush3.bf16.msra.mxu1 %v10937_v0  ;;  %9902 = vmatprep.subr.bf16.mxu0 %v10938_v1  ;;  %v10987_v0 = vld [vmem:[%s14115_s1 + $0x9e0] sm:$0xff]  }
 0x106   :  { %9924 = vmatprep.subr.bf16.mxu1 %v10939_v2  ;;  %7235 = vmatprep.mubr.bf16.mxu0 %v8711_v44  ;;  %v10988_v2 = vld [vmem:[%s14115_s1 + $0x920] sm:$0xff]   ;;  %v11017_v44 = vld [vmem:[%s14115_s1 + $0xa90] sm:$0xff]  }
 0x108   :  { %9903 = vmatpush3.bf16.msra.mxu0 %v10940_v3 }
 0x109   :  { %9925 = vmatpush3.bf16.msra.mxu1 %v10941_v4  ;;  %9904 = vmatprep.subr.bf16.mxu0 %v10942_v5  ;;  %v10989_v4 = vld [vmem:[%s14115_s1 + $0x9a0] sm:$0xff]  }
 0x10a   :  { %9926 = vmatprep.subr.bf16.mxu1 %v10943_v6 }
 0x10c   :  { %9905 = vmatpush3.bf16.msra.mxu0 %v10944_v7 }
 0x10d   :  { %9927 = vmatpush3.bf16.msra.mxu1 %v10945_v8  ;;  %9906 = vmatprep.subr.bf16.mxu0 %v10946_v9  ;;  %v10990_v8 = vld [vmem:[%s14115_s1 + $0x968] sm:$0xff]  }
 0x10e   :  { %9928 = vmatprep.subr.bf16.mxu1 %v10947_v10  ;;  %v10991_v10 = vld [vmem:[%s14115_s1 + $0x9e8] sm:$0xff]  }
 0x110   :  { %9907 = vmatpush3.bf16.msra.mxu0 %v10948_v11 }
 0x111   :  { %9929 = vmatpush3.bf16.msra.mxu1 %v10949_v12  ;;  %9908 = vmatprep.subr.bf16.mxu0 %v10950_v13 }
 0x112   :  { %9930 = vmatprep.subr.bf16.mxu1 %v10951_v14  ;;  %v10992_v14 = vld [vmem:[%s14115_s1 + $0x928] sm:$0xff]  }
 0x114   :  { %9909 = vmatpush3.bf16.msra.mxu0 %v10952_v15  ;;  %v10993_v15 = vld [vmem:[%s14115_s1 + $0x9a8] sm:$0xff]  }
 0x115   :  { %9931 = vmatpush3.bf16.msra.mxu1 %v10953_v17  ;;  %9910 = vmatprep.subr.bf16.mxu0 %v10954_v23  ;;  %v10998_v23 = vld [vmem:[%s14115_s1 + $0x978] sm:$0xff]  }
 0x116   :  { %v9608_v16 = vpop.f32.mrb[4].mxu0  ;;  %9932 = vmatprep.subr.bf16.mxu1 %v10955_v25  ;;  %v11000_v25 = vld [vmem:[%s14115_s1 + $0x938] sm:$0xff]  }
 0x117   :  { %v9630_v18 = vpop.f32.mrb[4].mxu1  ;;  %v9609_v19 = vpop.f32.mrb[5].mxu0 }
 0x118   :  { %v9631_v20 = vpop.f32.mrb[5].mxu1  ;;  %v9610_v21 = vadd.f32 %v9609_v19, %v9608_v16  ;;  %v9611_v24 = vpop.f32.mrb[6].mxu0  ;;  %9911 = vmatpush3.bf16.msra.mxu0 %v10956_v28  ;;  %v10994_v19 = vld [vmem:[%s14115_s1 + $0x970] sm:$0xff]   ;;  %v47_v28 = vld [vmem:[%s14114_s0 + $0x98] sm:$0xff] }
 0x119   :  { %v9632_v22 = vadd.f32 %v9631_v20, %v9630_v18  ;;  %v9633_v26 = vpop.f32.mrb[6].mxu1  ;;  %v9612_v29 = vpop.f32.mrb[7].mxu0  ;;  %9933 = vmatpush3.bf16.msra.mxu1 %v10957_v30  ;;  %9912 = vmatprep.subr.bf16.mxu0 %v10958_v33  ;;  %v10995_v20 = vld [vmem:[%s14115_s1 + $0x9f0] sm:$0xff]   ;;  %v10999_v24 = vld [vmem:[%s14115_s1 + $0x9f8] sm:$0xff]   ;;  %v8717_v33 = vcombine.high %v47_v28, %v47_v28 }
 0x11a   :  { %v6678_v27 = vadd.f32 %v9610_v21, %v12368_v46  ;;  %v9634_v31 = vpop.f32.mrb[7].mxu1  ;;  %9934 = vmatprep.subr.bf16.mxu1 %v10959_v34  ;;  %v8713_v46 = vcombine.high %v45_v42, %v45_v42  ;;  %v10996_v21 = vld [vmem:[%s14115_s1 + $0x930] sm:$0xff]   ;;  %v11001_v26 = vld [vmem:[%s14115_s1 + $0x9b8] sm:$0xff]   ;;  %v11007_v34 = vld [vmem:[%s14115_s1 + $0xac0] sm:$0xff]  }
 0x11b   :  { %v8716_v31 = vcombine.low %v47_v28, %v47_v28  ;;  %v11015_v42 = vld [vmem:[%s14115_s1 + $0xad0] sm:$0xff]  }
 0x11c   :  { %v12473_v32 = vadd.f32 %v9632_v22, %v6678_v27  ;;  %9913 = vmatpush3.bf16.msra.mxu0 %v10960_v35  ;;  %7275 = vmatprep.mubr.bf16.mxu1 %v8713_v46  ;;  %v10997_v22 = vld [vmem:[%s14115_s1 + $0x9b0] sm:$0xff]   ;;  %v11008_v35 = vld [vmem:[%s14115_s1 + $0xa00] sm:$0xff]   ;;  %v11019_v46 = vld [vmem:[%s14115_s1 + $0xad8] sm:$0xff]  }
 0x11d   :  { %9935 = vmatpush3.bf16.msra.mxu1 %v10961_v36  ;;  %9914 = vmatprep.subr.bf16.mxu0 %v10962_v37  ;;  %v46_v27 = vld [vmem:[%s14114_s0 + $0x90] sm:$0xff]  ;;  %v11009_v36 = vld [vmem:[%s14115_s1 + $0xa80] sm:$0xff]   ;;  %v11010_v37 = vld [vmem:[%s14115_s1 + $0xa48] sm:$0xff]  }
 0x11e   :  { %9936 = vmatprep.subr.bf16.mxu1 %v10963_v38  ;;  %v8714_v29 = vcombine.low %v46_v27, %v46_v27  ;;  %v8715_v30 = vcombine.high %v46_v27, %v46_v27  ;;  %v11011_v38 = vld [vmem:[%s14115_s1 + $0xac8] sm:$0xff]   ;;  %v11050_v27 = vld [vmem:[%s14115_s1 + $0xb50] sm:$0xff]  }
 0x11f   :  { %v11051_v28 = vld [vmem:[%s14115_s1 + $0xbd0] sm:$0xff]  }
 0x120   :  { %9915 = vmatpush3.bf16.msra.mxu0 %v10964_v39  ;;  %v11012_v39 = vld [vmem:[%s14115_s1 + $0xa08] sm:$0xff]  }
 0x121   :  { %9937 = vmatpush3.bf16.msra.mxu1 %v10965_v40  ;;  %9944 = vmatprep.subr.bf16.mxu0 %v10970_v47  ;;  %v11013_v40 = vld [vmem:[%s14115_s1 + $0xa88] sm:$0xff]   ;;  %v11020_v47 = vld [vmem:[%s14115_s1 + $0xa18] sm:$0xff]  }
 0x122   :  { %9966 = vmatprep.subr.bf16.mxu1 %v10971_v48  ;;  %v11021_v48 = vld [vmem:[%s14115_s1 + $0xa98] sm:$0xff]  }
 0x123   :  { %7236 = vmatmul.mubr.bf16.vlgmr.msra.gmra.mrb[32].mxu0 %v8710_v43  ;;  %v11016_v43 = vld [vmem:[%s14115_s1 + $0xa10] sm:$0xff]  }
 0x124   :  { %7276 = vmatmul.mubr.bf16.vlgmr.msra.gmra.mrb[32].mxu1 %v8712_v45  ;;  %9945 = vmatpush3.bf16.msra.mxu0 %v10972_v49  ;;  %v11018_v45 = vld [vmem:[%s14115_s1 + $0xa58] sm:$0xff]   ;;  %v11022_v49 = vld [vmem:[%s14115_s1 + $0xa60] sm:$0xff]  }
 0x125   :  { %9967 = vmatpush3.bf16.msra.mxu1 %v10973_v50  ;;  %9946 = vmatprep.subr.bf16.mxu0 %v10974_v51  ;;  %v11023_v50 = vld [vmem:[%s14115_s1 + $0xae0] sm:$0xff]  }
 0x126   :  { %9968 = vmatprep.subr.bf16.mxu1 %v10975_v52  ;;  %7315 = vmatprep.mubr.bf16.mxu0 %v8715_v30  ;;  %v11024_v52 = vld [vmem:[%s14115_s1 + $0xa20] sm:$0xff]   ;;  %v11053_v30 = vld [vmem:[%s14115_s1 + $0xb90] sm:$0xff]  }
 0x127   :  { %7355 = vmatprep.mubr.bf16.mxu1 %v8717_v33  ;;  %v11056_v33 = vld [vmem:[%s14115_s1 + $0xb18] sm:$0xff]  }
 0x128   :  { %9947 = vmatpush3.bf16.msra.mxu0 %v10976_v53 }
 0x129   :  { %9969 = vmatpush3.bf16.msra.mxu1 %v10977_v54  ;;  %9948 = vmatprep.subr.bf16.mxu0 %v10978_v55  ;;  %v11025_v54 = vld [vmem:[%s14115_s1 + $0xaa0] sm:$0xff]  }
 0x12a   :  { %9970 = vmatprep.subr.bf16.mxu1 %v10979_v56 }
 0x12c   :  { %9949 = vmatpush3.bf16.msra.mxu0 %v10980_v57  ;;  %v11026_v57 = vld [vmem:[%s14115_s1 + $0xa68] sm:$0xff]  }
 0x12d   :  { %9971 = vmatpush3.bf16.msra.mxu1 %v10981_v58  ;;  %9950 = vmatprep.subr.bf16.mxu0 %v10982_v59 }
 0x12e   :  { %9972 = vmatprep.subr.bf16.mxu1 %v10983_v60  ;;  %v11027_v60 = vld [vmem:[%s14115_s1 + $0xae8] sm:$0xff]  }
 0x130   :  { %9951 = vmatpush3.bf16.msra.mxu0 %v10984_v61 }
 0x131   :  { %9973 = vmatpush3.bf16.msra.mxu1 %v10985_v62  ;;  %9952 = vmatprep.subr.bf16.mxu0 %v10986_v63  ;;  %v11028_v63 = vld [vmem:[%s14115_s1 + $0xa28] sm:$0xff]  }
 0x132   :  { %9974 = vmatprep.subr.bf16.mxu1 %v10987_v0 }
 0x134   :  { %9953 = vmatpush3.bf16.msra.mxu0 %v10988_v2 }
 0x135   :  { %9975 = vmatpush3.bf16.msra.mxu1 %v10989_v4  ;;  %9954 = vmatprep.subr.bf16.mxu0 %v10990_v8  ;;  %v11030_v4 = vld [vmem:[%s14115_s1 + $0xa70] sm:$0xff]  }
 0x136   :  { %v9652_v1 = vpop.f32.mrb[8].mxu0  ;;  %9976 = vmatprep.subr.bf16.mxu1 %v10991_v10  ;;  %v11033_v8 = vld [vmem:[%s14115_s1 + $0xab0] sm:$0xff]   ;;  %v11035_v10 = vld [vmem:[%s14115_s1 + $0xaf8] sm:$0xff]  }
 0x137   :  { %v9674_v3 = vpop.f32.mrb[8].mxu1  ;;  %v9653_v5 = vpop.f32.mrb[9].mxu0 }
 0x138   :  { %v9654_v6 = vadd.f32 %v9653_v5, %v9652_v1  ;;  %v9675_v7 = vpop.f32.mrb[9].mxu1  ;;  %v9655_v11 = vpop.f32.mrb[10].mxu0  ;;  %9955 = vmatpush3.bf16.msra.mxu0 %v10992_v14  ;;  %v11029_v1 = vld [vmem:[%s14115_s1 + $0xaa8] sm:$0xff]  }
 0x139   :  { %v9676_v9 = vadd.f32 %v9675_v7, %v9674_v3  ;;  %v9677_v13 = vpop.f32.mrb[10].mxu1  ;;  %v9656_v16 = vpop.f32.mrb[11].mxu0  ;;  %9977 = vmatpush3.bf16.msra.mxu1 %v10993_v15  ;;  %9956 = vmatprep.subr.bf16.mxu0 %v10994_v19  ;;  %v11032_v7 = vld [vmem:[%s14115_s1 + $0xa30] sm:$0xff]   ;;  %v11036_v11 = vld [vmem:[%s14115_s1 + $0xa38] sm:$0xff]   ;;  %v11042_v19 = vld [vmem:[%s14115_s1 + $0xb40] sm:$0xff]  }
 0x13a   :  { %v6758_v12 = vadd.f32 %v9654_v6, %v12473_v32  ;;  %v9678_v18 = vpop.f32.mrb[11].mxu1  ;;  %9978 = vmatprep.subr.bf16.mxu1 %v10995_v20  ;;  %v11006_v32 = vld [vmem:[%s14115_s1 + $0xa40] sm:$0xff]   ;;  %v11031_v6 = vld [vmem:[%s14115_s1 + $0xaf0] sm:$0xff]   ;;  %v49_v16 = vld [vmem:[%s14114_s0 + $0xa8] sm:$0xff] }
 0x13b   :  { %v48_v13 = vld [vmem:[%s14114_s0 + $0xa0] sm:$0xff]  ;;  %v8721_v18 = vcombine.high %v49_v16, %v49_v16 }
 0x13c   :  { %v12578_v17 = vadd.f32 %v9676_v9, %v6758_v12  ;;  %9957 = vmatpush3.bf16.msra.mxu0 %v10996_v21  ;;  %v11034_v9 = vld [vmem:[%s14115_s1 + $0xa78] sm:$0xff]   ;;  %v8718_v14 = vcombine.low %v48_v13, %v48_v13  ;;  %v8719_v15 = vcombine.high %v48_v13, %v48_v13  ;;  %v11043_v20 = vld [vmem:[%s14115_s1 + $0xbc0] sm:$0xff]   ;;  %v11086_v13 = vld [vmem:[%s14115_s1 + $0xc50] sm:$0xff]  }
 0x13d   :  { %9979 = vmatpush3.bf16.msra.mxu1 %v10997_v22  ;;  %9958 = vmatprep.subr.bf16.mxu0 %v10998_v23  ;;  %v11037_v12 = vld [vmem:[%s14115_s1 + $0xab8] sm:$0xff]   ;;  %v11044_v21 = vld [vmem:[%s14115_s1 + $0xb00] sm:$0xff]   ;;  %v11046_v23 = vld [vmem:[%s14115_s1 + $0xb48] sm:$0xff]  }
 0x13e   :  { %9980 = vmatprep.subr.bf16.mxu1 %v10999_v24  ;;  %v11045_v22 = vld [vmem:[%s14115_s1 + $0xb80] sm:$0xff]   ;;  %v11047_v24 = vld [vmem:[%s14115_s1 + $0xbc8] sm:$0xff]  }
 0x140   :  { %9959 = vmatpush3.bf16.msra.mxu0 %v11000_v25  ;;  %v11048_v25 = vld [vmem:[%s14115_s1 + $0xb08] sm:$0xff]  }
 0x141   :  { %9981 = vmatpush3.bf16.msra.mxu1 %v11001_v26  ;;  %9988 = vmatprep.subr.bf16.mxu0 %v11006_v32  ;;  %v11049_v26 = vld [vmem:[%s14115_s1 + $0xb88] sm:$0xff]   ;;  %v11055_v32 = vld [vmem:[%s14115_s1 + $0xbd8] sm:$0xff]  }
 0x142   :  { %10010 = vmatprep.subr.bf16.mxu1 %v11007_v34  ;;  %v11057_v34 = vld [vmem:[%s14115_s1 + $0xb98] sm:$0xff]  }
 0x143   :  { %7316 = vmatmul.mubr.bf16.vlgmr.msra.gmra.mrb[36].mxu0 %v8714_v29  ;;  %v11052_v29 = vld [vmem:[%s14115_s1 + $0xb10] sm:$0xff]  }
 0x144   :  { %7356 = vmatmul.mubr.bf16.vlgmr.msra.gmra.mrb[36].mxu1 %v8716_v31  ;;  %9989 = vmatpush3.bf16.msra.mxu0 %v11008_v35  ;;  %v11054_v31 = vld [vmem:[%s14115_s1 + $0xb58] sm:$0xff]   ;;  %v11058_v35 = vld [vmem:[%s14115_s1 + $0xb60] sm:$0xff]  }
 0x145   :  { %10011 = vmatpush3.bf16.msra.mxu1 %v11009_v36  ;;  %9990 = vmatprep.subr.bf16.mxu0 %v11010_v37  ;;  %v11059_v36 = vld [vmem:[%s14115_s1 + $0xbe0] sm:$0xff]  }
 0x146   :  { %10012 = vmatprep.subr.bf16.mxu1 %v11011_v38  ;;  %7395 = vmatprep.mubr.bf16.mxu0 %v8719_v15  ;;  %v11060_v38 = vld [vmem:[%s14115_s1 + $0xb20] sm:$0xff]   ;;  %v11088_v15 = vld [vmem:[%s14115_s1 + $0xc10] sm:$0xff]  }
 0x147   :  { %7435 = vmatprep.mubr.bf16.mxu1 %v8721_v18  ;;  %v11091_v18 = vld [vmem:[%s14115_s1 + $0xcd8] sm:$0xff]  }
 0x148   :  { %9991 = vmatpush3.bf16.msra.mxu0 %v11012_v39 }
 0x149   :  { %10013 = vmatpush3.bf16.msra.mxu1 %v11013_v40  ;;  %9992 = vmatprep.subr.bf16.mxu0 %v11014_v41  ;;  %v11061_v40 = vld [vmem:[%s14115_s1 + $0xba0] sm:$0xff]  }
 0x14a   :  { %10014 = vmatprep.subr.bf16.mxu1 %v11015_v42 }
 0x14c   :  { %9993 = vmatpush3.bf16.msra.mxu0 %v11016_v43  ;;  %v11062_v43 = vld [vmem:[%s14115_s1 + $0xb68] sm:$0xff]  }
 0x14d   :  { %10015 = vmatpush3.bf16.msra.mxu1 %v11017_v44  ;;  %9994 = vmatprep.subr.bf16.mxu0 %v11018_v45 }
 0x14e   :  { %10016 = vmatprep.subr.bf16.mxu1 %v11019_v46  ;;  %v11063_v46 = vld [vmem:[%s14115_s1 + $0xbe8] sm:$0xff]  }
 0x150   :  { %9995 = vmatpush3.bf16.msra.mxu0 %v11020_v47 }
 0x151   :  { %10017 = vmatpush3.bf16.msra.mxu1 %v11021_v48  ;;  %9996 = vmatprep.subr.bf16.mxu0 %v11022_v49  ;;  %v11064_v49 = vld [vmem:[%s14115_s1 + $0xb28] sm:$0xff]  }
 0x152   :  { %10018 = vmatprep.subr.bf16.mxu1 %v11023_v50 }
 0x154   :  { %9997 = vmatpush3.bf16.msra.mxu0 %v11024_v52 }
 0x155   :  { %10019 = vmatpush3.bf16.msra.mxu1 %v11025_v54  ;;  %9998 = vmatprep.subr.bf16.mxu0 %v11026_v57  ;;  %v11066_v54 = vld [vmem:[%s14115_s1 + $0xb70] sm:$0xff]  }
 0x156   :  { %v9696_v51 = vpop.f32.mrb[12].mxu0  ;;  %10020 = vmatprep.subr.bf16.mxu1 %v11027_v60  ;;  %v11068_v57 = vld [vmem:[%s14115_s1 + $0xb30] sm:$0xff]   ;;  %v11071_v60 = vld [vmem:[%s14115_s1 + $0xbf8] sm:$0xff]  }
 0x157   :  { %v9718_v53 = vpop.f32.mrb[12].mxu1  ;;  %v9697_v55 = vpop.f32.mrb[13].mxu0 }
 0x158   :  { %v9719_v56 = vpop.f32.mrb[13].mxu1  ;;  %v9698_v58 = vadd.f32 %v9697_v55, %v9696_v51  ;;  %v9699_v61 = vpop.f32.mrb[14].mxu0  ;;  %9999 = vmatpush3.bf16.msra.mxu0 %v11028_v63  ;;  %v11065_v51 = vld [vmem:[%s14115_s1 + $0xba8] sm:$0xff]   ;;  %v50_v63 = vld [vmem:[%s14114_s0 + $0xb0] sm:$0xff] }
 0x159   :  { %v9720_v59 = vadd.f32 %v9719_v56, %v9718_v53  ;;  %v9721_v62 = vpop.f32.mrb[14].mxu1  ;;  %v9700_v2 = vpop.f32.mrb[15].mxu0  ;;  %10021 = vmatpush3.bf16.msra.mxu1 %v11029_v1  ;;  %10000 = vmatprep.subr.bf16.mxu0 %v11030_v4  ;;  %v11067_v56 = vld [vmem:[%s14115_s1 + $0xbf0] sm:$0xff]   ;;  %v11072_v61 = vld [vmem:[%s14115_s1 + $0xb38] sm:$0xff]   ;;  %v8722_v1 = vcombine.low %v50_v63, %v50_v63 }
 0x15a   :  { %v6838_v0 = vadd.f32 %v9698_v58, %v12578_v17  ;;  %v9722_v3 = vpop.f32.mrb[15].mxu1  ;;  %10022 = vmatprep.subr.bf16.mxu1 %v11031_v6  ;;  %v8720_v17 = vcombine.low %v49_v16, %v49_v16  ;;  %v11069_v58 = vld [vmem:[%s14115_s1 + $0xbb0] sm:$0xff]   ;;  %v11073_v62 = vld [vmem:[%s14115_s1 + $0xbb8] sm:$0xff]   ;;  %v8723_v2 = vcombine.high %v50_v63, %v50_v63  ;;  %v11079_v6 = vld [vmem:[%s14115_s1 + $0xcc0] sm:$0xff]  }
 0x15b   :  { %v11089_v16 = vld [vmem:[%s14115_s1 + $0xc90] sm:$0xff]  }
 0x15c   :  { %v12686_v5 = vadd.f32 %v9720_v59, %v6838_v0  ;;  %10001 = vmatpush3.bf16.msra.mxu0 %v11032_v7  ;;  %v11070_v59 = vld [vmem:[%s14115_s1 + $0xb78] sm:$0xff]   ;;  %v11080_v7 = vld [vmem:[%s14115_s1 + $0xc00] sm:$0xff]   ;;  %v11122_v63 = vld [vmem:[%s14115_s1 + $0xd50] sm:$0xff]  }
 0x15d   :  { %10023 = vmatpush3.bf16.msra.mxu1 %v11033_v8  ;;  %10002 = vmatprep.subr.bf16.mxu0 %v11034_v9  ;;  %v51_v0 = vld [vmem:[%s14114_s0 + $0xb8] sm:$0xff]  ;;  %v11081_v8 = vld [vmem:[%s14115_s1 + $0xc80] sm:$0xff]   ;;  %v11082_v9 = vld [vmem:[%s14115_s1 + $0xc48] sm:$0xff]  }
 0x15e   :  { %10024 = vmatprep.subr.bf16.mxu1 %v11035_v10  ;;  %v8724_v3 = vcombine.low %v51_v0, %v51_v0  ;;  %v8725_v4 = vcombine.high %v51_v0, %v51_v0  ;;  %v11083_v10 = vld [vmem:[%s14115_s1 + $0xcc8] sm:$0xff]   ;;  %v11123_v0 = vld [vmem:[%s14115_s1 + $0xdd0] sm:$0xff]  }
 0x160   :  { %10003 = vmatpush3.bf16.msra.mxu0 %v11036_v11  ;;  %v11084_v11 = vld [vmem:[%s14115_s1 + $0xc08] sm:$0xff]  }
 0x161   :  { %10025 = vmatpush3.bf16.msra.mxu1 %v11037_v12  ;;  %10032 = vmatprep.subr.bf16.mxu0 %v11042_v19  ;;  %v11085_v12 = vld [vmem:[%s14115_s1 + $0xc88] sm:$0xff]   ;;  %v11092_v19 = vld [vmem:[%s14115_s1 + $0xc18] sm:$0xff]  }
 0x162   :  { %10054 = vmatprep.subr.bf16.mxu1 %v11043_v20  ;;  %v11093_v20 = vld [vmem:[%s14115_s1 + $0xc98] sm:$0xff]  }
 0x163   :  { %7396 = vmatmul.mubr.bf16.vlgmr.msra.gmra.mrb[40].mxu0 %v8718_v14  ;;  %v11087_v14 = vld [vmem:[%s14115_s1 + $0xcd0] sm:$0xff]  }
 0x164   :  { %7436 = vmatmul.mubr.bf16.vlgmr.msra.gmra.mrb[40].mxu1 %v8720_v17  ;;  %10033 = vmatpush3.bf16.msra.mxu0 %v11044_v21  ;;  %v11090_v17 = vld [vmem:[%s14115_s1 + $0xc58] sm:$0xff]   ;;  %v11094_v21 = vld [vmem:[%s14115_s1 + $0xc60] sm:$0xff]  }
 0x165   :  { %10055 = vmatpush3.bf16.msra.mxu1 %v11045_v22  ;;  %10034 = vmatprep.subr.bf16.mxu0 %v11046_v23  ;;  %v11095_v22 = vld [vmem:[%s14115_s1 + $0xce0] sm:$0xff]  }
 0x166   :  { %10056 = vmatprep.subr.bf16.mxu1 %v11047_v24  ;;  %7475 = vmatprep.mubr.bf16.mxu0 %v8723_v2  ;;  %v11096_v24 = vld [vmem:[%s14115_s1 + $0xc20] sm:$0xff]   ;;  %v11125_v2 = vld [vmem:[%s14115_s1 + $0xd90] sm:$0xff]  }
 0x167   :  { %7515 = vmatprep.mubr.bf16.mxu1 %v8725_v4  ;;  %v11127_v4 = vld [vmem:[%s14115_s1 + $0xdd8] sm:$0xff]  }
 0x168   :  { %10035 = vmatpush3.bf16.msra.mxu0 %v11048_v25 }
 0x169   :  { %10057 = vmatpush3.bf16.msra.mxu1 %v11049_v26  ;;  %10036 = vmatprep.subr.bf16.mxu0 %v11050_v27  ;;  %v11097_v26 = vld [vmem:[%s14115_s1 + $0xca0] sm:$0xff]  }
 0x16a   :  { %10058 = vmatprep.subr.bf16.mxu1 %v11051_v28 }
 0x16c   :  { %10037 = vmatpush3.bf16.msra.mxu0 %v11052_v29 }
 0x16d   :  { %10059 = vmatpush3.bf16.msra.mxu1 %v11053_v30  ;;  %10038 = vmatprep.subr.bf16.mxu0 %v11054_v31  ;;  %v11098_v30 = vld [vmem:[%s14115_s1 + $0xc68] sm:$0xff]  }
 0x16e   :  { %10060 = vmatprep.subr.bf16.mxu1 %v11055_v32  ;;  %v11099_v32 = vld [vmem:[%s14115_s1 + $0xce8] sm:$0xff]  }
 0x170   :  { %10039 = vmatpush3.bf16.msra.mxu0 %v11056_v33 }
 0x171   :  { %10061 = vmatpush3.bf16.msra.mxu1 %v11057_v34  ;;  %10040 = vmatprep.subr.bf16.mxu0 %v11058_v35 }
 0x172   :  { %10062 = vmatprep.subr.bf16.mxu1 %v11059_v36  ;;  %v11100_v36 = vld [vmem:[%s14115_s1 + $0xc28] sm:$0xff]  }
 0x174   :  { %10041 = vmatpush3.bf16.msra.mxu0 %v11060_v38 }
 0x175   :  { %10063 = vmatpush3.bf16.msra.mxu1 %v11061_v40  ;;  %10042 = vmatprep.subr.bf16.mxu0 %v11062_v43  ;;  %v11104_v43 = vld [vmem:[%s14115_s1 + $0xc30] sm:$0xff]  }
 0x176   :  { %v9740_v37 = vpop.f32.mrb[16].mxu0  ;;  %10064 = vmatprep.subr.bf16.mxu1 %v11063_v46  ;;  %v11107_v46 = vld [vmem:[%s14115_s1 + $0xcf8] sm:$0xff]  }
 0x177   :  { %v9762_v39 = vpop.f32.mrb[16].mxu1  ;;  %v9741_v41 = vpop.f32.mrb[17].mxu0 }
 0x178   :  { %v9763_v42 = vpop.f32.mrb[17].mxu1  ;;  %v9742_v44 = vadd.f32 %v9741_v41, %v9740_v37  ;;  %v9743_v47 = vpop.f32.mrb[18].mxu0  ;;  %10043 = vmatpush3.bf16.msra.mxu0 %v11064_v49  ;;  %v11101_v37 = vld [vmem:[%s14115_s1 + $0xca8] sm:$0xff]   ;;  %v11102_v41 = vld [vmem:[%s14115_s1 + $0xc70] sm:$0xff]   ;;  %v52_v49 = vld [vmem:[%s14114_s0 + $0xc0] sm:$0xff] }
 0x179   :  { %v9764_v45 = vadd.f32 %v9763_v42, %v9762_v39  ;;  %v9765_v48 = vpop.f32.mrb[18].mxu1  ;;  %v9744_v52 = vpop.f32.mrb[19].mxu0  ;;  %10065 = vmatpush3.bf16.msra.mxu1 %v11065_v51  ;;  %10044 = vmatprep.subr.bf16.mxu0 %v11066_v54  ;;  %v11103_v42 = vld [vmem:[%s14115_s1 + $0xcf0] sm:$0xff]   ;;  %v11108_v47 = vld [vmem:[%s14115_s1 + $0xc38] sm:$0xff]   ;;  %v8726_v51 = vcombine.low %v52_v49, %v52_v49  ;;  %v11114_v54 = vld [vmem:[%s14115_s1 + $0xd40] sm:$0xff]  }
 0x17a   :  { %v6918_v50 = vadd.f32 %v9742_v44, %v12686_v5  ;;  %v9766_v53 = vpop.f32.mrb[19].mxu1  ;;  %10066 = vmatprep.subr.bf16.mxu1 %v11067_v56  ;;  %v11078_v5 = vld [vmem:[%s14115_s1 + $0xc40] sm:$0xff]   ;;  %v11105_v44 = vld [vmem:[%s14115_s1 + $0xcb0] sm:$0xff]   ;;  %v11109_v48 = vld [vmem:[%s14115_s1 + $0xcb8] sm:$0xff]   ;;  %v8727_v52 = vcombine.high %v52_v49, %v52_v49 }
 0x17b   :  { %v11115_v56 = vld [vmem:[%s14115_s1 + $0xdc0] sm:$0xff]   ;;  %v11158_v49 = vld [vmem:[%s14115_s1 + $0xe50] sm:$0xff]  }
 0x17c   :  { %v12791_v55 = vadd.f32 %v9764_v45, %v6918_v50  ;;  %10045 = vmatpush3.bf16.msra.mxu0 %v11068_v57  ;;  %v11106_v45 = vld [vmem:[%s14115_s1 + $0xc78] sm:$0xff]   ;;  %v53_v50 = vld [vmem:[%s14114_s0 + $0xc8] sm:$0xff]  ;;  %v11116_v57 = vld [vmem:[%s14115_s1 + $0xd00] sm:$0xff]  }
 0x17d   :  { %10067 = vmatpush3.bf16.msra.mxu1 %v11069_v58  ;;  %10046 = vmatprep.subr.bf16.mxu0 %v11070_v59  ;;  %v8728_v53 = vcombine.low %v53_v50, %v53_v50  ;;  %v11117_v58 = vld [vmem:[%s14115_s1 + $0xd80] sm:$0xff]   ;;  %v11118_v59 = vld [vmem:[%s14115_s1 + $0xd48] sm:$0xff]  }
 0x17e   :  { %10068 = vmatprep.subr.bf16.mxu1 %v11071_v60  ;;  %v11119_v60 = vld [vmem:[%s14115_s1 + $0xdc8] sm:$0xff]  }
 0x180   :  { %10047 = vmatpush3.bf16.msra.mxu0 %v11072_v61  ;;  %v11120_v61 = vld [vmem:[%s14115_s1 + $0xd08] sm:$0xff]  }
 0x181   :  { %10069 = vmatpush3.bf16.msra.mxu1 %v11073_v62  ;;  %10076 = vmatprep.subr.bf16.mxu0 %v11078_v5  ;;  %v11121_v62 = vld [vmem:[%s14115_s1 + $0xd88] sm:$0xff]   ;;  %v11128_v5 = vld [vmem:[%s14115_s1 + $0xd18] sm:$0xff]  }
 0x182   :  { %10098 = vmatprep.subr.bf16.mxu1 %v11079_v6  ;;  %v11129_v6 = vld [vmem:[%s14115_s1 + $0xd98] sm:$0xff]  }
 0x183   :  { %7476 = vmatmul.mubr.bf16.vlgmr.msra.gmra.mrb[44].mxu0 %v8722_v1  ;;  %v11124_v1 = vld [vmem:[%s14115_s1 + $0xd10] sm:$0xff]  }
 0x184   :  { %7516 = vmatmul.mubr.bf16.vlgmr.msra.gmra.mrb[44].mxu1 %v8724_v3  ;;  %10077 = vmatpush3.bf16.msra.mxu0 %v11080_v7  ;;  %v11126_v3 = vld [vmem:[%s14115_s1 + $0xd58] sm:$0xff]   ;;  %v11130_v7 = vld [vmem:[%s14115_s1 + $0xd60] sm:$0xff]  }
 0x185   :  { %10099 = vmatpush3.bf16.msra.mxu1 %v11081_v8  ;;  %10078 = vmatprep.subr.bf16.mxu0 %v11082_v9  ;;  %v11131_v8 = vld [vmem:[%s14115_s1 + $0xde0] sm:$0xff]  }
 0x186   :  { %10100 = vmatprep.subr.bf16.mxu1 %v11083_v10  ;;  %7555 = vmatprep.mubr.bf16.mxu0 %v8727_v52  ;;  %v11132_v10 = vld [vmem:[%s14115_s1 + $0xd20] sm:$0xff]   ;;  %v11161_v52 = vld [vmem:[%s14115_s1 + $0xe90] sm:$0xff]  }
 0x188   :  { %10079 = vmatpush3.bf16.msra.mxu0 %v11084_v11 }
 0x189   :  { %10101 = vmatpush3.bf16.msra.mxu1 %v11085_v12  ;;  %10080 = vmatprep.subr.bf16.mxu0 %v11086_v13  ;;  %v11133_v12 = vld [vmem:[%s14115_s1 + $0xda0] sm:$0xff]  }
 0x18a   :  { %10102 = vmatprep.subr.bf16.mxu1 %v11087_v14 }
 0x18c   :  { %10081 = vmatpush3.bf16.msra.mxu0 %v11088_v15  ;;  %v11134_v15 = vld [vmem:[%s14115_s1 + $0xd68] sm:$0xff]  }
 0x18d   :  { %10103 = vmatpush3.bf16.msra.mxu1 %v11089_v16  ;;  %10082 = vmatprep.subr.bf16.mxu0 %v11090_v17 }
 0x18e   :  { %10104 = vmatprep.subr.bf16.mxu1 %v11091_v18  ;;  %v11135_v18 = vld [vmem:[%s14115_s1 + $0xde8] sm:$0xff]  }
 0x190   :  { %10083 = vmatpush3.bf16.msra.mxu0 %v11092_v19 }
 0x191   :  { %10105 = vmatpush3.bf16.msra.mxu1 %v11093_v20  ;;  %10084 = vmatprep.subr.bf16.mxu0 %v11094_v21  ;;  %v11136_v21 = vld [vmem:[%s14115_s1 + $0xd28] sm:$0xff]  }
 0x192   :  { %10106 = vmatprep.subr.bf16.mxu1 %v11095_v22 }
 0x194   :  { %10085 = vmatpush3.bf16.msra.mxu0 %v11096_v24 }
 0x195   :  { %10107 = vmatpush3.bf16.msra.mxu1 %v11097_v26  ;;  %10086 = vmatprep.subr.bf16.mxu0 %v11098_v30  ;;  %v11138_v26 = vld [vmem:[%s14115_s1 + $0xd70] sm:$0xff]  }
 0x196   :  { %v9784_v23 = vpop.f32.mrb[20].mxu0  ;;  %10108 = vmatprep.subr.bf16.mxu1 %v11099_v32  ;;  %v11141_v30 = vld [vmem:[%s14115_s1 + $0xdb0] sm:$0xff]   ;;  %v11143_v32 = vld [vmem:[%s14115_s1 + $0xdf8] sm:$0xff]  }
 0x197   :  { %v9806_v25 = vpop.f32.mrb[20].mxu1  ;;  %v9785_v27 = vpop.f32.mrb[21].mxu0 }
 0x198   :  { %v9786_v28 = vadd.f32 %v9785_v27, %v9784_v23  ;;  %v9807_v29 = vpop.f32.mrb[21].mxu1  ;;  %v9787_v33 = vpop.f32.mrb[22].mxu0  ;;  %10087 = vmatpush3.bf16.msra.mxu0 %v11100_v36  ;;  %v11137_v23 = vld [vmem:[%s14115_s1 + $0xda8] sm:$0xff]  }
 0x199   :  { %v9808_v31 = vadd.f32 %v9807_v29, %v9806_v25  ;;  %v9809_v35 = vpop.f32.mrb[22].mxu1  ;;  %v9788_v38 = vpop.f32.mrb[23].mxu0  ;;  %10109 = vmatpush3.bf16.msra.mxu1 %v11101_v37  ;;  %10088 = vmatprep.subr.bf16.mxu0 %v11102_v41  ;;  %v11140_v29 = vld [vmem:[%s14115_s1 + $0xd30] sm:$0xff]   ;;  %v11144_v33 = vld [vmem:[%s14115_s1 + $0xd38] sm:$0xff]   ;;  %v11150_v41 = vld [vmem:[%s14115_s1 + $0xe40] sm:$0xff]  }
 0x19a   :  { %v6998_v34 = vadd.f32 %v9786_v28, %v12791_v55  ;;  %v9810_v40 = vpop.f32.mrb[23].mxu1  ;;  %10110 = vmatprep.subr.bf16.mxu1 %v11103_v42  ;;  %v8729_v55 = vcombine.high %v53_v50, %v53_v50  ;;  %v11139_v28 = vld [vmem:[%s14115_s1 + $0xdf0] sm:$0xff]   ;;  %v55_v38 = vld [vmem:[%s14114_s0 + $0xd8] sm:$0xff]  ;;  %v11151_v42 = vld [vmem:[%s14115_s1 + $0xec0] sm:$0xff]  }
 0x19b   :  { %v54_v35 = vld [vmem:[%s14114_s0 + $0xd0] sm:$0xff]  ;;  %v8733_v40 = vcombine.high %v55_v38, %v55_v38 }
 0x19c   :  { %v12893_v39 = vadd.f32 %v9808_v31, %v6998_v34  ;;  %10089 = vmatpush3.bf16.msra.mxu0 %v11104_v43  ;;  %7595 = vmatprep.mubr.bf16.mxu1 %v8729_v55  ;;  %v11142_v31 = vld [vmem:[%s14115_s1 + $0xd78] sm:$0xff]   ;;  %v8730_v36 = vcombine.low %v54_v35, %v54_v35  ;;  %v8731_v37 = vcombine.high %v54_v35, %v54_v35  ;;  %v11152_v43 = vld [vmem:[%s14115_s1 + $0xe00] sm:$0xff]   ;;  %v11159_v50 = vld [vmem:[%s14115_s1 + $0xed0] sm:$0xff]  }
 0x19d   :  { %10111 = vmatpush3.bf16.msra.mxu1 %v11105_v44  ;;  %10090 = vmatprep.subr.bf16.mxu0 %v11106_v45  ;;  %v11145_v34 = vld [vmem:[%s14115_s1 + $0xdb8] sm:$0xff]   ;;  %v11153_v44 = vld [vmem:[%s14115_s1 + $0xe80] sm:$0xff]   ;;  %v11154_v45 = vld [vmem:[%s14115_s1 + $0xe48] sm:$0xff]  }
 0x19e   :  { %10112 = vmatprep.subr.bf16.mxu1 %v11107_v46  ;;  %v11155_v46 = vld [vmem:[%s14115_s1 + $0xec8] sm:$0xff]   ;;  %v11164_v55 = vld [vmem:[%s14115_s1 + $0xe18] sm:$0xff]   ;;  %v11194_v35 = vld [vmem:[%s14115_s1 + $0xf50] sm:$0xff]  }
 0x1a0   :  { %10091 = vmatpush3.bf16.msra.mxu0 %v11108_v47  ;;  %v11156_v47 = vld [vmem:[%s14115_s1 + $0xe08] sm:$0xff]  }
 0x1a1   :  { %10113 = vmatpush3.bf16.msra.mxu1 %v11109_v48  ;;  %10120 = vmatprep.subr.bf16.mxu0 %v11114_v54  ;;  %v11157_v48 = vld [vmem:[%s14115_s1 + $0xe88] sm:$0xff]   ;;  %v11163_v54 = vld [vmem:[%s14115_s1 + $0xed8] sm:$0xff]  }
 0x1a2   :  { %10142 = vmatprep.subr.bf16.mxu1 %v11115_v56  ;;  %v11165_v56 = vld [vmem:[%s14115_s1 + $0xe98] sm:$0xff]  }
 0x1a3   :  { %7556 = vmatmul.mubr.bf16.vlgmr.msra.gmra.mrb[48].mxu0 %v8726_v51  ;;  %v11160_v51 = vld [vmem:[%s14115_s1 + $0xe10] sm:$0xff]  }
 0x1a4   :  { %7596 = vmatmul.mubr.bf16.vlgmr.msra.gmra.mrb[48].mxu1 %v8728_v53  ;;  %10121 = vmatpush3.bf16.msra.mxu0 %v11116_v57  ;;  %v11162_v53 = vld [vmem:[%s14115_s1 + $0xe58] sm:$0xff]   ;;  %v11166_v57 = vld [vmem:[%s14115_s1 + $0xe60] sm:$0xff]  }
 0x1a5   :  { %10143 = vmatpush3.bf16.msra.mxu1 %v11117_v58  ;;  %10122 = vmatprep.subr.bf16.mxu0 %v11118_v59  ;;  %v11167_v58 = vld [vmem:[%s14115_s1 + $0xee0] sm:$0xff]  }
 0x1a6   :  { %10144 = vmatprep.subr.bf16.mxu1 %v11119_v60  ;;  %7635 = vmatprep.mubr.bf16.mxu0 %v8731_v37  ;;  %v11168_v60 = vld [vmem:[%s14115_s1 + $0xe20] sm:$0xff]   ;;  %v11196_v37 = vld [vmem:[%s14115_s1 + $0xf10] sm:$0xff]  }
 0x1a7   :  { %7675 = vmatprep.mubr.bf16.mxu1 %v8733_v40  ;;  %v11199_v40 = vld [vmem:[%s14115_s1 + $0xfd8] sm:$0xff]  }
 0x1a8   :  { %10123 = vmatpush3.bf16.msra.mxu0 %v11120_v61 }
 0x1a9   :  { %10145 = vmatpush3.bf16.msra.mxu1 %v11121_v62  ;;  %10124 = vmatprep.subr.bf16.mxu0 %v11122_v63  ;;  %v11169_v62 = vld [vmem:[%s14115_s1 + $0xea0] sm:$0xff]  }
 0x1aa   :  { %10146 = vmatprep.subr.bf16.mxu1 %v11123_v0 }
 0x1ac   :  { %10125 = vmatpush3.bf16.msra.mxu0 %v11124_v1  ;;  %v11170_v1 = vld [vmem:[%s14115_s1 + $0xe68] sm:$0xff]  }
 0x1ad   :  { %10147 = vmatpush3.bf16.msra.mxu1 %v11125_v2  ;;  %10126 = vmatprep.subr.bf16.mxu0 %v11126_v3 }
 0x1ae   :  { %10148 = vmatprep.subr.bf16.mxu1 %v11127_v4  ;;  %v11171_v4 = vld [vmem:[%s14115_s1 + $0xee8] sm:$0xff]  }
 0x1b0   :  { %10127 = vmatpush3.bf16.msra.mxu0 %v11128_v5 }
 0x1b1   :  { %10149 = vmatpush3.bf16.msra.mxu1 %v11129_v6  ;;  %10128 = vmatprep.subr.bf16.mxu0 %v11130_v7  ;;  %v11172_v7 = vld [vmem:[%s14115_s1 + $0xe28] sm:$0xff]  }
 0x1b2   :  { %10150 = vmatprep.subr.bf16.mxu1 %v11131_v8 }
 0x1b4   :  { %10129 = vmatpush3.bf16.msra.mxu0 %v11132_v10 }
 0x1b5   :  { %10151 = vmatpush3.bf16.msra.mxu1 %v11133_v12  ;;  %10130 = vmatprep.subr.bf16.mxu0 %v11134_v15  ;;  %v11174_v12 = vld [vmem:[%s14115_s1 + $0xe70] sm:$0xff]  }
 0x1b6   :  { %v9828_v9 = vpop.f32.mrb[24].mxu0  ;;  %10152 = vmatprep.subr.bf16.mxu1 %v11135_v18  ;;  %v11176_v15 = vld [vmem:[%s14115_s1 + $0xe30] sm:$0xff]   ;;  %v11179_v18 = vld [vmem:[%s14115_s1 + $0xef8] sm:$0xff]  }
 0x1b7   :  { %v9850_v11 = vpop.f32.mrb[24].mxu1  ;;  %v9829_v13 = vpop.f32.mrb[25].mxu0 }
 0x1b8   :  { %v9851_v14 = vpop.f32.mrb[25].mxu1  ;;  %v9830_v16 = vadd.f32 %v9829_v13, %v9828_v9  ;;  %v9831_v19 = vpop.f32.mrb[26].mxu0  ;;  %10131 = vmatpush3.bf16.msra.mxu0 %v11136_v21  ;;  %v11173_v9 = vld [vmem:[%s14115_s1 + $0xea8] sm:$0xff]   ;;  %v56_v21 = vld [vmem:[%s14114_s0 + $0xe0] sm:$0xff] }
 0x1b9   :  { %v9852_v17 = vadd.f32 %v9851_v14, %v9850_v11  ;;  %v9853_v20 = vpop.f32.mrb[26].mxu1  ;;  %v9832_v24 = vpop.f32.mrb[27].mxu0  ;;  %10153 = vmatpush3.bf16.msra.mxu1 %v11137_v23  ;;  %10132 = vmatprep.subr.bf16.mxu0 %v11138_v26  ;;  %v11175_v14 = vld [vmem:[%s14115_s1 + $0xef0] sm:$0xff]   ;;  %v11180_v19 = vld [vmem:[%s14115_s1 + $0xe38] sm:$0xff]   ;;  %v8734_v23 = vcombine.low %v56_v21, %v56_v21 }
 0x1ba   :  { %v7078_v22 = vadd.f32 %v9830_v16, %v12893_v39  ;;  %v9854_v25 = vpop.f32.mrb[27].mxu1  ;;  %10154 = vmatprep.subr.bf16.mxu1 %v11139_v28  ;;  %v8732_v39 = vcombine.low %v55_v38, %v55_v38  ;;  %v11177_v16 = vld [vmem:[%s14115_s1 + $0xeb0] sm:$0xff]   ;;  %v11181_v20 = vld [vmem:[%s14115_s1 + $0xeb8] sm:$0xff]   ;;  %v8735_v24 = vcombine.high %v56_v21, %v56_v21  ;;  %v11187_v28 = vld [vmem:[%s14115_s1 + $0xfc0] sm:$0xff]  }
 0x1bb   :  { %v11197_v38 = vld [vmem:[%s14115_s1 + $0xf90] sm:$0xff]  }
 0x1bc   :  { %v13001_v27 = vadd.f32 %v9852_v17, %v7078_v22  ;;  %10133 = vmatpush3.bf16.msra.mxu0 %v11140_v29  ;;  %v11178_v17 = vld [vmem:[%s14115_s1 + $0xe78] sm:$0xff]   ;;  %v57_v22 = vld [vmem:[%s14114_s0 + $0xe8] sm:$0xff]  ;;  %v11188_v29 = vld [vmem:[%s14115_s1 + $0xf00] sm:$0xff]  }
 0x1bd   :  { %10155 = vmatpush3.bf16.msra.mxu1 %v11141_v30  ;;  %10134 = vmatprep.subr.bf16.mxu0 %v11142_v31  ;;  %v8736_v25 = vcombine.low %v57_v22, %v57_v22  ;;  %v8737_v26 = vcombine.high %v57_v22, %v57_v22  ;;  %v11189_v30 = vld [vmem:[%s14115_s1 + $0xf80] sm:$0xff]   ;;  %v11190_v31 = vld [vmem:[%s14115_s1 + $0xf48] sm:$0xff]   ;;  %v11230_v21 = vld [vmem:[%s14115_s1 + $0x1050] sm:$0xff]  }
 0x1be   :  { %10156 = vmatprep.subr.bf16.mxu1 %v11143_v32  ;;  %v11191_v32 = vld [vmem:[%s14115_s1 + $0xfc8] sm:$0xff]   ;;  %v11231_v22 = vld [vmem:[%s14115_s1 + $0x10d0] sm:$0xff]  }
 0x1c0   :  { %10135 = vmatpush3.bf16.msra.mxu0 %v11144_v33  ;;  %v11192_v33 = vld [vmem:[%s14115_s1 + $0xf08] sm:$0xff]  }
 0x1c1   :  { %10157 = vmatpush3.bf16.msra.mxu1 %v11145_v34  ;;  %10164 = vmatprep.subr.bf16.mxu0 %v11150_v41  ;;  %v11193_v34 = vld [vmem:[%s14115_s1 + $0xf88] sm:$0xff]   ;;  %v11200_v41 = vld [vmem:[%s14115_s1 + $0xf18] sm:$0xff]  }
 0x1c2   :  { %10186 = vmatprep.subr.bf16.mxu1 %v11151_v42  ;;  %v11201_v42 = vld [vmem:[%s14115_s1 + $0xf98] sm:$0xff]  }
 0x1c3   :  { %7636 = vmatmul.mubr.bf16.vlgmr.msra.gmra.mrb[52].mxu0 %v8730_v36  ;;  %v11195_v36 = vld [vmem:[%s14115_s1 + $0xfd0] sm:$0xff]  }
 0x1c4   :  { %7676 = vmatmul.mubr.bf16.vlgmr.msra.gmra.mrb[52].mxu1 %v8732_v39  ;;  %10165 = vmatpush3.bf16.msra.mxu0 %v11152_v43  ;;  %v11198_v39 = vld [vmem:[%s14115_s1 + $0xf58] sm:$0xff]   ;;  %v11202_v43 = vld [vmem:[%s14115_s1 + $0xf60] sm:$0xff]  }
 0x1c5   :  { %10187 = vmatpush3.bf16.msra.mxu1 %v11153_v44  ;;  %10166 = vmatprep.subr.bf16.mxu0 %v11154_v45  ;;  %v11203_v44 = vld [vmem:[%s14115_s1 + $0xfe0] sm:$0xff]  }
 0x1c6   :  { %10188 = vmatprep.subr.bf16.mxu1 %v11155_v46  ;;  %7715 = vmatprep.mubr.bf16.mxu0 %v8735_v24  ;;  %v11204_v45 = vld [vmem:[%s14115_s1 + $0xf20] sm:$0xff]   ;;  %v11233_v24 = vld [vmem:[%s14115_s1 + $0x1090] sm:$0xff]  }
 0x1c7   :  { %7755 = vmatprep.mubr.bf16.mxu1 %v8737_v26  ;;  %v11235_v26 = vld [vmem:[%s14115_s1 + $0x10d8] sm:$0xff]  }
 0x1c8   :  { %10167 = vmatpush3.bf16.msra.mxu0 %v11156_v47  ;;  %v11205_v47 = vld [vmem:[%s14115_s1 + $0xfa0] sm:$0xff]  }
 0x1c9   :  { %10189 = vmatpush3.bf16.msra.mxu1 %v11157_v48  ;;  %10168 = vmatprep.subr.bf16.mxu0 %v11158_v49 }
 0x1ca   :  { %10190 = vmatprep.subr.bf16.mxu1 %v11159_v50 }
 0x1cc   :  { %10169 = vmatpush3.bf16.msra.mxu0 %v11160_v51 }
 0x1cd   :  { %10191 = vmatpush3.bf16.msra.mxu1 %v11161_v52  ;;  %10170 = vmatprep.subr.bf16.mxu0 %v11162_v53  ;;  %v11206_v53 = vld [vmem:[%s14115_s1 + $0xf68] sm:$0xff]  }
 0x1ce   :  { %10192 = vmatprep.subr.bf16.mxu1 %v11163_v54 }
 0x1d0   :  { %10171 = vmatpush3.bf16.msra.mxu0 %v11164_v55  ;;  %v11207_v55 = vld [vmem:[%s14115_s1 + $0xfe8] sm:$0xff]  }
 0x1d1   :  { %10193 = vmatpush3.bf16.msra.mxu1 %v11165_v56  ;;  %10172 = vmatprep.subr.bf16.mxu0 %v11166_v57 }
 0x1d2   :  { %10194 = vmatprep.subr.bf16.mxu1 %v11167_v58  ;;  %v11208_v58 = vld [vmem:[%s14115_s1 + $0xf28] sm:$0xff]  }
 0x1d4   :  { %10173 = vmatpush3.bf16.msra.mxu0 %v11168_v60  ;;  %v11209_v60 = vld [vmem:[%s14115_s1 + $0xfa8] sm:$0xff]  }
 0x1d5   :  { %10195 = vmatpush3.bf16.msra.mxu1 %v11169_v62  ;;  %10174 = vmatprep.subr.bf16.mxu0 %v11170_v1  ;;  %v11212_v1 = vld [vmem:[%s14115_s1 + $0xf30] sm:$0xff]  }
 0x1d6   :  { %v9872_v59 = vpop.f32.mrb[28].mxu0  ;;  %10196 = vmatprep.subr.bf16.mxu1 %v11171_v4  ;;  %v11215_v4 = vld [vmem:[%s14115_s1 + $0xff8] sm:$0xff]  }
 0x1d7   :  { %v9894_v61 = vpop.f32.mrb[28].mxu1  ;;  %v9873_v63 = vpop.f32.mrb[29].mxu0 }
 0x1d8   :  { %v9895_v0 = vpop.f32.mrb[29].mxu1  ;;  %v9874_v2 = vadd.f32 %v9873_v63, %v9872_v59  ;;  %v9875_v5 = vpop.f32.mrb[30].mxu0  ;;  %10175 = vmatpush3.bf16.msra.mxu0 %v11172_v7  ;;  %v11210_v63 = vld [vmem:[%s14115_s1 + $0xf70] sm:$0xff]  }
 0x1d9   :  { %v9896_v3 = vadd.f32 %v9895_v0, %v9894_v61  ;;  %v9897_v6 = vpop.f32.mrb[30].mxu1  ;;  %v9876_v10 = vpop.f32.mrb[31].mxu0  ;;  %10197 = vmatpush3.bf16.msra.mxu1 %v11173_v9  ;;  %10176 = vmatprep.subr.bf16.mxu0 %v11174_v12  ;;  %v11211_v0 = vld [vmem:[%s14115_s1 + $0xff0] sm:$0xff]   ;;  %v11216_v5 = vld [vmem:[%s14115_s1 + $0xf38] sm:$0xff]  }
 0x1da   :  { %v7158_v8 = vadd.f32 %v9874_v2, %v13001_v27  ;;  %v9898_v11 = vpop.f32.mrb[31].mxu1  ;;  %10198 = vmatprep.subr.bf16.mxu1 %v11175_v14  ;;  %v11186_v27 = vld [vmem:[%s14115_s1 + $0xf40] sm:$0xff]   ;;  %v11213_v2 = vld [vmem:[%s14115_s1 + $0xfb0] sm:$0xff]   ;;  %v11217_v6 = vld [vmem:[%s14115_s1 + $0xfb8] sm:$0xff]  }
 0x1db   :  { %v58_v7 = vld [vmem:[%s14114_s0 + $0xf0] sm:$0xff]  ;;  %v11223_v14 = vld [vmem:[%s14115_s1 + $0x10c0] sm:$0xff]  }
 0x1dc   :  { %v13106_v13 = vadd.f32 %v9896_v3, %v7158_v8  ;;  %10177 = vmatpush3.bf16.msra.mxu0 %v11176_v15  ;;  %v11214_v3 = vld [vmem:[%s14115_s1 + $0xf78] sm:$0xff]   ;;  %v8738_v9 = vcombine.low %v58_v7, %v58_v7  ;;  %v8739_v10 = vcombine.high %v58_v7, %v58_v7  ;;  %v11224_v15 = vld [vmem:[%s14115_s1 + $0x1000] sm:$0xff]   ;;  %v11266_v7 = vld [vmem:[%s14115_s1 + $0x1150] sm:$0xff]  }
 0x1dd   :  { %10199 = vmatpush3.bf16.msra.mxu1 %v11177_v16  ;;  %10178 = vmatprep.subr.bf16.mxu0 %v11178_v17  ;;  %v59_v8 = vld [vmem:[%s14114_s0 + $0xf8] sm:$0xff]  ;;  %v11225_v16 = vld [vmem:[%s14115_s1 + $0x1080] sm:$0xff]   ;;  %v11226_v17 = vld [vmem:[%s14115_s1 + $0x1048] sm:$0xff]  }
 0x1de   :  { %10200 = vmatprep.subr.bf16.mxu1 %v11179_v18  ;;  %v8740_v11 = vcombine.low %v59_v8, %v59_v8  ;;  %v8741_v12 = vcombine.high %v59_v8, %v59_v8  ;;  %v11227_v18 = vld [vmem:[%s14115_s1 + $0x10c8] sm:$0xff]   ;;  %v11267_v8 = vld [vmem:[%s14115_s1 + $0x11d0] sm:$0xff]  }
 0x1e0   :  { %10179 = vmatpush3.bf16.msra.mxu0 %v11180_v19  ;;  %v11228_v19 = vld [vmem:[%s14115_s1 + $0x1008] sm:$0xff]  }
 0x1e1   :  { %10201 = vmatpush3.bf16.msra.mxu1 %v11181_v20  ;;  %10208 = vmatprep.subr.bf16.mxu0 %v11186_v27  ;;  %v11229_v20 = vld [vmem:[%s14115_s1 + $0x1088] sm:$0xff]   ;;  %v11236_v27 = vld [vmem:[%s14115_s1 + $0x1018] sm:$0xff]  }
 0x1e2   :  { %10230 = vmatprep.subr.bf16.mxu1 %v11187_v28  ;;  %v11237_v28 = vld [vmem:[%s14115_s1 + $0x1098] sm:$0xff]  }
 0x1e3   :  { %7716 = vmatmul.mubr.bf16.vlgmr.msra.gmra.mrb[56].mxu0 %v8734_v23  ;;  %v11232_v23 = vld [vmem:[%s14115_s1 + $0x1010] sm:$0xff]  }
 0x1e4   :  { %7756 = vmatmul.mubr.bf16.vlgmr.msra.gmra.mrb[56].mxu1 %v8736_v25  ;;  %10209 = vmatpush3.bf16.msra.mxu0 %v11188_v29  ;;  %v11234_v25 = vld [vmem:[%s14115_s1 + $0x1058] sm:$0xff]   ;;  %v11238_v29 = vld [vmem:[%s14115_s1 + $0x1060] sm:$0xff]  }
 0x1e5   :  { %10231 = vmatpush3.bf16.msra.mxu1 %v11189_v30  ;;  %10210 = vmatprep.subr.bf16.mxu0 %v11190_v31  ;;  %v11239_v30 = vld [vmem:[%s14115_s1 + $0x10e0] sm:$0xff]  }
 0x1e6   :  { %10232 = vmatprep.subr.bf16.mxu1 %v11191_v32  ;;  %7795 = vmatprep.mubr.bf16.mxu0 %v8739_v10  ;;  %v11240_v31 = vld [vmem:[%s14115_s1 + $0x1020] sm:$0xff]   ;;  %v11269_v10 = vld [vmem:[%s14115_s1 + $0x1190] sm:$0xff]  }
 0x1e7   :  { %7835 = vmatprep.mubr.bf16.mxu1 %v8741_v12  ;;  %v11271_v12 = vld [vmem:[%s14115_s1 + $0x11d8] sm:$0xff]  }
 0x1e8   :  { %10211 = vmatpush3.bf16.msra.mxu0 %v11192_v33  ;;  %v11241_v33 = vld [vmem:[%s14115_s1 + $0x10a0] sm:$0xff]  }
 0x1e9   :  { %10233 = vmatpush3.bf16.msra.mxu1 %v11193_v34  ;;  %10212 = vmatprep.subr.bf16.mxu0 %v11194_v35 }
 0x1ea   :  { %10234 = vmatprep.subr.bf16.mxu1 %v11195_v36 }
 0x1ec   :  { %10213 = vmatpush3.bf16.msra.mxu0 %v11196_v37 }
 0x1ed   :  { %10235 = vmatpush3.bf16.msra.mxu1 %v11197_v38  ;;  %10214 = vmatprep.subr.bf16.mxu0 %v11198_v39  ;;  %v11242_v39 = vld [vmem:[%s14115_s1 + $0x1068] sm:$0xff]  }
 0x1ee   :  { %10236 = vmatprep.subr.bf16.mxu1 %v11199_v40 }
 0x1f0   :  { %10215 = vmatpush3.bf16.msra.mxu0 %v11200_v41  ;;  %v11243_v41 = vld [vmem:[%s14115_s1 + $0x10e8] sm:$0xff]  }
 0x1f1   :  { %10237 = vmatpush3.bf16.msra.mxu1 %v11201_v42  ;;  %10216 = vmatprep.subr.bf16.mxu0 %v11202_v43 }
 0x1f2   :  { %10238 = vmatprep.subr.bf16.mxu1 %v11203_v44  ;;  %v11244_v44 = vld [vmem:[%s14115_s1 + $0x1028] sm:$0xff]  }
 0x1f4   :  { %10217 = vmatpush3.bf16.msra.mxu0 %v11204_v45 }
 0x1f5   :  { %10239 = vmatpush3.bf16.msra.mxu1 %v11205_v47  ;;  %10218 = vmatprep.subr.bf16.mxu0 %v11206_v53  ;;  %v11250_v53 = vld [vmem:[%s14115_s1 + $0x1078] sm:$0xff]  }
 0x1f6   :  { %v9916_v46 = vpop.f32.mrb[32].mxu0  ;;  %10240 = vmatprep.subr.bf16.mxu1 %v11207_v55  ;;  %v11252_v55 = vld [vmem:[%s14115_s1 + $0x1038] sm:$0xff]  }
 0x1f7   :  { %v9938_v48 = vpop.f32.mrb[32].mxu1  ;;  %v9917_v49 = vpop.f32.mrb[33].mxu0 }
 0x1f8   :  { %v9939_v50 = vpop.f32.mrb[33].mxu1  ;;  %v9918_v51 = vadd.f32 %v9917_v49, %v9916_v46  ;;  %v9919_v54 = vpop.f32.mrb[34].mxu0  ;;  %10219 = vmatpush3.bf16.msra.mxu0 %v11208_v58  ;;  %v11245_v46 = vld [vmem:[%s14115_s1 + $0x10a8] sm:$0xff]   ;;  %v11246_v49 = vld [vmem:[%s14115_s1 + $0x1070] sm:$0xff]  }
 0x1f9   :  { %v9940_v52 = vadd.f32 %v9939_v50, %v9938_v48  ;;  %v9941_v56 = vpop.f32.mrb[34].mxu1  ;;  %v9920_v59 = vpop.f32.mrb[35].mxu0  ;;  %10241 = vmatpush3.bf16.msra.mxu1 %v11209_v60  ;;  %10220 = vmatprep.subr.bf16.mxu0 %v11210_v63  ;;  %v11247_v50 = vld [vmem:[%s14115_s1 + $0x10f0] sm:$0xff]   ;;  %v11251_v54 = vld [vmem:[%s14115_s1 + $0x10f8] sm:$0xff]   ;;  %v61_v58 = vld [vmem:[%s14114_s0 + $0x108] sm:$0xff] }
 0x1fa   :  { %v7238_v57 = vadd.f32 %v9918_v51, %v13106_v13  ;;  %v9942_v61 = vpop.f32.mrb[35].mxu1  ;;  %10242 = vmatprep.subr.bf16.mxu1 %v11211_v0  ;;  %v11222_v13 = vld [vmem:[%s14115_s1 + $0x1040] sm:$0xff]   ;;  %v11248_v51 = vld [vmem:[%s14115_s1 + $0x1030] sm:$0xff]   ;;  %v11253_v56 = vld [vmem:[%s14115_s1 + $0x10b8] sm:$0xff]  }
 0x1fb   :  { %v8744_v61 = vcombine.low %v61_v58, %v61_v58  ;;  %v11258_v63 = vld [vmem:[%s14115_s1 + $0x1140] sm:$0xff]  }
 0x1fc   :  { %v13208_v62 = vadd.f32 %v9940_v52, %v7238_v57  ;;  %10221 = vmatpush3.bf16.msra.mxu0 %v11212_v1  ;;  %v11249_v52 = vld [vmem:[%s14115_s1 + $0x10b0] sm:$0xff]   ;;  %v60_v57 = vld [vmem:[%s14114_s0 + $0x100] sm:$0xff] }
 0x1fd   :  { %10243 = vmatpush3.bf16.msra.mxu1 %v11213_v2  ;;  %10222 = vmatprep.subr.bf16.mxu0 %v11214_v3  ;;  %v8742_v59 = vcombine.low %v60_v57, %v60_v57  ;;  %v8743_v60 = vcombine.high %v60_v57, %v60_v57  ;;  %v11259_v0 = vld [vmem:[%s14115_s1 + $0x11c0] sm:$0xff]   ;;  %v11262_v3 = vld [vmem:[%s14115_s1 + $0x1148] sm:$0xff]   ;;  %v11302_v57 = vld [vmem:[%s14115_s1 + $0x1250] sm:$0xff]  }
 0x1fe   :  { %10244 = vmatprep.subr.bf16.mxu1 %v11215_v4  ;;  %v11260_v1 = vld [vmem:[%s14115_s1 + $0x1100] sm:$0xff]   ;;  %v11263_v4 = vld [vmem:[%s14115_s1 + $0x11c8] sm:$0xff]  }
 0x1ff   :  { %v11261_v2 = vld [vmem:[%s14115_s1 + $0x1180] sm:$0xff]  }
 0x200   :  { %10223 = vmatpush3.bf16.msra.mxu0 %v11216_v5  ;;  %v11264_v5 = vld [vmem:[%s14115_s1 + $0x1108] sm:$0xff]  }
 0x201   :  { %10245 = vmatpush3.bf16.msra.mxu1 %v11217_v6  ;;  %10252 = vmatprep.subr.bf16.mxu0 %v11222_v13  ;;  %v11265_v6 = vld [vmem:[%s14115_s1 + $0x1188] sm:$0xff]   ;;  %v11272_v13 = vld [vmem:[%s14115_s1 + $0x1118] sm:$0xff]  }
 0x202   :  { %10274 = vmatprep.subr.bf16.mxu1 %v11223_v14  ;;  %v11273_v14 = vld [vmem:[%s14115_s1 + $0x1198] sm:$0xff]  }
 0x203   :  { %7796 = vmatmul.mubr.bf16.vlgmr.msra.gmra.mrb[60].mxu0 %v8738_v9  ;;  %v11268_v9 = vld [vmem:[%s14115_s1 + $0x1110] sm:$0xff]  }
 0x204   :  { %7836 = vmatmul.mubr.bf16.vlgmr.msra.gmra.mrb[60].mxu1 %v8740_v11  ;;  %10253 = vmatpush3.bf16.msra.mxu0 %v11224_v15  ;;  %v11270_v11 = vld [vmem:[%s14115_s1 + $0x1158] sm:$0xff]   ;;  %v11274_v15 = vld [vmem:[%s14115_s1 + $0x1160] sm:$0xff]  }
 0x205   :  { %10275 = vmatpush3.bf16.msra.mxu1 %v11225_v16  ;;  %10254 = vmatprep.subr.bf16.mxu0 %v11226_v17  ;;  %v11275_v16 = vld [vmem:[%s14115_s1 + $0x11e0] sm:$0xff]  }
 0x206   :  { %10276 = vmatprep.subr.bf16.mxu1 %v11227_v18  ;;  %7875 = vmatprep.mubr.bf16.mxu0 %v8743_v60  ;;  %v11276_v17 = vld [vmem:[%s14115_s1 + $0x1120] sm:$0xff]   ;;  %v11305_v60 = vld [vmem:[%s14115_s1 + $0x1290] sm:$0xff]  }
 0x208   :  { %10255 = vmatpush3.bf16.msra.mxu0 %v11228_v19  ;;  %v11277_v19 = vld [vmem:[%s14115_s1 + $0x11a0] sm:$0xff]  }
 0x209   :  { %10277 = vmatpush3.bf16.msra.mxu1 %v11229_v20  ;;  %10256 = vmatprep.subr.bf16.mxu0 %v11230_v21 }
 0x20a   :  { %10278 = vmatprep.subr.bf16.mxu1 %v11231_v22 }
 0x20c   :  { %10257 = vmatpush3.bf16.msra.mxu0 %v11232_v23 }
 0x20d   :  { %10279 = vmatpush3.bf16.msra.mxu1 %v11233_v24  ;;  %10258 = vmatprep.subr.bf16.mxu0 %v11234_v25  ;;  %v11278_v25 = vld [vmem:[%s14115_s1 + $0x1168] sm:$0xff]  }
 0x20e   :  { %10280 = vmatprep.subr.bf16.mxu1 %v11235_v26 }
 0x210   :  { %10259 = vmatpush3.bf16.msra.mxu0 %v11236_v27  ;;  %v11279_v27 = vld [vmem:[%s14115_s1 + $0x11e8] sm:$0xff]  }
 0x211   :  { %10281 = vmatpush3.bf16.msra.mxu1 %v11237_v28  ;;  %10260 = vmatprep.subr.bf16.mxu0 %v11238_v29 }
 0x212   :  { %10282 = vmatprep.subr.bf16.mxu1 %v11239_v30  ;;  %v11280_v30 = vld [vmem:[%s14115_s1 + $0x1128] sm:$0xff]  }
 0x214   :  { %10261 = vmatpush3.bf16.msra.mxu0 %v11240_v31 }
 0x215   :  { %10283 = vmatpush3.bf16.msra.mxu1 %v11241_v33  ;;  %10262 = vmatprep.subr.bf16.mxu0 %v11242_v39  ;;  %v11286_v39 = vld [vmem:[%s14115_s1 + $0x1178] sm:$0xff]  }
 0x216   :  { %v9960_v32 = vpop.f32.mrb[36].mxu0  ;;  %10284 = vmatprep.subr.bf16.mxu1 %v11243_v41  ;;  %v11288_v41 = vld [vmem:[%s14115_s1 + $0x1138] sm:$0xff]  }
 0x217   :  { %v9982_v34 = vpop.f32.mrb[36].mxu1  ;;  %v9961_v35 = vpop.f32.mrb[37].mxu0 }
 0x218   :  { %v9983_v36 = vpop.f32.mrb[37].mxu1  ;;  %v9962_v37 = vadd.f32 %v9961_v35, %v9960_v32  ;;  %v9963_v40 = vpop.f32.mrb[38].mxu0  ;;  %10263 = vmatpush3.bf16.msra.mxu0 %v11244_v44  ;;  %v11281_v32 = vld [vmem:[%s14115_s1 + $0x11a8] sm:$0xff]   ;;  %v11282_v35 = vld [vmem:[%s14115_s1 + $0x1170] sm:$0xff]   ;;  %v63_v44 = vld [vmem:[%s14114_s0 + $0x118] sm:$0xff] }
 0x219   :  { %v9984_v38 = vadd.f32 %v9983_v36, %v9982_v34  ;;  %v9985_v42 = vpop.f32.mrb[38].mxu1  ;;  %v9964_v45 = vpop.f32.mrb[39].mxu0  ;;  %10285 = vmatpush3.bf16.msra.mxu1 %v11245_v46  ;;  %10264 = vmatprep.subr.bf16.mxu0 %v11246_v49  ;;  %v11283_v36 = vld [vmem:[%s14115_s1 + $0x11f0] sm:$0xff]   ;;  %v11287_v40 = vld [vmem:[%s14115_s1 + $0x11f8] sm:$0xff]   ;;  %v11294_v49 = vld [vmem:[%s14115_s1 + $0x1240] sm:$0xff]  }
 0x21a   :  { %v7318_v43 = vadd.f32 %v9962_v37, %v13208_v62  ;;  %v9986_v47 = vpop.f32.mrb[39].mxu1  ;;  %10286 = vmatprep.subr.bf16.mxu1 %v11247_v50  ;;  %v8745_v62 = vcombine.high %v61_v58, %v61_v58  ;;  %v11284_v37 = vld [vmem:[%s14115_s1 + $0x1130] sm:$0xff]   ;;  %v11289_v42 = vld [vmem:[%s14115_s1 + $0x11b8] sm:$0xff]   ;;  %v11295_v50 = vld [vmem:[%s14115_s1 + $0x12c0] sm:$0xff]  }
 0x21b   :  { %v8748_v47 = vcombine.low %v63_v44, %v63_v44  ;;  %v11303_v58 = vld [vmem:[%s14115_s1 + $0x12d0] sm:$0xff]  }
 0x21c   :  { %v13313_v48 = vadd.f32 %v9984_v38, %v7318_v43  ;;  %10265 = vmatpush3.bf16.msra.mxu0 %v11248_v51  ;;  %7915 = vmatprep.mubr.bf16.mxu1 %v8745_v62  ;;  %v11285_v38 = vld [vmem:[%s14115_s1 + $0x11b0] sm:$0xff]   ;;  %v11296_v51 = vld [vmem:[%s14115_s1 + $0x1200] sm:$0xff]   ;;  %v11307_v62 = vld [vmem:[%s14115_s1 + $0x12d8] sm:$0xff]  }
 0x21d   :  { %10287 = vmatpush3.bf16.msra.mxu1 %v11249_v52  ;;  %10266 = vmatprep.subr.bf16.mxu0 %v11250_v53  ;;  %v62_v43 = vld [vmem:[%s14114_s0 + $0x110] sm:$0xff]  ;;  %v11297_v52 = vld [vmem:[%s14115_s1 + $0x1280] sm:$0xff]   ;;  %v11298_v53 = vld [vmem:[%s14115_s1 + $0x1248] sm:$0xff]  }
 0x21e   :  { %10288 = vmatprep.subr.bf16.mxu1 %v11251_v54  ;;  %v8746_v45 = vcombine.low %v62_v43, %v62_v43  ;;  %v8747_v46 = vcombine.high %v62_v43, %v62_v43  ;;  %v11299_v54 = vld [vmem:[%s14115_s1 + $0x12c8] sm:$0xff]   ;;  %v11338_v43 = vld [vmem:[%s14115_s1 + $0x1350] sm:$0xff]  }
 0x220   :  { %10267 = vmatpush3.bf16.msra.mxu0 %v11252_v55  ;;  %v11300_v55 = vld [vmem:[%s14115_s1 + $0x1208] sm:$0xff]  }
 0x221   :  { %10289 = vmatpush3.bf16.msra.mxu1 %v11253_v56  ;;  %10296 = vmatprep.subr.bf16.mxu0 %v11258_v63  ;;  %v11301_v56 = vld [vmem:[%s14115_s1 + $0x1288] sm:$0xff]   ;;  %v11308_v63 = vld [vmem:[%s14115_s1 + $0x1218] sm:$0xff]  }
 0x222   :  { %10318 = vmatprep.subr.bf16.mxu1 %v11259_v0  ;;  %v11309_v0 = vld [vmem:[%s14115_s1 + $0x1298] sm:$0xff]  }
 0x223   :  { %7876 = vmatmul.mubr.bf16.vlgmr.msra.gmra.mrb[64].mxu0 %v8742_v59  ;;  %v11304_v59 = vld [vmem:[%s14115_s1 + $0x1210] sm:$0xff]  }
 0x224   :  { %7916 = vmatmul.mubr.bf16.vlgmr.msra.gmra.mrb[64].mxu1 %v8744_v61  ;;  %10297 = vmatpush3.bf16.msra.mxu0 %v11260_v1  ;;  %v11306_v61 = vld [vmem:[%s14115_s1 + $0x1258] sm:$0xff]   ;;  %v11310_v1 = vld [vmem:[%s14115_s1 + $0x1260] sm:$0xff]  }
 0x225   :  { %10319 = vmatpush3.bf16.msra.mxu1 %v11261_v2  ;;  %10298 = vmatprep.subr.bf16.mxu0 %v11262_v3  ;;  %v11311_v2 = vld [vmem:[%s14115_s1 + $0x12e0] sm:$0xff]  }
 0x226   :  { %10320 = vmatprep.subr.bf16.mxu1 %v11263_v4  ;;  %7955 = vmatprep.mubr.bf16.mxu0 %v8747_v46  ;;  %v11312_v4 = vld [vmem:[%s14115_s1 + $0x1220] sm:$0xff]   ;;  %v11341_v46 = vld [vmem:[%s14115_s1 + $0x1390] sm:$0xff]  }
 0x228   :  { %10299 = vmatpush3.bf16.msra.mxu0 %v11264_v5 }
 0x229   :  { %10321 = vmatpush3.bf16.msra.mxu1 %v11265_v6  ;;  %10300 = vmatprep.subr.bf16.mxu0 %v11266_v7  ;;  %v11313_v6 = vld [vmem:[%s14115_s1 + $0x12a0] sm:$0xff]  }
 0x22a   :  { %10322 = vmatprep.subr.bf16.mxu1 %v11267_v8 }
 0x22c   :  { %10301 = vmatpush3.bf16.msra.mxu0 %v11268_v9 }
 0x22d   :  { %10323 = vmatpush3.bf16.msra.mxu1 %v11269_v10  ;;  %10302 = vmatprep.subr.bf16.mxu0 %v11270_v11  ;;  %v11314_v10 = vld [vmem:[%s14115_s1 + $0x1268] sm:$0xff]  }
 0x22e   :  { %10324 = vmatprep.subr.bf16.mxu1 %v11271_v12  ;;  %v11315_v12 = vld [vmem:[%s14115_s1 + $0x12e8] sm:$0xff]  }
 0x230   :  { %10303 = vmatpush3.bf16.msra.mxu0 %v11272_v13 }
 0x231   :  { %10325 = vmatpush3.bf16.msra.mxu1 %v11273_v14  ;;  %10304 = vmatprep.subr.bf16.mxu0 %v11274_v15 }
 0x232   :  { %10326 = vmatprep.subr.bf16.mxu1 %v11275_v16  ;;  %v11316_v16 = vld [vmem:[%s14115_s1 + $0x1228] sm:$0xff]  }
 0x234   :  { %10305 = vmatpush3.bf16.msra.mxu0 %v11276_v17  ;;  %v11317_v17 = vld [vmem:[%s14115_s1 + $0x12a8] sm:$0xff]  }
 0x235   :  { %10327 = vmatpush3.bf16.msra.mxu1 %v11277_v19  ;;  %10306 = vmatprep.subr.bf16.mxu0 %v11278_v25  ;;  %v11322_v25 = vld [vmem:[%s14115_s1 + $0x1278] sm:$0xff]  }
 0x236   :  { %v10004_v18 = vpop.f32.mrb[40].mxu0  ;;  %10328 = vmatprep.subr.bf16.mxu1 %v11279_v27  ;;  %v11324_v27 = vld [vmem:[%s14115_s1 + $0x1238] sm:$0xff]  }
 0x237   :  { %v10026_v20 = vpop.f32.mrb[40].mxu1  ;;  %v10005_v21 = vpop.f32.mrb[41].mxu0 }
 0x238   :  { %v10027_v22 = vpop.f32.mrb[41].mxu1  ;;  %v10006_v23 = vadd.f32 %v10005_v21, %v10004_v18  ;;  %v10007_v26 = vpop.f32.mrb[42].mxu0  ;;  %10307 = vmatpush3.bf16.msra.mxu0 %v11280_v30  ;;  %v11318_v21 = vld [vmem:[%s14115_s1 + $0x1270] sm:$0xff]   ;;  %v65_v30 = vld [vmem:[%s14114_s0 + $0x128] sm:$0xff] }
 0x239   :  { %v10028_v24 = vadd.f32 %v10027_v22, %v10026_v20  ;;  %v10029_v28 = vpop.f32.mrb[42].mxu1  ;;  %v10008_v31 = vpop.f32.mrb[43].mxu0  ;;  %10329 = vmatpush3.bf16.msra.mxu1 %v11281_v32  ;;  %10308 = vmatprep.subr.bf16.mxu0 %v11282_v35  ;;  %v11319_v22 = vld [vmem:[%s14115_s1 + $0x12f0] sm:$0xff]   ;;  %v11323_v26 = vld [vmem:[%s14115_s1 + $0x12f8] sm:$0xff]   ;;  %v8753_v35 = vcombine.high %v65_v30, %v65_v30 }
 0x23a   :  { %v7398_v29 = vadd.f32 %v10006_v23, %v13313_v48  ;;  %v10030_v33 = vpop.f32.mrb[43].mxu1  ;;  %10330 = vmatprep.subr.bf16.mxu1 %v11283_v36  ;;  %v8749_v48 = vcombine.high %v63_v44, %v63_v44  ;;  %v11320_v23 = vld [vmem:[%s14115_s1 + $0x1230] sm:$0xff]   ;;  %v11325_v28 = vld [vmem:[%s14115_s1 + $0x12b8] sm:$0xff]   ;;  %v11331_v36 = vld [vmem:[%s14115_s1 + $0x13c0] sm:$0xff]  }
 0x23b   :  { %v8752_v33 = vcombine.low %v65_v30, %v65_v30  ;;  %v11339_v44 = vld [vmem:[%s14115_s1 + $0x13d0] sm:$0xff]  }
 0x23c   :  { %v13418_v34 = vadd.f32 %v10028_v24, %v7398_v29  ;;  %10309 = vmatpush3.bf16.msra.mxu0 %v11284_v37  ;;  %7995 = vmatprep.mubr.bf16.mxu1 %v8749_v48  ;;  %v11321_v24 = vld [vmem:[%s14115_s1 + $0x12b0] sm:$0xff]   ;;  %v64_v29 = vld [vmem:[%s14114_s0 + $0x120] sm:$0xff]  ;;  %v11343_v48 = vld [vmem:[%s14115_s1 + $0x13d8] sm:$0xff]  }
 0x23d   :  { %10331 = vmatpush3.bf16.msra.mxu1 %v11285_v38  ;;  %10310 = vmatprep.subr.bf16.mxu0 %v11286_v39  ;;  %v8750_v31 = vcombine.low %v64_v29, %v64_v29  ;;  %v8751_v32 = vcombine.high %v64_v29, %v64_v29  ;;  %v11332_v37 = vld [vmem:[%s14115_s1 + $0x1300] sm:$0xff]   ;;  %v11334_v39 = vld [vmem:[%s14115_s1 + $0x1348] sm:$0xff]   ;;  %v11374_v29 = vld [vmem:[%s14115_s1 + $0x1450] sm:$0xff]  }
 0x23e   :  { %10332 = vmatprep.subr.bf16.mxu1 %v11287_v40  ;;  %v11333_v38 = vld [vmem:[%s14115_s1 + $0x1380] sm:$0xff]   ;;  %v11335_v40 = vld [vmem:[%s14115_s1 + $0x13c8] sm:$0xff]   ;;  %v11375_v30 = vld [vmem:[%s14115_s1 + $0x14d0] sm:$0xff]  }
 0x240   :  { %10311 = vmatpush3.bf16.msra.mxu0 %v11288_v41  ;;  %v11336_v41 = vld [vmem:[%s14115_s1 + $0x1308] sm:$0xff]  }
 0x241   :  { %10333 = vmatpush3.bf16.msra.mxu1 %v11289_v42  ;;  %10340 = vmatprep.subr.bf16.mxu0 %v11294_v49  ;;  %v11337_v42 = vld [vmem:[%s14115_s1 + $0x1388] sm:$0xff]   ;;  %v11344_v49 = vld [vmem:[%s14115_s1 + $0x1318] sm:$0xff]  }
 0x242   :  { %10362 = vmatprep.subr.bf16.mxu1 %v11295_v50  ;;  %v11345_v50 = vld [vmem:[%s14115_s1 + $0x1398] sm:$0xff]  }
 0x243   :  { %7956 = vmatmul.mubr.bf16.vlgmr.msra.gmra.mrb[68].mxu0 %v8746_v45  ;;  %v11340_v45 = vld [vmem:[%s14115_s1 + $0x1310] sm:$0xff]  }
 0x244   :  { %7996 = vmatmul.mubr.bf16.vlgmr.msra.gmra.mrb[68].mxu1 %v8748_v47  ;;  %10341 = vmatpush3.bf16.msra.mxu0 %v11296_v51  ;;  %v11342_v47 = vld [vmem:[%s14115_s1 + $0x1358] sm:$0xff]   ;;  %v11346_v51 = vld [vmem:[%s14115_s1 + $0x1360] sm:$0xff]  }
 0x245   :  { %10363 = vmatpush3.bf16.msra.mxu1 %v11297_v52  ;;  %10342 = vmatprep.subr.bf16.mxu0 %v11298_v53  ;;  %v11347_v52 = vld [vmem:[%s14115_s1 + $0x13e0] sm:$0xff]  }
 0x246   :  { %10364 = vmatprep.subr.bf16.mxu1 %v11299_v54  ;;  %8035 = vmatprep.mubr.bf16.mxu0 %v8751_v32  ;;  %v11348_v54 = vld [vmem:[%s14115_s1 + $0x1320] sm:$0xff]   ;;  %v11377_v32 = vld [vmem:[%s14115_s1 + $0x1490] sm:$0xff]  }
 0x247   :  { %8075 = vmatprep.mubr.bf16.mxu1 %v8753_v35  ;;  %v11380_v35 = vld [vmem:[%s14115_s1 + $0x1418] sm:$0xff]  }
 0x248   :  { %10343 = vmatpush3.bf16.msra.mxu0 %v11300_v55 }
 0x249   :  { %10365 = vmatpush3.bf16.msra.mxu1 %v11301_v56  ;;  %10344 = vmatprep.subr.bf16.mxu0 %v11302_v57  ;;  %v11349_v56 = vld [vmem:[%s14115_s1 + $0x13a0] sm:$0xff]  }
 0x24a   :  { %10366 = vmatprep.subr.bf16.mxu1 %v11303_v58 }
 0x24c   :  { %10345 = vmatpush3.bf16.msra.mxu0 %v11304_v59  ;;  %v11350_v59 = vld [vmem:[%s14115_s1 + $0x1368] sm:$0xff]  }
 0x24d   :  { %10367 = vmatpush3.bf16.msra.mxu1 %v11305_v60  ;;  %10346 = vmatprep.subr.bf16.mxu0 %v11306_v61 }
 0x24e   :  { %10368 = vmatprep.subr.bf16.mxu1 %v11307_v62  ;;  %v11351_v62 = vld [vmem:[%s14115_s1 + $0x13e8] sm:$0xff]  }
 0x250   :  { %10347 = vmatpush3.bf16.msra.mxu0 %v11308_v63 }
 0x251   :  { %10369 = vmatpush3.bf16.msra.mxu1 %v11309_v0  ;;  %10348 = vmatprep.subr.bf16.mxu0 %v11310_v1  ;;  %v11352_v1 = vld [vmem:[%s14115_s1 + $0x1328] sm:$0xff]  }
 0x252   :  { %10370 = vmatprep.subr.bf16.mxu1 %v11311_v2 }
 0x254   :  { %10349 = vmatpush3.bf16.msra.mxu0 %v11312_v4 }
 0x255   :  { %10371 = vmatpush3.bf16.msra.mxu1 %v11313_v6  ;;  %10350 = vmatprep.subr.bf16.mxu0 %v11314_v10  ;;  %v11354_v6 = vld [vmem:[%s14115_s1 + $0x1370] sm:$0xff]  }
 0x256   :  { %v10048_v3 = vpop.f32.mrb[44].mxu0  ;;  %10372 = vmatprep.subr.bf16.mxu1 %v11315_v12  ;;  %v11357_v10 = vld [vmem:[%s14115_s1 + $0x13b0] sm:$0xff]   ;;  %v11359_v12 = vld [vmem:[%s14115_s1 + $0x13f8] sm:$0xff]  }
 0x257   :  { %v10070_v5 = vpop.f32.mrb[44].mxu1  ;;  %v10049_v7 = vpop.f32.mrb[45].mxu0 }
 0x258   :  { %v10050_v8 = vadd.f32 %v10049_v7, %v10048_v3  ;;  %v10071_v9 = vpop.f32.mrb[45].mxu1  ;;  %v10051_v13 = vpop.f32.mrb[46].mxu0  ;;  %10351 = vmatpush3.bf16.msra.mxu0 %v11316_v16  ;;  %v11353_v3 = vld [vmem:[%s14115_s1 + $0x13a8] sm:$0xff]  }
 0x259   :  { %v10072_v11 = vadd.f32 %v10071_v9, %v10070_v5  ;;  %v10073_v15 = vpop.f32.mrb[46].mxu1  ;;  %v10052_v18 = vpop.f32.mrb[47].mxu0  ;;  %10373 = vmatpush3.bf16.msra.mxu1 %v11317_v17  ;;  %10352 = vmatprep.subr.bf16.mxu0 %v11318_v21  ;;  %v11356_v9 = vld [vmem:[%s14115_s1 + $0x1330] sm:$0xff]   ;;  %v11360_v13 = vld [vmem:[%s14115_s1 + $0x1338] sm:$0xff]   ;;  %v11366_v21 = vld [vmem:[%s14115_s1 + $0x1440] sm:$0xff]  }
 0x25a   :  { %v7478_v14 = vadd.f32 %v10050_v8, %v13418_v34  ;;  %v10074_v20 = vpop.f32.mrb[47].mxu1  ;;  %10374 = vmatprep.subr.bf16.mxu1 %v11319_v22  ;;  %v11330_v34 = vld [vmem:[%s14115_s1 + $0x1340] sm:$0xff]   ;;  %v11355_v8 = vld [vmem:[%s14115_s1 + $0x13f0] sm:$0xff]   ;;  %v67_v18 = vld [vmem:[%s14114_s0 + $0x138] sm:$0xff] }
 0x25b   :  { %v66_v15 = vld [vmem:[%s14114_s0 + $0x130] sm:$0xff]  ;;  %v8757_v20 = vcombine.high %v67_v18, %v67_v18  ;;  %v11367_v22 = vld [vmem:[%s14115_s1 + $0x14c0] sm:$0xff]  }
 0x25c   :  { %v13523_v19 = vadd.f32 %v10072_v11, %v7478_v14  ;;  %10353 = vmatpush3.bf16.msra.mxu0 %v11320_v23  ;;  %v11358_v11 = vld [vmem:[%s14115_s1 + $0x1378] sm:$0xff]   ;;  %v8754_v16 = vcombine.low %v66_v15, %v66_v15  ;;  %v8755_v17 = vcombine.high %v66_v15, %v66_v15  ;;  %v11368_v23 = vld [vmem:[%s14115_s1 + $0x1400] sm:$0xff]   ;;  %v11410_v15 = vld [vmem:[%s14115_s1 + $0x1550] sm:$0xff]  }
 0x25d   :  { %10375 = vmatpush3.bf16.msra.mxu1 %v11321_v24  ;;  %10354 = vmatprep.subr.bf16.mxu0 %v11322_v25  ;;  %v11361_v14 = vld [vmem:[%s14115_s1 + $0x13b8] sm:$0xff]   ;;  %v11369_v24 = vld [vmem:[%s14115_s1 + $0x1480] sm:$0xff]   ;;  %v11370_v25 = vld [vmem:[%s14115_s1 + $0x1448] sm:$0xff]  }
 0x25e   :  { %10376 = vmatprep.subr.bf16.mxu1 %v11323_v26  ;;  %v11371_v26 = vld [vmem:[%s14115_s1 + $0x14c8] sm:$0xff]  }
 0x260   :  { %10355 = vmatpush3.bf16.msra.mxu0 %v11324_v27  ;;  %v11372_v27 = vld [vmem:[%s14115_s1 + $0x1408] sm:$0xff]  }
 0x261   :  { %10377 = vmatpush3.bf16.msra.mxu1 %v11325_v28  ;;  %10384 = vmatprep.subr.bf16.mxu0 %v11330_v34  ;;  %v11373_v28 = vld [vmem:[%s14115_s1 + $0x1488] sm:$0xff]   ;;  %v11379_v34 = vld [vmem:[%s14115_s1 + $0x14d8] sm:$0xff]  }
 0x262   :  { %10406 = vmatprep.subr.bf16.mxu1 %v11331_v36  ;;  %v11381_v36 = vld [vmem:[%s14115_s1 + $0x1498] sm:$0xff]  }
 0x263   :  { %8036 = vmatmul.mubr.bf16.vlgmr.msra.gmra.mrb[72].mxu0 %v8750_v31  ;;  %v11376_v31 = vld [vmem:[%s14115_s1 + $0x1410] sm:$0xff]  }
 0x264   :  { %8076 = vmatmul.mubr.bf16.vlgmr.msra.gmra.mrb[72].mxu1 %v8752_v33  ;;  %10385 = vmatpush3.bf16.msra.mxu0 %v11332_v37  ;;  %v11378_v33 = vld [vmem:[%s14115_s1 + $0x1458] sm:$0xff]   ;;  %v11382_v37 = vld [vmem:[%s14115_s1 + $0x1460] sm:$0xff]  }
 0x265   :  { %10407 = vmatpush3.bf16.msra.mxu1 %v11333_v38  ;;  %10386 = vmatprep.subr.bf16.mxu0 %v11334_v39  ;;  %v11383_v38 = vld [vmem:[%s14115_s1 + $0x14e0] sm:$0xff]  }
 0x266   :  { %10408 = vmatprep.subr.bf16.mxu1 %v11335_v40  ;;  %8115 = vmatprep.mubr.bf16.mxu0 %v8755_v17  ;;  %v11384_v40 = vld [vmem:[%s14115_s1 + $0x1420] sm:$0xff]   ;;  %v11412_v17 = vld [vmem:[%s14115_s1 + $0x1510] sm:$0xff]  }
 0x267   :  { %8155 = vmatprep.mubr.bf16.mxu1 %v8757_v20  ;;  %v11415_v20 = vld [vmem:[%s14115_s1 + $0x15d8] sm:$0xff]  }
 0x268   :  { %10387 = vmatpush3.bf16.msra.mxu0 %v11336_v41 }
 0x269   :  { %10409 = vmatpush3.bf16.msra.mxu1 %v11337_v42  ;;  %10388 = vmatprep.subr.bf16.mxu0 %v11338_v43  ;;  %v11385_v42 = vld [vmem:[%s14115_s1 + $0x14a0] sm:$0xff]  }
 0x26a   :  { %10410 = vmatprep.subr.bf16.mxu1 %v11339_v44 }
 0x26c   :  { %10389 = vmatpush3.bf16.msra.mxu0 %v11340_v45  ;;  %v11386_v45 = vld [vmem:[%s14115_s1 + $0x1468] sm:$0xff]  }
 0x26d   :  { %10411 = vmatpush3.bf16.msra.mxu1 %v11341_v46  ;;  %10390 = vmatprep.subr.bf16.mxu0 %v11342_v47 }
 0x26e   :  { %10412 = vmatprep.subr.bf16.mxu1 %v11343_v48  ;;  %v11387_v48 = vld [vmem:[%s14115_s1 + $0x14e8] sm:$0xff]  }
 0x270   :  { %10391 = vmatpush3.bf16.msra.mxu0 %v11344_v49 }
 0x271   :  { %10413 = vmatpush3.bf16.msra.mxu1 %v11345_v50  ;;  %10392 = vmatprep.subr.bf16.mxu0 %v11346_v51  ;;  %v11388_v51 = vld [vmem:[%s14115_s1 + $0x1428] sm:$0xff]  }
 0x272   :  { %10414 = vmatprep.subr.bf16.mxu1 %v11347_v52 }
 0x274   :  { %10393 = vmatpush3.bf16.msra.mxu0 %v11348_v54 }
 0x275   :  { %10415 = vmatpush3.bf16.msra.mxu1 %v11349_v56  ;;  %10394 = vmatprep.subr.bf16.mxu0 %v11350_v59  ;;  %v11390_v56 = vld [vmem:[%s14115_s1 + $0x1470] sm:$0xff]  }
 0x276   :  { %v10092_v53 = vpop.f32.mrb[48].mxu0  ;;  %10416 = vmatprep.subr.bf16.mxu1 %v11351_v62  ;;  %v11392_v59 = vld [vmem:[%s14115_s1 + $0x1430] sm:$0xff]   ;;  %v11395_v62 = vld [vmem:[%s14115_s1 + $0x14f8] sm:$0xff]  }
 0x277   :  { %v10114_v55 = vpop.f32.mrb[48].mxu1  ;;  %v10093_v57 = vpop.f32.mrb[49].mxu0 }
 0x278   :  { %v10115_v58 = vpop.f32.mrb[49].mxu1  ;;  %v10094_v60 = vadd.f32 %v10093_v57, %v10092_v53  ;;  %v10095_v63 = vpop.f32.mrb[50].mxu0  ;;  %10395 = vmatpush3.bf16.msra.mxu0 %v11352_v1  ;;  %v11389_v53 = vld [vmem:[%s14115_s1 + $0x14a8] sm:$0xff]   ;;  %v68_v1 = vld [vmem:[%s14114_s0 + $0x140] sm:$0xff] }
 0x279   :  { %v10116_v61 = vadd.f32 %v10115_v58, %v10114_v55  ;;  %v10117_v0 = vpop.f32.mrb[50].mxu1  ;;  %v10096_v4 = vpop.f32.mrb[51].mxu0  ;;  %10417 = vmatpush3.bf16.msra.mxu1 %v11353_v3  ;;  %10396 = vmatprep.subr.bf16.mxu0 %v11354_v6  ;;  %v11391_v58 = vld [vmem:[%s14115_s1 + $0x14f0] sm:$0xff]   ;;  %v11396_v63 = vld [vmem:[%s14115_s1 + $0x1438] sm:$0xff]   ;;  %v8758_v3 = vcombine.low %v68_v1, %v68_v1 }
 0x27a   :  { %v7558_v2 = vadd.f32 %v10094_v60, %v13523_v19  ;;  %v10118_v5 = vpop.f32.mrb[51].mxu1  ;;  %10418 = vmatprep.subr.bf16.mxu1 %v11355_v8  ;;  %v8756_v19 = vcombine.low %v67_v18, %v67_v18  ;;  %v11393_v60 = vld [vmem:[%s14115_s1 + $0x14b0] sm:$0xff]   ;;  %v11397_v0 = vld [vmem:[%s14115_s1 + $0x14b8] sm:$0xff]   ;;  %v8759_v4 = vcombine.high %v68_v1, %v68_v1  ;;  %v11403_v8 = vld [vmem:[%s14115_s1 + $0x15c0] sm:$0xff]  }
 0x27b   :  { %v11413_v18 = vld [vmem:[%s14115_s1 + $0x1590] sm:$0xff]  }
 0x27c   :  { %v13631_v7 = vadd.f32 %v10116_v61, %v7558_v2  ;;  %10397 = vmatpush3.bf16.msra.mxu0 %v11356_v9  ;;  %v11394_v61 = vld [vmem:[%s14115_s1 + $0x1478] sm:$0xff]   ;;  %v69_v2 = vld [vmem:[%s14114_s0 + $0x148] sm:$0xff]  ;;  %v11404_v9 = vld [vmem:[%s14115_s1 + $0x1500] sm:$0xff]  }
 0x27d   :  { %10419 = vmatpush3.bf16.msra.mxu1 %v11357_v10  ;;  %10398 = vmatprep.subr.bf16.mxu0 %v11358_v11  ;;  %v8760_v5 = vcombine.low %v69_v2, %v69_v2  ;;  %v8761_v6 = vcombine.high %v69_v2, %v69_v2  ;;  %v11405_v10 = vld [vmem:[%s14115_s1 + $0x1580] sm:$0xff]   ;;  %v11406_v11 = vld [vmem:[%s14115_s1 + $0x1548] sm:$0xff]   ;;  %v11446_v1 = vld [vmem:[%s14115_s1 + $0x1650] sm:$0xff]  }
 0x27e   :  { %10420 = vmatprep.subr.bf16.mxu1 %v11359_v12  ;;  %v11407_v12 = vld [vmem:[%s14115_s1 + $0x15c8] sm:$0xff]   ;;  %v11447_v2 = vld [vmem:[%s14115_s1 + $0x16d0] sm:$0xff]  }
 0x280   :  { %10399 = vmatpush3.bf16.msra.mxu0 %v11360_v13  ;;  %v11408_v13 = vld [vmem:[%s14115_s1 + $0x1508] sm:$0xff]  }
 0x281   :  { %10421 = vmatpush3.bf16.msra.mxu1 %v11361_v14  ;;  %10428 = vmatprep.subr.bf16.mxu0 %v11366_v21  ;;  %v11409_v14 = vld [vmem:[%s14115_s1 + $0x1588] sm:$0xff]   ;;  %v11416_v21 = vld [vmem:[%s14115_s1 + $0x1518] sm:$0xff]  }
 0x282   :  { %10450 = vmatprep.subr.bf16.mxu1 %v11367_v22  ;;  %v11417_v22 = vld [vmem:[%s14115_s1 + $0x1598] sm:$0xff]  }
 0x283   :  { %8116 = vmatmul.mubr.bf16.vlgmr.msra.gmra.mrb[76].mxu0 %v8754_v16  ;;  %v11411_v16 = vld [vmem:[%s14115_s1 + $0x15d0] sm:$0xff]  }
 0x284   :  { %8156 = vmatmul.mubr.bf16.vlgmr.msra.gmra.mrb[76].mxu1 %v8756_v19  ;;  %10429 = vmatpush3.bf16.msra.mxu0 %v11368_v23  ;;  %v11414_v19 = vld [vmem:[%s14115_s1 + $0x1558] sm:$0xff]   ;;  %v11418_v23 = vld [vmem:[%s14115_s1 + $0x1560] sm:$0xff]  }
 0x285   :  { %10451 = vmatpush3.bf16.msra.mxu1 %v11369_v24  ;;  %10430 = vmatprep.subr.bf16.mxu0 %v11370_v25  ;;  %v11419_v24 = vld [vmem:[%s14115_s1 + $0x15e0] sm:$0xff]  }
 0x286   :  { %10452 = vmatprep.subr.bf16.mxu1 %v11371_v26  ;;  %8195 = vmatprep.mubr.bf16.mxu0 %v8759_v4  ;;  %v11420_v26 = vld [vmem:[%s14115_s1 + $0x1520] sm:$0xff]   ;;  %v11449_v4 = vld [vmem:[%s14115_s1 + $0x1690] sm:$0xff]  }
 0x287   :  { %8235 = vmatprep.mubr.bf16.mxu1 %v8761_v6  ;;  %v11451_v6 = vld [vmem:[%s14115_s1 + $0x16d8] sm:$0xff]  }
 0x288   :  { %10431 = vmatpush3.bf16.msra.mxu0 %v11372_v27 }
 0x289   :  { %10453 = vmatpush3.bf16.msra.mxu1 %v11373_v28  ;;  %10432 = vmatprep.subr.bf16.mxu0 %v11374_v29  ;;  %v11421_v28 = vld [vmem:[%s14115_s1 + $0x15a0] sm:$0xff]  }
 0x28a   :  { %10454 = vmatprep.subr.bf16.mxu1 %v11375_v30 }
 0x28c   :  { %10433 = vmatpush3.bf16.msra.mxu0 %v11376_v31 }
 0x28d   :  { %10455 = vmatpush3.bf16.msra.mxu1 %v11377_v32  ;;  %10434 = vmatprep.subr.bf16.mxu0 %v11378_v33  ;;  %v11422_v32 = vld [vmem:[%s14115_s1 + $0x1568] sm:$0xff]  }
 0x28e   :  { %10456 = vmatprep.subr.bf16.mxu1 %v11379_v34  ;;  %v11423_v34 = vld [vmem:[%s14115_s1 + $0x15e8] sm:$0xff]  }
 0x290   :  { %10435 = vmatpush3.bf16.msra.mxu0 %v11380_v35 }
 0x291   :  { %10457 = vmatpush3.bf16.msra.mxu1 %v11381_v36  ;;  %10436 = vmatprep.subr.bf16.mxu0 %v11382_v37 }
 0x292   :  { %10458 = vmatprep.subr.bf16.mxu1 %v11383_v38  ;;  %v11424_v38 = vld [vmem:[%s14115_s1 + $0x1528] sm:$0xff]  }
 0x294   :  { %10437 = vmatpush3.bf16.msra.mxu0 %v11384_v40 }
 0x295   :  { %10459 = vmatpush3.bf16.msra.mxu1 %v11385_v42  ;;  %10438 = vmatprep.subr.bf16.mxu0 %v11386_v45  ;;  %v11428_v45 = vld [vmem:[%s14115_s1 + $0x1530] sm:$0xff]  }
 0x296   :  { %v10136_v39 = vpop.f32.mrb[52].mxu0  ;;  %10460 = vmatprep.subr.bf16.mxu1 %v11387_v48  ;;  %v11431_v48 = vld [vmem:[%s14115_s1 + $0x15f8] sm:$0xff]  }
 0x297   :  { %v10158_v41 = vpop.f32.mrb[52].mxu1  ;;  %v10137_v43 = vpop.f32.mrb[53].mxu0 }
 0x298   :  { %v10159_v44 = vpop.f32.mrb[53].mxu1  ;;  %v10138_v46 = vadd.f32 %v10137_v43, %v10136_v39  ;;  %v10139_v49 = vpop.f32.mrb[54].mxu0  ;;  %10439 = vmatpush3.bf16.msra.mxu0 %v11388_v51  ;;  %v11425_v39 = vld [vmem:[%s14115_s1 + $0x15a8] sm:$0xff]   ;;  %v11426_v43 = vld [vmem:[%s14115_s1 + $0x1570] sm:$0xff]  }
 0x299   :  { %v10160_v47 = vadd.f32 %v10159_v44, %v10158_v41  ;;  %v10161_v50 = vpop.f32.mrb[54].mxu1  ;;  %v10140_v54 = vpop.f32.mrb[55].mxu0  ;;  %10461 = vmatpush3.bf16.msra.mxu1 %v11389_v53  ;;  %10440 = vmatprep.subr.bf16.mxu0 %v11390_v56  ;;  %v11427_v44 = vld [vmem:[%s14115_s1 + $0x15f0] sm:$0xff]   ;;  %v11432_v49 = vld [vmem:[%s14115_s1 + $0x1538] sm:$0xff]   ;;  %v11438_v56 = vld [vmem:[%s14115_s1 + $0x1640] sm:$0xff]  }
 0x29a   :  { %v7638_v52 = vadd.f32 %v10138_v46, %v13631_v7  ;;  %v10162_v55 = vpop.f32.mrb[55].mxu1  ;;  %10462 = vmatprep.subr.bf16.mxu1 %v11391_v58  ;;  %v11402_v7 = vld [vmem:[%s14115_s1 + $0x1540] sm:$0xff]   ;;  %v11429_v46 = vld [vmem:[%s14115_s1 + $0x15b0] sm:$0xff]   ;;  %v11433_v50 = vld [vmem:[%s14115_s1 + $0x15b8] sm:$0xff]  }
 0x29b   :  { %v70_v51 = vld [vmem:[%s14114_s0 + $0x150] sm:$0xff]  ;;  %v11439_v58 = vld [vmem:[%s14115_s1 + $0x16c0] sm:$0xff]  }
 0x29c   :  { %v13736_v57 = vadd.f32 %v10160_v47, %v7638_v52  ;;  %10441 = vmatpush3.bf16.msra.mxu0 %v11392_v59  ;;  %v11430_v47 = vld [vmem:[%s14115_s1 + $0x1578] sm:$0xff]   ;;  %v8762_v53 = vcombine.low %v70_v51, %v70_v51  ;;  %v8763_v54 = vcombine.high %v70_v51, %v70_v51  ;;  %v11440_v59 = vld [vmem:[%s14115_s1 + $0x1600] sm:$0xff]   ;;  %v11482_v51 = vld [vmem:[%s14115_s1 + $0x1750] sm:$0xff]  }
 0x29d   :  { %10463 = vmatpush3.bf16.msra.mxu1 %v11393_v60  ;;  %10442 = vmatprep.subr.bf16.mxu0 %v11394_v61  ;;  %v71_v52 = vld [vmem:[%s14114_s0 + $0x158] sm:$0xff]  ;;  %v11441_v60 = vld [vmem:[%s14115_s1 + $0x1680] sm:$0xff]   ;;  %v11442_v61 = vld [vmem:[%s14115_s1 + $0x1648] sm:$0xff]  }
 0x29e   :  { %10464 = vmatprep.subr.bf16.mxu1 %v11395_v62  ;;  %v8764_v55 = vcombine.low %v71_v52, %v71_v52  ;;  %v11443_v62 = vld [vmem:[%s14115_s1 + $0x16c8] sm:$0xff]  }
 0x2a0   :  { %10443 = vmatpush3.bf16.msra.mxu0 %v11396_v63  ;;  %v11444_v63 = vld [vmem:[%s14115_s1 + $0x1608] sm:$0xff]  }
 0x2a1   :  { %10465 = vmatpush3.bf16.msra.mxu1 %v11397_v0  ;;  %10472 = vmatprep.subr.bf16.mxu0 %v11402_v7  ;;  %v11445_v0 = vld [vmem:[%s14115_s1 + $0x1688] sm:$0xff]   ;;  %v11452_v7 = vld [vmem:[%s14115_s1 + $0x1618] sm:$0xff]  }
 0x2a2   :  { %10494 = vmatprep.subr.bf16.mxu1 %v11403_v8  ;;  %v11453_v8 = vld [vmem:[%s14115_s1 + $0x1698] sm:$0xff]  }
 0x2a3   :  { %8196 = vmatmul.mubr.bf16.vlgmr.msra.gmra.mrb[80].mxu0 %v8758_v3  ;;  %v11448_v3 = vld [vmem:[%s14115_s1 + $0x1610] sm:$0xff]  }
 0x2a4   :  { %8236 = vmatmul.mubr.bf16.vlgmr.msra.gmra.mrb[80].mxu1 %v8760_v5  ;;  %10473 = vmatpush3.bf16.msra.mxu0 %v11404_v9  ;;  %v11450_v5 = vld [vmem:[%s14115_s1 + $0x1658] sm:$0xff]   ;;  %v11454_v9 = vld [vmem:[%s14115_s1 + $0x1660] sm:$0xff]  }
 0x2a5   :  { %10495 = vmatpush3.bf16.msra.mxu1 %v11405_v10  ;;  %10474 = vmatprep.subr.bf16.mxu0 %v11406_v11  ;;  %v11455_v10 = vld [vmem:[%s14115_s1 + $0x16e0] sm:$0xff]  }
 0x2a6   :  { %10496 = vmatprep.subr.bf16.mxu1 %v11407_v12  ;;  %8275 = vmatprep.mubr.bf16.mxu0 %v8763_v54  ;;  %v11456_v12 = vld [vmem:[%s14115_s1 + $0x1620] sm:$0xff]   ;;  %v11485_v54 = vld [vmem:[%s14115_s1 + $0x1790] sm:$0xff]  }
 0x2a8   :  { %10475 = vmatpush3.bf16.msra.mxu0 %v11408_v13 }
 0x2a9   :  { %10497 = vmatpush3.bf16.msra.mxu1 %v11409_v14  ;;  %10476 = vmatprep.subr.bf16.mxu0 %v11410_v15  ;;  %v11457_v14 = vld [vmem:[%s14115_s1 + $0x16a0] sm:$0xff]  }
 0x2aa   :  { %10498 = vmatprep.subr.bf16.mxu1 %v11411_v16 }
 0x2ac   :  { %10477 = vmatpush3.bf16.msra.mxu0 %v11412_v17  ;;  %v11458_v17 = vld [vmem:[%s14115_s1 + $0x1668] sm:$0xff]  }
 0x2ad   :  { %10499 = vmatpush3.bf16.msra.mxu1 %v11413_v18  ;;  %10478 = vmatprep.subr.bf16.mxu0 %v11414_v19 }
 0x2ae   :  { %10500 = vmatprep.subr.bf16.mxu1 %v11415_v20  ;;  %v11459_v20 = vld [vmem:[%s14115_s1 + $0x16e8] sm:$0xff]  }
 0x2b0   :  { %10479 = vmatpush3.bf16.msra.mxu0 %v11416_v21 }
 0x2b1   :  { %10501 = vmatpush3.bf16.msra.mxu1 %v11417_v22  ;;  %10480 = vmatprep.subr.bf16.mxu0 %v11418_v23  ;;  %v11460_v23 = vld [vmem:[%s14115_s1 + $0x1628] sm:$0xff]  }
 0x2b2   :  { %10502 = vmatprep.subr.bf16.mxu1 %v11419_v24 }
 0x2b4   :  { %10481 = vmatpush3.bf16.msra.mxu0 %v11420_v26 }
 0x2b5   :  { %10503 = vmatpush3.bf16.msra.mxu1 %v11421_v28  ;;  %10482 = vmatprep.subr.bf16.mxu0 %v11422_v32  ;;  %v11462_v28 = vld [vmem:[%s14115_s1 + $0x1670] sm:$0xff]  }
 0x2b6   :  { %v10180_v25 = vpop.f32.mrb[56].mxu0  ;;  %10504 = vmatprep.subr.bf16.mxu1 %v11423_v34  ;;  %v11465_v32 = vld [vmem:[%s14115_s1 + $0x16b0] sm:$0xff]   ;;  %v11467_v34 = vld [vmem:[%s14115_s1 + $0x16f8] sm:$0xff]  }
 0x2b7   :  { %v10202_v27 = vpop.f32.mrb[56].mxu1  ;;  %v10181_v29 = vpop.f32.mrb[57].mxu0 }
 0x2b8   :  { %v10182_v30 = vadd.f32 %v10181_v29, %v10180_v25  ;;  %v10203_v31 = vpop.f32.mrb[57].mxu1  ;;  %v10183_v35 = vpop.f32.mrb[58].mxu0  ;;  %10483 = vmatpush3.bf16.msra.mxu0 %v11424_v38  ;;  %v11461_v25 = vld [vmem:[%s14115_s1 + $0x16a8] sm:$0xff]  }
 0x2b9   :  { %v10204_v33 = vadd.f32 %v10203_v31, %v10202_v27  ;;  %v10205_v37 = vpop.f32.mrb[58].mxu1  ;;  %v10184_v40 = vpop.f32.mrb[59].mxu0  ;;  %10505 = vmatpush3.bf16.msra.mxu1 %v11425_v39  ;;  %10484 = vmatprep.subr.bf16.mxu0 %v11426_v43  ;;  %v11464_v31 = vld [vmem:[%s14115_s1 + $0x1630] sm:$0xff]   ;;  %v11468_v35 = vld [vmem:[%s14115_s1 + $0x1638] sm:$0xff]   ;;  %v11474_v43 = vld [vmem:[%s14115_s1 + $0x1740] sm:$0xff]  }
 0x2ba   :  { %v7718_v36 = vadd.f32 %v10182_v30, %v13736_v57  ;;  %v10206_v42 = vpop.f32.mrb[59].mxu1  ;;  %10506 = vmatprep.subr.bf16.mxu1 %v11427_v44  ;;  %v8765_v57 = vcombine.high %v71_v52, %v71_v52  ;;  %v11463_v30 = vld [vmem:[%s14115_s1 + $0x16f0] sm:$0xff]   ;;  %v72_v37 = vld [vmem:[%s14114_s0 + $0x160] sm:$0xff]  ;;  %v73_v40 = vld [vmem:[%s14114_s0 + $0x168] sm:$0xff] }
 0x2bb   :  { %v8766_v38 = vcombine.low %v72_v37, %v72_v37  ;;  %v8767_v39 = vcombine.high %v72_v37, %v72_v37  ;;  %v8769_v42 = vcombine.high %v73_v40, %v73_v40  ;;  %v11475_v44 = vld [vmem:[%s14115_s1 + $0x17c0] sm:$0xff]   ;;  %v11483_v52 = vld [vmem:[%s14115_s1 + $0x17d0] sm:$0xff]  }
 0x2bc   :  { %v13838_v41 = vadd.f32 %v10204_v33, %v7718_v36  ;;  %10485 = vmatpush3.bf16.msra.mxu0 %v11428_v45  ;;  %8315 = vmatprep.mubr.bf16.mxu1 %v8765_v57  ;;  %v11466_v33 = vld [vmem:[%s14115_s1 + $0x1678] sm:$0xff]   ;;  %v11476_v45 = vld [vmem:[%s14115_s1 + $0x1700] sm:$0xff]  }
 0x2bd   :  { %10507 = vmatpush3.bf16.msra.mxu1 %v11429_v46  ;;  %10486 = vmatprep.subr.bf16.mxu0 %v11430_v47  ;;  %v11469_v36 = vld [vmem:[%s14115_s1 + $0x16b8] sm:$0xff]   ;;  %v11477_v46 = vld [vmem:[%s14115_s1 + $0x1780] sm:$0xff]   ;;  %v11478_v47 = vld [vmem:[%s14115_s1 + $0x1748] sm:$0xff]  }
 0x2be   :  { %10508 = vmatprep.subr.bf16.mxu1 %v11431_v48  ;;  %v11479_v48 = vld [vmem:[%s14115_s1 + $0x17c8] sm:$0xff]   ;;  %v11488_v57 = vld [vmem:[%s14115_s1 + $0x1718] sm:$0xff]  }
 0x2c0   :  { %10487 = vmatpush3.bf16.msra.mxu0 %v11432_v49  ;;  %v11480_v49 = vld [vmem:[%s14115_s1 + $0x1708] sm:$0xff]  }
 0x2c1   :  { %10509 = vmatpush3.bf16.msra.mxu1 %v11433_v50  ;;  %10516 = vmatprep.subr.bf16.mxu0 %v11438_v56  ;;  %v11481_v50 = vld [vmem:[%s14115_s1 + $0x1788] sm:$0xff]   ;;  %v11487_v56 = vld [vmem:[%s14115_s1 + $0x17d8] sm:$0xff]  }
 0x2c2   :  { %10538 = vmatprep.subr.bf16.mxu1 %v11439_v58  ;;  %v11489_v58 = vld [vmem:[%s14115_s1 + $0x1798] sm:$0xff]  }
 0x2c3   :  { %8276 = vmatmul.mubr.bf16.vlgmr.msra.gmra.mrb[84].mxu0 %v8762_v53  ;;  %v11484_v53 = vld [vmem:[%s14115_s1 + $0x1710] sm:$0xff]  }
 0x2c4   :  { %8316 = vmatmul.mubr.bf16.vlgmr.msra.gmra.mrb[84].mxu1 %v8764_v55  ;;  %10517 = vmatpush3.bf16.msra.mxu0 %v11440_v59  ;;  %v11486_v55 = vld [vmem:[%s14115_s1 + $0x1758] sm:$0xff]   ;;  %v11490_v59 = vld [vmem:[%s14115_s1 + $0x1760] sm:$0xff]  }
 0x2c5   :  { %10539 = vmatpush3.bf16.msra.mxu1 %v11441_v60  ;;  %10518 = vmatprep.subr.bf16.mxu0 %v11442_v61  ;;  %v11491_v60 = vld [vmem:[%s14115_s1 + $0x17e0] sm:$0xff]  }
 0x2c6   :  { %10540 = vmatprep.subr.bf16.mxu1 %v11443_v62  ;;  %8355 = vmatprep.mubr.bf16.mxu0 %v8767_v39  ;;  %v11492_v62 = vld [vmem:[%s14115_s1 + $0x1720] sm:$0xff]  }
 0x2c7   :  { %8395 = vmatprep.mubr.bf16.mxu1 %v8769_v42 }
 0x2c8   :  { %10519 = vmatpush3.bf16.msra.mxu0 %v11444_v63 }
 0x2c9   :  { %10541 = vmatpush3.bf16.msra.mxu1 %v11445_v0  ;;  %10520 = vmatprep.subr.bf16.mxu0 %v11446_v1  ;;  %v11493_v0 = vld [vmem:[%s14115_s1 + $0x17a0] sm:$0xff]  }
 0x2ca   :  { %10542 = vmatprep.subr.bf16.mxu1 %v11447_v2 }
 0x2cc   :  { %10521 = vmatpush3.bf16.msra.mxu0 %v11448_v3  ;;  %v11494_v3 = vld [vmem:[%s14115_s1 + $0x1768] sm:$0xff]  }
 0x2cd   :  { %10543 = vmatpush3.bf16.msra.mxu1 %v11449_v4  ;;  %10522 = vmatprep.subr.bf16.mxu0 %v11450_v5 }
 0x2ce   :  { %10544 = vmatprep.subr.bf16.mxu1 %v11451_v6  ;;  %v11495_v6 = vld [vmem:[%s14115_s1 + $0x17e8] sm:$0xff]  }
 0x2d0   :  { %10523 = vmatpush3.bf16.msra.mxu0 %v11452_v7 }
 0x2d1   :  { %10545 = vmatpush3.bf16.msra.mxu1 %v11453_v8  ;;  %10524 = vmatprep.subr.bf16.mxu0 %v11454_v9  ;;  %v11496_v9 = vld [vmem:[%s14115_s1 + $0x1728] sm:$0xff]  }
 0x2d2   :  { %10546 = vmatprep.subr.bf16.mxu1 %v11455_v10 }
 0x2d4   :  { %10525 = vmatpush3.bf16.msra.mxu0 %v11456_v12 }
 0x2d5   :  { %10547 = vmatpush3.bf16.msra.mxu1 %v11457_v14  ;;  %10526 = vmatprep.subr.bf16.mxu0 %v11458_v17  ;;  %v11498_v14 = vld [vmem:[%s14115_s1 + $0x1770] sm:$0xff]  }
 0x2d6   :  { %v10224_v11 = vpop.f32.mrb[60].mxu0  ;;  %10548 = vmatprep.subr.bf16.mxu1 %v11459_v20  ;;  %v11500_v17 = vld [vmem:[%s14115_s1 + $0x1730] sm:$0xff]   ;;  %v11503_v20 = vld [vmem:[%s14115_s1 + $0x17f8] sm:$0xff]  }
 0x2d7   :  { %v10246_v13 = vpop.f32.mrb[60].mxu1  ;;  %v10225_v15 = vpop.f32.mrb[61].mxu0 }
 0x2d8   :  { %v10247_v16 = vpop.f32.mrb[61].mxu1  ;;  %v10226_v18 = vadd.f32 %v10225_v15, %v10224_v11  ;;  %v10227_v21 = vpop.f32.mrb[62].mxu0  ;;  %10527 = vmatpush3.bf16.msra.mxu0 %v11460_v23  ;;  %v11497_v11 = vld [vmem:[%s14115_s1 + $0x17a8] sm:$0xff]   ;;  %v74_v23 = vld [vmem:[%s14114_s0 + $0x170] sm:$0xff] }
 0x2d9   :  { %v10248_v19 = vadd.f32 %v10247_v16, %v10246_v13  ;;  %v10249_v22 = vpop.f32.mrb[62].mxu1  ;;  %v10228_v26 = vpop.f32.mrb[63].mxu0  ;;  %10549 = vmatpush3.bf16.msra.mxu1 %v11461_v25  ;;  %10528 = vmatprep.subr.bf16.mxu0 %v11462_v28  ;;  %v11499_v16 = vld [vmem:[%s14115_s1 + $0x17f0] sm:$0xff]   ;;  %v11504_v21 = vld [vmem:[%s14115_s1 + $0x1738] sm:$0xff]   ;;  %v8770_v25 = vcombine.low %v74_v23, %v74_v23 }
 0x2da   :  { %v7798_v24 = vadd.f32 %v10226_v18, %v13838_v41  ;;  %v10250_v27 = vpop.f32.mrb[63].mxu1  ;;  %10550 = vmatprep.subr.bf16.mxu1 %v11463_v30  ;;  %v8768_v41 = vcombine.low %v73_v40, %v73_v40  ;;  %v11501_v18 = vld [vmem:[%s14115_s1 + $0x17b0] sm:$0xff]   ;;  %v11505_v22 = vld [vmem:[%s14115_s1 + $0x17b8] sm:$0xff]   ;;  %v8771_v26 = vcombine.high %v74_v23, %v74_v23 }
 0x2dc   :  { %v13946_v29 = vadd.f32 %v10248_v19, %v7798_v24  ;;  %10529 = vmatpush3.bf16.msra.mxu0 %v11464_v31  ;;  %v11502_v19 = vld [vmem:[%s14115_s1 + $0x1778] sm:$0xff]  }
 0x2dd   :  { %10551 = vmatpush3.bf16.msra.mxu1 %v11465_v32  ;;  %10530 = vmatprep.subr.bf16.mxu0 %v11466_v33  ;;  %v75_v24 = vld [vmem:[%s14114_s0 + $0x178] sm:$0xff] }
 0x2de   :  { %10552 = vmatprep.subr.bf16.mxu1 %v11467_v34  ;;  %v8772_v27 = vcombine.low %v75_v24, %v75_v24  ;;  %v8773_v28 = vcombine.high %v75_v24, %v75_v24 }
 0x2e0   :  { %10531 = vmatpush3.bf16.msra.mxu0 %v11468_v35 }
 0x2e1   :  { %10553 = vmatpush3.bf16.msra.mxu1 %v11469_v36  ;;  %10560 = vmatprep.subr.bf16.mxu0 %v11474_v43 }
 0x2e2   :  { %10582 = vmatprep.subr.bf16.mxu1 %v11475_v44 }
 0x2e3   :  { %8356 = vmatmul.mubr.bf16.vlgmr.msra.gmra.mrb[88].mxu0 %v8766_v38 }
 0x2e4   :  { %8396 = vmatmul.mubr.bf16.vlgmr.msra.gmra.mrb[88].mxu1 %v8768_v41  ;;  %10561 = vmatpush3.bf16.msra.mxu0 %v11476_v45 }
 0x2e5   :  { %10583 = vmatpush3.bf16.msra.mxu1 %v11477_v46  ;;  %10562 = vmatprep.subr.bf16.mxu0 %v11478_v47 }
 0x2e6   :  { %10584 = vmatprep.subr.bf16.mxu1 %v11479_v48 }
 0x2e8   :  { %10563 = vmatpush3.bf16.msra.mxu0 %v11480_v49 }
 0x2e9   :  { %10585 = vmatpush3.bf16.msra.mxu1 %v11481_v50  ;;  %10564 = vmatprep.subr.bf16.mxu0 %v11482_v51 }
 0x2ea   :  { %10586 = vmatprep.subr.bf16.mxu1 %v11483_v52 }
 0x2ec   :  { %10565 = vmatpush3.bf16.msra.mxu0 %v11484_v53 }
 0x2ed   :  { %10587 = vmatpush3.bf16.msra.mxu1 %v11485_v54  ;;  %10566 = vmatprep.subr.bf16.mxu0 %v11486_v55 }
 0x2ee   :  { %10588 = vmatprep.subr.bf16.mxu1 %v11487_v56 }
 0x2f0   :  { %10567 = vmatpush3.bf16.msra.mxu0 %v11488_v57 }
 0x2f1   :  { %10589 = vmatpush3.bf16.msra.mxu1 %v11489_v58  ;;  %10568 = vmatprep.subr.bf16.mxu0 %v11490_v59 }
 0x2f2   :  { %10590 = vmatprep.subr.bf16.mxu1 %v11491_v60 }
 0x2f4   :  { %10569 = vmatpush3.bf16.msra.mxu0 %v11492_v62 }
 0x2f5   :  { %10591 = vmatpush3.bf16.msra.mxu1 %v11493_v0  ;;  %10570 = vmatprep.subr.bf16.mxu0 %v11494_v3 }
 0x2f6   :  { %v10268_v61 = vpop.f32.mrb[64].mxu0  ;;  %10592 = vmatprep.subr.bf16.mxu1 %v11495_v6 }
 0x2f7   :  { %v10290_v63 = vpop.f32.mrb[64].mxu1  ;;  %v10269_v1 = vpop.f32.mrb[65].mxu0 }
 0x2f8   :  { %v10291_v2 = vpop.f32.mrb[65].mxu1  ;;  %v10270_v4 = vadd.f32 %v10269_v1, %v10268_v61  ;;  %v10271_v7 = vpop.f32.mrb[66].mxu0  ;;  %10571 = vmatpush3.bf16.msra.mxu0 %v11496_v9 }
 0x2f9   :  { %v10292_v5 = vadd.f32 %v10291_v2, %v10290_v63  ;;  %v10293_v8 = vpop.f32.mrb[66].mxu1  ;;  %v10272_v12 = vpop.f32.mrb[67].mxu0  ;;  %10593 = vmatpush3.bf16.msra.mxu1 %v11497_v11  ;;  %10572 = vmatprep.subr.bf16.mxu0 %v11498_v14 }
 0x2fa   :  { %v7878_v10 = vadd.f32 %v10270_v4, %v13946_v29  ;;  %v10294_v13 = vpop.f32.mrb[67].mxu1  ;;  %10594 = vmatprep.subr.bf16.mxu1 %v11499_v16 }
 0x2fc   :  { %v7918_v15 = vadd.f32 %v10292_v5, %v7878_v10  ;;  %10573 = vmatpush3.bf16.msra.mxu0 %v11500_v17 }
 0x2fd   :  { %10595 = vmatpush3.bf16.msra.mxu1 %v11501_v18  ;;  %10574 = vmatprep.subr.bf16.mxu0 %v11502_v19 }
 0x2fe   :  { %10596 = vmatprep.subr.bf16.mxu1 %v11503_v20 }
 0x300   :  { %10575 = vmatpush3.bf16.msra.mxu0 %v11504_v21 }
 0x301   :  { %12 = vsyncpa [#allocation3], 0  ;;  %10597 = vmatpush3.bf16.msra.mxu1 %v11505_v22  ;;  %8435 = vmatprep.mubr.bf16.mxu0 %v8771_v26  ;;  %v8484_v63 = vld [vmem:[%s14117_s3] sm:$0xff]  ;;  %v8485_v0 = vld [vmem:[%s14117_s3 + $0x8] sm:$0xff]  ;;  %v11534_v3 = vmov 0.0|0.0   ;;  %vm8499_vm0 = vcmask 1040384  }
 0x302   :  { %8475 = vmatprep.mubr.bf16.mxu1 %v8773_v28  ;;  %v10631_v2 = vpack.c.bf16 %v8485_v0, %v8484_v63  ;;  %10630 = vmatprep.subr.bf16.mxu0 %v11534_v3  ;;  %v8486_v5 = vld [vmem:[%s14117_s3 + $0x10] sm:$0xff]  ;;  %v8487_v6 = vld [vmem:[%s14117_s3 + $0x18] sm:$0x1]  ;;  %vm11535_vm1 = vmmov 1   ;;  %vm11536_vm3 = vmmov 0   ;;  %v11537_v8 = vmov 0.0  }
 0x303   :  { %8436 = vmatmul.mubr.bf16.vlgmr.msra.gmra.mrb[92].mxu0 %v8770_v25  ;;  %10637 = vmatprep.subr.bf16.mxu1 %v11534_v3  ;;  %v10634_v7 = vpack.c.bf16 %v8487_v6, %v8486_v5  ;;  %vm10635_vm2 = vmpackc.low %vm8499_vm0, %vm11535_vm1  ;;  %v8574_v9 = vld [vmem:[%s14119_s5] sm:$0xff]  ;;  %v8575_v10 = vld [vmem:[%s14119_s5 + $0x8] sm:$0xf]  ;;  %vm8587_vm4 = vcmask 1043456   ;;  %vm8495_vm6 = vcmask 203776   ;;  %vm8583_vm7 = vcmask 97280  }
 0x304   :  { %8476 = vmatmul.mubr.bf16.vlgmr.msra.gmra.mrb[92].mxu1 %v8772_v27  ;;  %10632 = vmatpush3.bf16.msra.mxu0 %v10631_v2  ;;  %v10638_v11 = vpack.c.bf16 %v8575_v10, %v8574_v9  ;;  %vm10639_vm5 = vmpackc.low %vm8587_vm4, %vm11535_vm1  ;;  %v9545_v2 = vld [vmem:[%s14120_s6] ss:$0 sm:$0xff]  ;;  %s11538_s13 = smov [#allocation2]   ;;  %vm8661_vm8 = vcmask 48128  }
 0x305   :  { %10633 = vmatprep.subr.bf16.mxu0 %v11534_v3  ;;  %10620 = vmatprep.mubr.msk.f32.mxu0 %vm11536_vm3, %v11537_v8  ;;  %s8669_s14 = sshll.u32 %s11538_s13, 4  ;;  %s8670_s14 = int_to_ptr.vmem [resolvable:$true] %s8669_s14 }
 0x306   :  { %10627 = vmatprep.mubr.msk.f32.mxu1 %vm11536_vm3, %v11537_v8  ;;  %10640 = vmatpush3.bf16.msk.msra.mxu1 %vm10639_vm5, %v10638_v11  ;;  %s11510_s15 = scalar_lea.vmem %s8670_s14, 128  ;;  %p11515_p1 = scmp.lt.s32.totalorder %s8670_s14, %s8670_s14 }
 0x307   :  { %p11511_p0 = scmp.ne.s32.totalorder %s8670_s14, %s11510_s15  ;;  %p11516_p2 = scmp.lt.s32.totalorder %s11510_s15, %s11510_s15 }
 0x308   :  { %10636 = vmatpush3.bf16.msk.msra.mxu0 %vm10635_vm2, %v10634_v7 }
 0x309   :  { %p11517_p3 = por %p11516_p2, %p11515_p1 }
 0x30b   :  { %p11518_p4 = pnand %p11517_p3, %p11511_p0 }
 0x316   :  { %v10312_v29 = vpop.f32.mrb[68].mxu0 }
 0x317   :  { %v10334_v30 = vpop.f32.mrb[68].mxu1  ;;  %v10313_v31 = vpop.f32.mrb[69].mxu0 }
 0x318   :  { %v10314_v32 = vadd.f32 %v10313_v31, %v10312_v29  ;;  %v10335_v33 = vpop.f32.mrb[69].mxu1  ;;  %v10315_v34 = vpop.f32.mrb[70].mxu0 }
 0x319   :  { %v10336_v35 = vadd.f32 %v10335_v33, %v10334_v30  ;;  %v10337_v36 = vpop.f32.mrb[70].mxu1  ;;  %v10316_v37 = vpop.f32.mrb[71].mxu0 }
 0x31a   :  { %v7958_v38 = vadd.f32 %v10314_v32, %v7918_v15  ;;  %v10338_v39 = vpop.f32.mrb[71].mxu1 }
 0x31c   :  { %v7998_v40 = vadd.f32 %v10336_v35, %v7958_v38 }
 0x336   :  { %v10356_v41 = vpop.f32.mrb[72].mxu0 }
 0x337   :  { %v10378_v42 = vpop.f32.mrb[72].mxu1  ;;  %v10357_v43 = vpop.f32.mrb[73].mxu0 }
 0x338   :  { %v10358_v44 = vadd.f32 %v10357_v43, %v10356_v41  ;;  %v10379_v45 = vpop.f32.mrb[73].mxu1  ;;  %v10359_v46 = vpop.f32.mrb[74].mxu0 }
 0x339   :  { %v10380_v47 = vadd.f32 %v10379_v45, %v10378_v42  ;;  %v10381_v48 = vpop.f32.mrb[74].mxu1  ;;  %v10360_v49 = vpop.f32.mrb[75].mxu0 }
 0x33a   :  { %v8038_v50 = vadd.f32 %v10358_v44, %v7998_v40  ;;  %v10382_v51 = vpop.f32.mrb[75].mxu1 }
 0x33c   :  { %v8078_v52 = vadd.f32 %v10380_v47, %v8038_v50 }
 0x356   :  { %v10400_v53 = vpop.f32.mrb[76].mxu0 }
 0x357   :  { %v10422_v54 = vpop.f32.mrb[76].mxu1  ;;  %v10401_v55 = vpop.f32.mrb[77].mxu0 }
 0x358   :  { %v10423_v56 = vpop.f32.mrb[77].mxu1  ;;  %v10402_v57 = vadd.f32 %v10401_v55, %v10400_v53  ;;  %v10403_v59 = vpop.f32.mrb[78].mxu0 }
 0x359   :  { %v10424_v58 = vadd.f32 %v10423_v56, %v10422_v54  ;;  %v10425_v60 = vpop.f32.mrb[78].mxu1  ;;  %v10404_v61 = vpop.f32.mrb[79].mxu0 }
 0x35a   :  { %v10426_v62 = vpop.f32.mrb[79].mxu1  ;;  %v8118_v1 = vadd.f32 %v10402_v57, %v8078_v52  ;;  %v9542_v61 = vld [vmem:[%s14118_s4] ss:$0 sm:$0xff] }
 0x35c   :  { %v8158_v4 = vadd.f32 %v10424_v58, %v8118_v1 }
 0x376   :  { %v10444_v12 = vpop.f32.mrb[80].mxu0 }
 0x377   :  { %v10466_v13 = vpop.f32.mrb[80].mxu1  ;;  %v10445_v14 = vpop.f32.mrb[81].mxu0 }
 0x378   :  { %v10446_v15 = vadd.f32 %v10445_v14, %v10444_v12  ;;  %v10467_v16 = vpop.f32.mrb[81].mxu1  ;;  %v10447_v17 = vpop.f32.mrb[82].mxu0 }
 0x379   :  { %v10468_v18 = vadd.f32 %v10467_v16, %v10466_v13  ;;  %v10469_v19 = vpop.f32.mrb[82].mxu1  ;;  %v10448_v20 = vpop.f32.mrb[83].mxu0 }
 0x37a   :  { %v8198_v21 = vadd.f32 %v10446_v15, %v8158_v4  ;;  %v10470_v22 = vpop.f32.mrb[83].mxu1 }
 0x37c   :  { %v8238_v23 = vadd.f32 %v10468_v18, %v8198_v21 }
 0x396   :  { %v10488_v24 = vpop.f32.mrb[84].mxu0 }
 0x397   :  { %v10510_v25 = vpop.f32.mrb[84].mxu1  ;;  %v10489_v26 = vpop.f32.mrb[85].mxu0 }
 0x398   :  { %v10490_v27 = vadd.f32 %v10489_v26, %v10488_v24  ;;  %v10511_v28 = vpop.f32.mrb[85].mxu1  ;;  %v10491_v29 = vpop.f32.mrb[86].mxu0 }
 0x399   :  { %v10512_v30 = vadd.f32 %v10511_v28, %v10510_v25  ;;  %v10513_v31 = vpop.f32.mrb[86].mxu1  ;;  %v10492_v32 = vpop.f32.mrb[87].mxu0 }
 0x39a   :  { %v8278_v33 = vadd.f32 %v10490_v27, %v8238_v23  ;;  %v10514_v34 = vpop.f32.mrb[87].mxu1 }
 0x39c   :  { %v8318_v35 = vadd.f32 %v10512_v30, %v8278_v33 }
 0x3b6   :  { %v10532_v36 = vpop.f32.mrb[88].mxu0 }
 0x3b7   :  { %v10554_v37 = vpop.f32.mrb[88].mxu1  ;;  %v10533_v38 = vpop.f32.mrb[89].mxu0 }
 0x3b8   :  { %v10555_v39 = vpop.f32.mrb[89].mxu1  ;;  %v10534_v40 = vadd.f32 %v10533_v38, %v10532_v36  ;;  %v10535_v42 = vpop.f32.mrb[90].mxu0 }
 0x3b9   :  { %v10556_v41 = vadd.f32 %v10555_v39, %v10554_v37  ;;  %v10557_v43 = vpop.f32.mrb[90].mxu1  ;;  %v10536_v44 = vpop.f32.mrb[91].mxu0 }
 0x3ba   :  { %v10558_v45 = vpop.f32.mrb[91].mxu1  ;;  %v8358_v46 = vadd.f32 %v10534_v40, %v8318_v35 }
 0x3bc   :  { %v8398_v47 = vadd.f32 %v10556_v41, %v8358_v46 }
 0x3d6   :  { %v10576_v48 = vpop.f32.mrb[92].mxu0 }
 0x3d7   :  { %v10598_v49 = vpop.f32.mrb[92].mxu1  ;;  %v10577_v50 = vpop.f32.mrb[93].mxu0 }
 0x3d8   :  { %v10578_v51 = vadd.f32 %v10577_v50, %v10576_v48  ;;  %v10599_v52 = vpop.f32.mrb[93].mxu1  ;;  %v10579_v53 = vpop.f32.mrb[94].mxu0 }
 0x3d9   :  { %v10600_v54 = vadd.f32 %v10599_v52, %v10598_v49  ;;  %v10601_v55 = vpop.f32.mrb[94].mxu1  ;;  %v10580_v56 = vpop.f32.mrb[95].mxu0 }
 0x3da   :  { %v8438_v57 = vadd.f32 %v10578_v51, %v8398_v47  ;;  %v10602_v58 = vpop.f32.mrb[95].mxu1 }
 0x3dc   :  { %v8478_v59 = vadd.f32 %v10600_v54, %v8438_v57 }
 0x3de   :  { %v8483_v60 = vmax.f32 %v8478_v59, 0.0 }
 0x3e0   :  { %10621 = vmatmul.mubr.msk.f32.vlgmr.msra.gmra.mrb[96].mxu0 %vm8495_vm6, %v8483_v60 }
 0x4b3   :  { %v8569_v62 = vpop.f32.mrb[96].mxu0 }
 0x4b4   :  { %v8570_v63 = vadd.f32 %v9542_v61, %v8569_v62  ;;  %v10622_v0 = vpop.f32.mrb[97].mxu0 }
 0x4b6   :  { %v8573_v1 = vmax.f32 %v8570_v63, 0.0 }
 0x4b8   :  { %10628 = vmatmul.mubr.msk.f32.vlgmr.msra.gmra.mrb[96].mxu1 %vm8583_vm7, %v8573_v1 }
 0x58b   :  { %v8657_v3 = vpop.f32.mrb[96].mxu1 }
 0x58c   :  { %v8658_v4 = vadd.f32 %v9545_v2, %v8657_v3  ;;  %v10629_v5 = vpop.f32.mrb[97].mxu1 }
 0x58e   :  { %8662 = vst.msk [vmem:[#allocation2] sm:$0xff] %vm8661_vm8, %v8658_v4 }
 0x58f   :  { %11521 = shalt.err (!%p11518_p4)
}
 0x590   :  { %s11522_s17 = scalar_lea.hbm %s14121_s7, 128 }
 0x591   :  { %p11523_p5 = scmp.ne.s32.totalorder %s14121_s7, %s11522_s17  ;;  %p11526_p6 = scmp.lt.u32.totalorder %s11522_s17, %s14121_s7 }
 0x593   :  { %p11528_p7 = pnand %p11526_p6, %p11523_p5 }
 0x595   :  { %11531 = shalt.err (!%p11528_p7)
}
 0x596   :  { %8672 = dma.vmem_to_hbm [thread:$0]  %s8670_s14, 128, %s14121_s7, [#allocation3]  }
 0x597   :  { %11532 = dma.done.wait [#allocation3], 128  }
 0x598   :  { %11533 = vsyncadd [#allocation3], 4294967168 }
 0x599   :  { %8676 = vsyncpa [#allocation3], 1 }

</bundles_post_ra>
